<compile_context>
chip_gen: v7x
topology: tpu7x:2x2x1
jax: 0.10.0
libtpu: 0.0.40
codegen_flags: <defaults>
</compile_context>

<pallas_src>
import functools

import jax
import jax.numpy as jnp
from jax.experimental import pallas as pl
from jax.experimental.pallas import tpu as pltpu


# ----------------------------------------------------------------------------
# Fused kernel: cv1 (1x1 + folded BN + SiLU) -> cv2 (5x5 + folded BN + SiLU)
# -> channel concat, whole batch in one invocation, lane-flat spatial layout.
# ----------------------------------------------------------------------------
def _ghost_conv_kernel(w1_ref, b1_ref, w2_ref, b2_ref,        # SMEM params
                       x_ref, mask_ref,                        # VMEM inputs
                       o_ref,                                  # VMEM output (n*c2, hp*wp)
                       sp_ref,                                 # VMEM scratch (c_*n, padlen)
                       *, n, c1, c_, h, w, pad1, pad2, k2):
    hw = h * w
    hp, wp = h + 2 * pad1, w + 2 * pad1            # cv1 output spatial      (18, 18)
    hpp, wpp = hp + 2 * pad2, wp + 2 * pad2        # cv2 zero-halo'd spatial (22, 22)
    padlen = sp_ref.shape[-1]                      # lane-padded flat plane length (512)
    anchor = pad2 * wpp + pad2                     # flat index of y[0, 0] in the halo'd plane
    accl = (hp - 1) * wpp + wp                     # window length covering all outputs (392)

    def silu(v):
        return v * jax.nn.sigmoid(v)               # sigmoid -> EUP slot, no explicit divide

    # ---- cv1: 1x1 conv channel mix (BN scale pre-folded into w1) ------------
    xv = x_ref[...].reshape(n, c1, hw)             # (n, c1, h*w), lane-dense
    xch = [xv[:, ci, :] for ci in range(c1)]       # hoisted per-channel (n, h*w) slabs
    s_planes = []
    for m in range(c_):                            # plane order: m-major, then batch
        acc = w1_ref[m * c1] * xch[0]
        for ci in range(1, c1):
            acc = acc + w1_ref[m * c1 + ci] * xch[ci]
        s_planes.append(acc)
    s_val = jnp.concatenate(s_planes, axis=0)      # (c_*n, h*w), pre-bias conv1 result

    # ---- re-stride the cv1 result into the cv2 halo'd flat plane ------------
    # sp holds conv1(x) at the interior positions; everything else stays 0.
    sp_ref[...] = jnp.zeros(sp_ref.shape, sp_ref.dtype)        # 8 KB, negligible
    row0 = anchor + pad1 * wpp + pad1
    for r in range(h):
        dst = row0 + r * wpp
        sp_ref[:, dst:dst + w] = s_val[:, r * w:(r + 1) * w]

    # ---- bias + SiLU + mask: y with its constant silu(b1) pad ring AND the
    #      cv2 zero halo in one shot (no xpad scratch, no explicit ring writes)
    spv = sp_ref[...]                                          # (c_*n, padlen)
    maskv = mask_ref[...]                                      # (1, padlen), hoisted
    ypad = [silu(spv[m * n:(m + 1) * n, :] + b1_ref[m]) * maskv
            for m in range(c_)]                                # c_ x (n, padlen)

    # ---- cv2: 5x5 conv as static lane-offset windows + scalar MACs ----------
    # Tap (kh, kw) reads the window [kh*wpp + kw : + accl] of the flat plane.
    # 3 kh-groups x c_ output channels = 6 independent accumulators (ILP).
    ngrp = 3
    acc = [[None] * c_ for _ in range(ngrp)]
    for kh in range(k2):
        g = kh % ngrp
        for kw in range(k2):
            start = kh * wpp + kw
            rm = [ypad[m][:, start:start + accl] for m in range(c_)]   # (n, accl)
            for co in range(c_):
                t = w2_ref[((co * c_) * k2 + kh) * k2 + kw] * rm[0]
                for ci in range(1, c_):
                    t = t + w2_ref[((co * c_ + ci) * k2 + kh) * k2 + kw] * rm[ci]
                acc[g][co] = t if acc[g][co] is None else acc[g][co] + t
    z = []
    for co in range(c_):
        parts = [a[co] for a in acc if a[co] is not None]
        while len(parts) > 1:                                  # tree-combine partials
            nxt = [parts[i] + parts[i + 1] for i in range(0, len(parts) - 1, 2)]
            if len(parts) % 2:
                nxt.append(parts[-1])
            parts = nxt
        z.append(silu(parts[0] + b2_ref[co]))                  # bias added once at the end

    # ---- extract the (hp, wp) planes from the 22-stride windows and emit the
    #      whole lane-dense output block with a single store ------------------
    ys = [yp[:, anchor:anchor + accl] for yp in ypad]          # y planes, same anchoring as z
    stack = jnp.concatenate(ys + z, axis=0)                    # (2*c_*n, accl)
    cols = [stack[:, r * wpp:r * wpp + wp] for r in range(hp)]
    ex = jnp.concatenate(cols, axis=1)                         # (2*c_*n, hp*wp)
    order = []
    for b in range(n):                                         # (batch, [y..., z...]) row order
        order += [m * n + b for m in range(c_)]
        order += [c_ * n + co * n + b for co in range(c_)]
    o_ref[...] = jnp.concatenate([ex[i:i + 1, :] for i in order], axis=0)


# ----------------------------------------------------------------------------
# Wrapper: folds BN scale into weights, builds the (free) lane-dense layouts,
# issues ONE pallas_call, reshapes back to NCHW.
# ----------------------------------------------------------------------------
def ghost_conv_forward(x_nchw, params):
    """GhostConv forward with k=1, s=1, g=1 (the module defaults)."""
    n, c1, h, w = x_nchw.shape
    pad1 = int(params["pad1"])
    pad2 = int(params["pad2"])
    c_ = params["scale1"].shape[0]
    c2 = 2 * c_
    k2 = 5
    hp, wp = h + 2 * pad1, w + 2 * pad1
    hpp, wpp = hp + 2 * pad2, wp + 2 * pad2
    # concat only shape-checks when cv2 preserves spatial dims: pad2 == 2 (c_ == 2)
    assert hpp - k2 + 1 == hp, "GhostConv (as written) requires c2 == 4"
    padlen = ((hpp * wpp + 127) // 128) * 128

    f32 = jnp.float32
    # Fold inference-BN scale into the conv weights; biases stay separate.
    ws1 = (params["w1_oihw"][:, :, 0, 0] * params["scale1"][:, None]).reshape(-1).astype(f32)
    ws2 = (params["w2_oihw"] * params["scale2"][:, None, None, None]).reshape(-1).astype(f32)
    b1 = params["bias1"].astype(f32)
    b2 = params["bias2"].astype(f32)

    # Constant mask of the y-region inside the cv2-halo'd flat plane: zeros give
    # cv2's zero padding; inside, silu(0 + b1) reproduces cv1's constant pad ring.
    q = jnp.arange(padlen)
    i2, j2 = q // wpp, q % wpp
    mask = (((q < hpp * wpp)
             & (i2 >= pad2) & (i2 < pad2 + hp)
             & (j2 >= pad2) & (j2 < pad2 + wp)).astype(f32))[None, :]

    # Lane-dense input layout (free row-major reshape).
    x_flat = x_nchw.reshape(n * c1, h * w).astype(f32)

    kernel = functools.partial(_ghost_conv_kernel, n=n, c1=c1, c_=c_, h=h, w=w,
                               pad1=pad1, pad2=pad2, k2=k2)
    smem = pl.BlockSpec(memory_space=pltpu.MemorySpace.SMEM)
    vmem = pl.BlockSpec(memory_space=pltpu.MemorySpace.VMEM)

    out_flat = pl.pallas_call(
        kernel,
        out_shape=jax.ShapeDtypeStruct((n * c2, hp * wp), f32),
        in_specs=[smem, smem, smem, smem, vmem, vmem],
        out_specs=vmem,
        scratch_shapes=[pltpu.VMEM((c_ * n, padlen), f32)],
        # Single invocation (grid = ()): batch is merged onto sublanes.  No
        # per-step grid overhead on single-TC v5e/v6e; dual-TC sharding on v7x
        # is net-neutral at this size per the review.
        compiler_params=pltpu.CompilerParams(vmem_limit_bytes=8 * 1024 * 1024),
    )(ws1, b1, ws2, b2, x_flat, mask)

    return out_flat.reshape(n, c2, hp, wp)


# ----------------------------------------------------------------------------
# Pure-JAX reference (lax.conv) for verification
# ----------------------------------------------------------------------------
def ghost_conv_reference(x_nchw, params):
    def conv(x, w_oihw, pad):
        return jax.lax.conv_general_dilated(
            x, w_oihw, (1, 1), [(pad, pad), (pad, pad)],
            dimension_numbers=("NCHW", "OIHW", "NCHW"),
            precision=jax.lax.Precision.HIGHEST)

    def bn_silu(x, scale, bias):
        yy = x * scale[None, :, None, None] + bias[None, :, None, None]
        return yy * jax.nn.sigmoid(yy)

    y = bn_silu(conv(x_nchw, params["w1_oihw"], params["pad1"]),
                params["scale1"], params["bias1"])
    zz = bn_silu(conv(y, params["w2_oihw"], params["pad2"]),
                 params["scale2"], params["bias2"])
    return jnp.concatenate([y, zz], axis=1)


# ----------------------------------------------------------------------------
# Deterministic synthetic parameters
# ----------------------------------------------------------------------------
def make_params(key, c1, c2, g=1, eps=1e-5):
    c_ = c2 // 2
    ks = jax.random.split(key, 10)
    w1_oihw = 0.3 * jax.random.normal(ks[0], (c_, c1, 1, 1), jnp.float32)
    w2_oihw = 0.1 * jax.random.normal(ks[1], (c_, c_, 5, 5), jnp.float32)

    def bn(k_g, k_b, k_m, k_v, c):
        gamma = 1.0 + 0.2 * jax.random.normal(k_g, (c,), jnp.float32)
        beta = 0.1 * jax.random.normal(k_b, (c,), jnp.float32)
        mean = 0.1 * jax.random.normal(k_m, (c,), jnp.float32)
        var = 0.5 + jax.random.uniform(k_v, (c,), jnp.float32)
        scale = gamma / jnp.sqrt(var + eps)
        bias = beta - mean * scale
        return scale, bias

    scale1, bias1 = bn(ks[2], ks[3], ks[4], ks[5], c_)
    scale2, bias2 = bn(ks[6], ks[7], ks[8], ks[9], c_)

    return dict(
        w1_oihw=w1_oihw, w2_oihw=w2_oihw,
        scale1=scale1, bias1=bias1, scale2=scale2, bias2=bias2,
        pad1=g,          # autopad(k=1, p=g) == g    (argument-shift semantics)
        pad2=c_,         # autopad(5,  p=c_) == c_   (argument-shift semantics)
    )


if __name__ == "__main__":
    key = jax.random.PRNGKey(0)
    k_x, k_p = jax.random.split(key)

    N, C1, H, W = 2, 4, 16, 16
    C2 = 4  # c_ = 2: the only configuration where the reference forward shape-checks
    x = jax.random.normal(k_x, (N, C1, H, W), jnp.float32)
    params = make_params(k_p, C1, C2)

    out = jax.block_until_ready(ghost_conv_forward(x, params))

    ref = ghost_conv_reference(x, params)
    assert out.shape == ref.shape == (N, C2, H + 2, W + 2), (out.shape, ref.shape)
    err = float(jnp.max(jnp.abs(out - ref)))
    assert err < 5e-3, err

    print("KERNEL_OK")
</pallas_src>

<mosaic_0001>
module attributes {stable_mosaic.version = 11 : i64} {
  func.func @_ghost_conv_kernel(%arg0: memref<8xf32, #tpu.memory_space<smem>>, %arg1: memref<2xf32, #tpu.memory_space<smem>>, %arg2: memref<100xf32, #tpu.memory_space<smem>>, %arg3: memref<2xf32, #tpu.memory_space<smem>>, %arg4: memref<8x256xf32, #tpu.memory_space<vmem>>, %arg5: memref<1x512xf32, #tpu.memory_space<vmem>>, %arg6: memref<8x324xf32, #tpu.memory_space<vmem>>, %arg7: memref<4x512xf32, #tpu.memory_space<vmem>>) attributes {dimension_semantics = [], scalar_prefetch = 0 : i64, scratch_operands = 1 : i64, tpu.core_type = #tpu.core_type<tc>} {
    %c0 = arith.constant 0 : index
    %c0_0 = arith.constant 0 : index
    %0 = vector.load %arg4[%c0, %c0_0] : memref<8x256xf32, #tpu.memory_space<vmem>>, vector<8x256xf32>
    %1 = vector.shape_cast %0 : vector<8x256xf32> to vector<2x4x256xf32>
    %2 = vector.extract_strided_slice %1 {offsets = [0, 0, 0], sizes = [2, 1, 256], strides = [1, 1, 1]} : vector<2x4x256xf32> to vector<2x1x256xf32>
    %3 = vector.shape_cast %2 : vector<2x1x256xf32> to vector<2x256xf32>
    %4 = vector.extract_strided_slice %1 {offsets = [0, 1, 0], sizes = [2, 1, 256], strides = [1, 1, 1]} : vector<2x4x256xf32> to vector<2x1x256xf32>
    %5 = vector.shape_cast %4 : vector<2x1x256xf32> to vector<2x256xf32>
    %6 = vector.extract_strided_slice %1 {offsets = [0, 2, 0], sizes = [2, 1, 256], strides = [1, 1, 1]} : vector<2x4x256xf32> to vector<2x1x256xf32>
    %7 = vector.shape_cast %6 : vector<2x1x256xf32> to vector<2x256xf32>
    %8 = vector.extract_strided_slice %1 {offsets = [0, 3, 0], sizes = [2, 1, 256], strides = [1, 1, 1]} : vector<2x4x256xf32> to vector<2x1x256xf32>
    %9 = vector.shape_cast %8 : vector<2x1x256xf32> to vector<2x256xf32>
    %c0_1 = arith.constant 0 : index
    %10 = memref.load %arg0[%c0_1] : memref<8xf32, #tpu.memory_space<smem>>
    %11 = vector.broadcast %10 : f32 to vector<2x256xf32>
    %12 = arith.mulf %11, %3 : vector<2x256xf32>
    %c1 = arith.constant 1 : index
    %13 = memref.load %arg0[%c1] : memref<8xf32, #tpu.memory_space<smem>>
    %14 = vector.broadcast %13 : f32 to vector<2x256xf32>
    %15 = arith.mulf %14, %5 : vector<2x256xf32>
    %16 = arith.addf %12, %15 : vector<2x256xf32>
    %c2 = arith.constant 2 : index
    %17 = memref.load %arg0[%c2] : memref<8xf32, #tpu.memory_space<smem>>
    %18 = vector.broadcast %17 : f32 to vector<2x256xf32>
    %19 = arith.mulf %18, %7 : vector<2x256xf32>
    %20 = arith.addf %16, %19 : vector<2x256xf32>
    %c3 = arith.constant 3 : index
    %21 = memref.load %arg0[%c3] : memref<8xf32, #tpu.memory_space<smem>>
    %22 = vector.broadcast %21 : f32 to vector<2x256xf32>
    %23 = arith.mulf %22, %9 : vector<2x256xf32>
    %24 = arith.addf %20, %23 : vector<2x256xf32>
    %c4 = arith.constant 4 : index
    %25 = memref.load %arg0[%c4] : memref<8xf32, #tpu.memory_space<smem>>
    %26 = vector.broadcast %25 : f32 to vector<2x256xf32>
    %27 = arith.mulf %26, %3 : vector<2x256xf32>
    %c5 = arith.constant 5 : index
    %28 = memref.load %arg0[%c5] : memref<8xf32, #tpu.memory_space<smem>>
    %29 = vector.broadcast %28 : f32 to vector<2x256xf32>
    %30 = arith.mulf %29, %5 : vector<2x256xf32>
    %31 = arith.addf %27, %30 : vector<2x256xf32>
    %c6 = arith.constant 6 : index
    %32 = memref.load %arg0[%c6] : memref<8xf32, #tpu.memory_space<smem>>
    %33 = vector.broadcast %32 : f32 to vector<2x256xf32>
    %34 = arith.mulf %33, %7 : vector<2x256xf32>
    %35 = arith.addf %31, %34 : vector<2x256xf32>
    %c7 = arith.constant 7 : index
    %36 = memref.load %arg0[%c7] : memref<8xf32, #tpu.memory_space<smem>>
    %37 = vector.broadcast %36 : f32 to vector<2x256xf32>
    %38 = arith.mulf %37, %9 : vector<2x256xf32>
    %39 = arith.addf %35, %38 : vector<2x256xf32>
    %40 = tpu.concatenate %24, %39 in 0 : vector<2x256xf32>, vector<2x256xf32> -> vector<4x256xf32>
    %cst = arith.constant 0.000000e+00 : f32
    %41 = vector.broadcast %cst : f32 to vector<4x512xf32>
    %c0_2 = arith.constant 0 : index
    %c0_3 = arith.constant 0 : index
    %42 = vector.load %arg7[%c0_2, %c0_3] : memref<4x512xf32, #tpu.memory_space<vmem>>, vector<4x512xf32>
    tpu.vector_store %arg7[%c0_2, %c0_3], %41 {strides = array<i32>} : memref<4x512xf32, #tpu.memory_space<vmem>>, vector<4x512xf32>,
    %43 = vector.extract_strided_slice %40 {offsets = [0, 0], sizes = [4, 16], strides = [1, 1]} : vector<4x256xf32> to vector<4x16xf32>
    %c0_4 = arith.constant 0 : index
    %c69 = arith.constant 69 : index
    %44 = vector.load %arg7[%c0_4, %c69] : memref<4x512xf32, #tpu.memory_space<vmem>>, vector<4x16xf32>
    tpu.vector_store %arg7[%c0_4, %c69], %43 {strides = array<i32>} : memref<4x512xf32, #tpu.memory_space<vmem>>, vector<4x16xf32>,
    %45 = vector.extract_strided_slice %40 {offsets = [0, 16], sizes = [4, 16], strides = [1, 1]} : vector<4x256xf32> to vector<4x16xf32>
    %c0_5 = arith.constant 0 : index
    %c91 = arith.constant 91 : index
    %46 = vector.load %arg7[%c0_5, %c91] : memref<4x512xf32, #tpu.memory_space<vmem>>, vector<4x16xf32>
    tpu.vector_store %arg7[%c0_5, %c91], %45 {strides = array<i32>} : memref<4x512xf32, #tpu.memory_space<vmem>>, vector<4x16xf32>,
    %47 = vector.extract_strided_slice %40 {offsets = [0, 32], sizes = [4, 16], strides = [1, 1]} : vector<4x256xf32> to vector<4x16xf32>
    %c0_6 = arith.constant 0 : index
    %c113 = arith.constant 113 : index
    %48 = vector.load %arg7[%c0_6, %c113] : memref<4x512xf32, #tpu.memory_space<vmem>>, vector<4x16xf32>
    tpu.vector_store %arg7[%c0_6, %c113], %47 {strides = array<i32>} : memref<4x512xf32, #tpu.memory_space<vmem>>, vector<4x16xf32>,
    %49 = vector.extract_strided_slice %40 {offsets = [0, 48], sizes = [4, 16], strides = [1, 1]} : vector<4x256xf32> to vector<4x16xf32>
    %c0_7 = arith.constant 0 : index
    %c135 = arith.constant 135 : index
    %50 = vector.load %arg7[%c0_7, %c135] : memref<4x512xf32, #tpu.memory_space<vmem>>, vector<4x16xf32>
    tpu.vector_store %arg7[%c0_7, %c135], %49 {strides = array<i32>} : memref<4x512xf32, #tpu.memory_space<vmem>>, vector<4x16xf32>,
    %51 = vector.extract_strided_slice %40 {offsets = [0, 64], sizes = [4, 16], strides = [1, 1]} : vector<4x256xf32> to vector<4x16xf32>
    %c0_8 = arith.constant 0 : index
    %c157 = arith.constant 157 : index
    %52 = vector.load %arg7[%c0_8, %c157] : memref<4x512xf32, #tpu.memory_space<vmem>>, vector<4x16xf32>
    tpu.vector_store %arg7[%c0_8, %c157], %51 {strides = array<i32>} : memref<4x512xf32, #tpu.memory_space<vmem>>, vector<4x16xf32>,
    %53 = vector.extract_strided_slice %40 {offsets = [0, 80], sizes = [4, 16], strides = [1, 1]} : vector<4x256xf32> to vector<4x16xf32>
    %c0_9 = arith.constant 0 : index
    %c179 = arith.constant 179 : index
    %54 = vector.load %arg7[%c0_9, %c179] : memref<4x512xf32, #tpu.memory_space<vmem>>, vector<4x16xf32>
    tpu.vector_store %arg7[%c0_9, %c179], %53 {strides = array<i32>} : memref<4x512xf32, #tpu.memory_space<vmem>>, vector<4x16xf32>,
    %55 = vector.extract_strided_slice %40 {offsets = [0, 96], sizes = [4, 16], strides = [1, 1]} : vector<4x256xf32> to vector<4x16xf32>
    %c0_10 = arith.constant 0 : index
    %c201 = arith.constant 201 : index
    %56 = vector.load %arg7[%c0_10, %c201] : memref<4x512xf32, #tpu.memory_space<vmem>>, vector<4x16xf32>
    tpu.vector_store %arg7[%c0_10, %c201], %55 {strides = array<i32>} : memref<4x512xf32, #tpu.memory_space<vmem>>, vector<4x16xf32>,
    %57 = vector.extract_strided_slice %40 {offsets = [0, 112], sizes = [4, 16], strides = [1, 1]} : vector<4x256xf32> to vector<4x16xf32>
    %c0_11 = arith.constant 0 : index
    %c223 = arith.constant 223 : index
    %58 = vector.load %arg7[%c0_11, %c223] : memref<4x512xf32, #tpu.memory_space<vmem>>, vector<4x16xf32>
    tpu.vector_store %arg7[%c0_11, %c223], %57 {strides = array<i32>} : memref<4x512xf32, #tpu.memory_space<vmem>>, vector<4x16xf32>,
    %59 = vector.extract_strided_slice %40 {offsets = [0, 128], sizes = [4, 16], strides = [1, 1]} : vector<4x256xf32> to vector<4x16xf32>
    %c0_12 = arith.constant 0 : index
    %c245 = arith.constant 245 : index
    %60 = vector.load %arg7[%c0_12, %c245] : memref<4x512xf32, #tpu.memory_space<vmem>>, vector<4x16xf32>
    tpu.vector_store %arg7[%c0_12, %c245], %59 {strides = array<i32>} : memref<4x512xf32, #tpu.memory_space<vmem>>, vector<4x16xf32>,
    %61 = vector.extract_strided_slice %40 {offsets = [0, 144], sizes = [4, 16], strides = [1, 1]} : vector<4x256xf32> to vector<4x16xf32>
    %c0_13 = arith.constant 0 : index
    %c267 = arith.constant 267 : index
    %62 = vector.load %arg7[%c0_13, %c267] : memref<4x512xf32, #tpu.memory_space<vmem>>, vector<4x16xf32>
    tpu.vector_store %arg7[%c0_13, %c267], %61 {strides = array<i32>} : memref<4x512xf32, #tpu.memory_space<vmem>>, vector<4x16xf32>,
    %63 = vector.extract_strided_slice %40 {offsets = [0, 160], sizes = [4, 16], strides = [1, 1]} : vector<4x256xf32> to vector<4x16xf32>
    %c0_14 = arith.constant 0 : index
    %c289 = arith.constant 289 : index
    %64 = vector.load %arg7[%c0_14, %c289] : memref<4x512xf32, #tpu.memory_space<vmem>>, vector<4x16xf32>
    tpu.vector_store %arg7[%c0_14, %c289], %63 {strides = array<i32>} : memref<4x512xf32, #tpu.memory_space<vmem>>, vector<4x16xf32>,
    %65 = vector.extract_strided_slice %40 {offsets = [0, 176], sizes = [4, 16], strides = [1, 1]} : vector<4x256xf32> to vector<4x16xf32>
    %c0_15 = arith.constant 0 : index
    %c311 = arith.constant 311 : index
    %66 = vector.load %arg7[%c0_15, %c311] : memref<4x512xf32, #tpu.memory_space<vmem>>, vector<4x16xf32>
    tpu.vector_store %arg7[%c0_15, %c311], %65 {strides = array<i32>} : memref<4x512xf32, #tpu.memory_space<vmem>>, vector<4x16xf32>,
    %67 = vector.extract_strided_slice %40 {offsets = [0, 192], sizes = [4, 16], strides = [1, 1]} : vector<4x256xf32> to vector<4x16xf32>
    %c0_16 = arith.constant 0 : index
    %c333 = arith.constant 333 : index
    %68 = vector.load %arg7[%c0_16, %c333] : memref<4x512xf32, #tpu.memory_space<vmem>>, vector<4x16xf32>
    tpu.vector_store %arg7[%c0_16, %c333], %67 {strides = array<i32>} : memref<4x512xf32, #tpu.memory_space<vmem>>, vector<4x16xf32>,
    %69 = vector.extract_strided_slice %40 {offsets = [0, 208], sizes = [4, 16], strides = [1, 1]} : vector<4x256xf32> to vector<4x16xf32>
    %c0_17 = arith.constant 0 : index
    %c355 = arith.constant 355 : index
    %70 = vector.load %arg7[%c0_17, %c355] : memref<4x512xf32, #tpu.memory_space<vmem>>, vector<4x16xf32>
    tpu.vector_store %arg7[%c0_17, %c355], %69 {strides = array<i32>} : memref<4x512xf32, #tpu.memory_space<vmem>>, vector<4x16xf32>,
    %71 = vector.extract_strided_slice %40 {offsets = [0, 224], sizes = [4, 16], strides = [1, 1]} : vector<4x256xf32> to vector<4x16xf32>
    %c0_18 = arith.constant 0 : index
    %c377 = arith.constant 377 : index
    %72 = vector.load %arg7[%c0_18, %c377] : memref<4x512xf32, #tpu.memory_space<vmem>>, vector<4x16xf32>
    tpu.vector_store %arg7[%c0_18, %c377], %71 {strides = array<i32>} : memref<4x512xf32, #tpu.memory_space<vmem>>, vector<4x16xf32>,
    %73 = vector.extract_strided_slice %40 {offsets = [0, 240], sizes = [4, 16], strides = [1, 1]} : vector<4x256xf32> to vector<4x16xf32>
    %c0_19 = arith.constant 0 : index
    %c399 = arith.constant 399 : index
    %74 = vector.load %arg7[%c0_19, %c399] : memref<4x512xf32, #tpu.memory_space<vmem>>, vector<4x16xf32>
    tpu.vector_store %arg7[%c0_19, %c399], %73 {strides = array<i32>} : memref<4x512xf32, #tpu.memory_space<vmem>>, vector<4x16xf32>,
    %c0_20 = arith.constant 0 : index
    %c0_21 = arith.constant 0 : index
    %75 = vector.load %arg7[%c0_20, %c0_21] : memref<4x512xf32, #tpu.memory_space<vmem>>, vector<4x512xf32>
    %c0_22 = arith.constant 0 : index
    %c0_23 = arith.constant 0 : index
    %76 = vector.load %arg5[%c0_22, %c0_23] : memref<1x512xf32, #tpu.memory_space<vmem>>, vector<1x512xf32>
    %77 = vector.extract_strided_slice %75 {offsets = [0, 0], sizes = [2, 512], strides = [1, 1]} : vector<4x512xf32> to vector<2x512xf32>
    %c0_24 = arith.constant 0 : index
    %78 = memref.load %arg1[%c0_24] : memref<2xf32, #tpu.memory_space<smem>>
    %79 = vector.broadcast %78 : f32 to vector<2x512xf32>
    %80 = arith.addf %77, %79 : vector<2x512xf32>
    %81 = arith.negf %80 : vector<2x512xf32>
    %82 = math.exp %81 : vector<2x512xf32>
    %cst_25 = arith.constant 1.000000e+00 : f32
    %83 = vector.broadcast %cst_25 : f32 to vector<2x512xf32>
    %84 = arith.addf %83, %82 : vector<2x512xf32>
    %85 = arith.divf %83, %84 : vector<2x512xf32>
    %86 = arith.mulf %80, %85 : vector<2x512xf32>
    %87 = vector.broadcast %76 : vector<1x512xf32> to vector<2x512xf32>
    %88 = arith.mulf %86, %87 : vector<2x512xf32>
    %89 = vector.extract_strided_slice %75 {offsets = [2, 0], sizes = [2, 512], strides = [1, 1]} : vector<4x512xf32> to vector<2x512xf32>
    %c1_26 = arith.constant 1 : index
    %90 = memref.load %arg1[%c1_26] : memref<2xf32, #tpu.memory_space<smem>>
    %91 = vector.broadcast %90 : f32 to vector<2x512xf32>
    %92 = arith.addf %89, %91 : vector<2x512xf32>
    %93 = arith.negf %92 : vector<2x512xf32>
    %94 = math.exp %93 : vector<2x512xf32>
    %cst_27 = arith.constant 1.000000e+00 : f32
    %95 = vector.broadcast %cst_27 : f32 to vector<2x512xf32>
    %96 = arith.addf %95, %94 : vector<2x512xf32>
    %97 = arith.divf %95, %96 : vector<2x512xf32>
    %98 = arith.mulf %92, %97 : vector<2x512xf32>
    %99 = vector.broadcast %76 : vector<1x512xf32> to vector<2x512xf32>
    %100 = arith.mulf %98, %99 : vector<2x512xf32>
    %101 = vector.extract_strided_slice %88 {offsets = [0, 0], sizes = [2, 392], strides = [1, 1]} : vector<2x512xf32> to vector<2x392xf32>
    %102 = vector.extract_strided_slice %100 {offsets = [0, 0], sizes = [2, 392], strides = [1, 1]} : vector<2x512xf32> to vector<2x392xf32>
    %c0_28 = arith.constant 0 : index
    %103 = memref.load %arg2[%c0_28] : memref<100xf32, #tpu.memory_space<smem>>
    %104 = vector.broadcast %103 : f32 to vector<2x392xf32>
    %105 = arith.mulf %104, %101 : vector<2x392xf32>
    %c25 = arith.constant 25 : index
    %106 = memref.load %arg2[%c25] : memref<100xf32, #tpu.memory_space<smem>>
    %107 = vector.broadcast %106 : f32 to vector<2x392xf32>
    %108 = arith.mulf %107, %102 : vector<2x392xf32>
    %109 = arith.addf %105, %108 : vector<2x392xf32>
    %c50 = arith.constant 50 : index
    %110 = memref.load %arg2[%c50] : memref<100xf32, #tpu.memory_space<smem>>
    %111 = vector.broadcast %110 : f32 to vector<2x392xf32>
    %112 = arith.mulf %111, %101 : vector<2x392xf32>
    %c75 = arith.constant 75 : index
    %113 = memref.load %arg2[%c75] : memref<100xf32, #tpu.memory_space<smem>>
    %114 = vector.broadcast %113 : f32 to vector<2x392xf32>
    %115 = arith.mulf %114, %102 : vector<2x392xf32>
    %116 = arith.addf %112, %115 : vector<2x392xf32>
    %117 = vector.extract_strided_slice %88 {offsets = [0, 1], sizes = [2, 392], strides = [1, 1]} : vector<2x512xf32> to vector<2x392xf32>
    %118 = vector.extract_strided_slice %100 {offsets = [0, 1], sizes = [2, 392], strides = [1, 1]} : vector<2x512xf32> to vector<2x392xf32>
    %c1_29 = arith.constant 1 : index
    %119 = memref.load %arg2[%c1_29] : memref<100xf32, #tpu.memory_space<smem>>
    %120 = vector.broadcast %119 : f32 to vector<2x392xf32>
    %121 = arith.mulf %120, %117 : vector<2x392xf32>
    %c26 = arith.constant 26 : index
    %122 = memref.load %arg2[%c26] : memref<100xf32, #tpu.memory_space<smem>>
    %123 = vector.broadcast %122 : f32 to vector<2x392xf32>
    %124 = arith.mulf %123, %118 : vector<2x392xf32>
    %125 = arith.addf %121, %124 : vector<2x392xf32>
    %126 = arith.addf %109, %125 : vector<2x392xf32>
    %c51 = arith.constant 51 : index
    %127 = memref.load %arg2[%c51] : memref<100xf32, #tpu.memory_space<smem>>
    %128 = vector.broadcast %127 : f32 to vector<2x392xf32>
    %129 = arith.mulf %128, %117 : vector<2x392xf32>
    %c76 = arith.constant 76 : index
    %130 = memref.load %arg2[%c76] : memref<100xf32, #tpu.memory_space<smem>>
    %131 = vector.broadcast %130 : f32 to vector<2x392xf32>
    %132 = arith.mulf %131, %118 : vector<2x392xf32>
    %133 = arith.addf %129, %132 : vector<2x392xf32>
    %134 = arith.addf %116, %133 : vector<2x392xf32>
    %135 = vector.extract_strided_slice %88 {offsets = [0, 2], sizes = [2, 392], strides = [1, 1]} : vector<2x512xf32> to vector<2x392xf32>
    %136 = vector.extract_strided_slice %100 {offsets = [0, 2], sizes = [2, 392], strides = [1, 1]} : vector<2x512xf32> to vector<2x392xf32>
    %c2_30 = arith.constant 2 : index
    %137 = memref.load %arg2[%c2_30] : memref<100xf32, #tpu.memory_space<smem>>
    %138 = vector.broadcast %137 : f32 to vector<2x392xf32>
    %139 = arith.mulf %138, %135 : vector<2x392xf32>
    %c27 = arith.constant 27 : index
    %140 = memref.load %arg2[%c27] : memref<100xf32, #tpu.memory_space<smem>>
    %141 = vector.broadcast %140 : f32 to vector<2x392xf32>
    %142 = arith.mulf %141, %136 : vector<2x392xf32>
    %143 = arith.addf %139, %142 : vector<2x392xf32>
    %144 = arith.addf %126, %143 : vector<2x392xf32>
    %c52 = arith.constant 52 : index
    %145 = memref.load %arg2[%c52] : memref<100xf32, #tpu.memory_space<smem>>
    %146 = vector.broadcast %145 : f32 to vector<2x392xf32>
    %147 = arith.mulf %146, %135 : vector<2x392xf32>
    %c77 = arith.constant 77 : index
    %148 = memref.load %arg2[%c77] : memref<100xf32, #tpu.memory_space<smem>>
    %149 = vector.broadcast %148 : f32 to vector<2x392xf32>
    %150 = arith.mulf %149, %136 : vector<2x392xf32>
    %151 = arith.addf %147, %150 : vector<2x392xf32>
    %152 = arith.addf %134, %151 : vector<2x392xf32>
    %153 = vector.extract_strided_slice %88 {offsets = [0, 3], sizes = [2, 392], strides = [1, 1]} : vector<2x512xf32> to vector<2x392xf32>
    %154 = vector.extract_strided_slice %100 {offsets = [0, 3], sizes = [2, 392], strides = [1, 1]} : vector<2x512xf32> to vector<2x392xf32>
    %c3_31 = arith.constant 3 : index
    %155 = memref.load %arg2[%c3_31] : memref<100xf32, #tpu.memory_space<smem>>
    %156 = vector.broadcast %155 : f32 to vector<2x392xf32>
    %157 = arith.mulf %156, %153 : vector<2x392xf32>
    %c28 = arith.constant 28 : index
    %158 = memref.load %arg2[%c28] : memref<100xf32, #tpu.memory_space<smem>>
    %159 = vector.broadcast %158 : f32 to vector<2x392xf32>
    %160 = arith.mulf %159, %154 : vector<2x392xf32>
    %161 = arith.addf %157, %160 : vector<2x392xf32>
    %162 = arith.addf %144, %161 : vector<2x392xf32>
    %c53 = arith.constant 53 : index
    %163 = memref.load %arg2[%c53] : memref<100xf32, #tpu.memory_space<smem>>
    %164 = vector.broadcast %163 : f32 to vector<2x392xf32>
    %165 = arith.mulf %164, %153 : vector<2x392xf32>
    %c78 = arith.constant 78 : index
    %166 = memref.load %arg2[%c78] : memref<100xf32, #tpu.memory_space<smem>>
    %167 = vector.broadcast %166 : f32 to vector<2x392xf32>
    %168 = arith.mulf %167, %154 : vector<2x392xf32>
    %169 = arith.addf %165, %168 : vector<2x392xf32>
    %170 = arith.addf %152, %169 : vector<2x392xf32>
    %171 = vector.extract_strided_slice %88 {offsets = [0, 4], sizes = [2, 392], strides = [1, 1]} : vector<2x512xf32> to vector<2x392xf32>
    %172 = vector.extract_strided_slice %100 {offsets = [0, 4], sizes = [2, 392], strides = [1, 1]} : vector<2x512xf32> to vector<2x392xf32>
    %c4_32 = arith.constant 4 : index
    %173 = memref.load %arg2[%c4_32] : memref<100xf32, #tpu.memory_space<smem>>
    %174 = vector.broadcast %173 : f32 to vector<2x392xf32>
    %175 = arith.mulf %174, %171 : vector<2x392xf32>
    %c29 = arith.constant 29 : index
    %176 = memref.load %arg2[%c29] : memref<100xf32, #tpu.memory_space<smem>>
    %177 = vector.broadcast %176 : f32 to vector<2x392xf32>
    %178 = arith.mulf %177, %172 : vector<2x392xf32>
    %179 = arith.addf %175, %178 : vector<2x392xf32>
    %180 = arith.addf %162, %179 : vector<2x392xf32>
    %c54 = arith.constant 54 : index
    %181 = memref.load %arg2[%c54] : memref<100xf32, #tpu.memory_space<smem>>
    %182 = vector.broadcast %181 : f32 to vector<2x392xf32>
    %183 = arith.mulf %182, %171 : vector<2x392xf32>
    %c79 = arith.constant 79 : index
    %184 = memref.load %arg2[%c79] : memref<100xf32, #tpu.memory_space<smem>>
    %185 = vector.broadcast %184 : f32 to vector<2x392xf32>
    %186 = arith.mulf %185, %172 : vector<2x392xf32>
    %187 = arith.addf %183, %186 : vector<2x392xf32>
    %188 = arith.addf %170, %187 : vector<2x392xf32>
    %189 = vector.extract_strided_slice %88 {offsets = [0, 22], sizes = [2, 392], strides = [1, 1]} : vector<2x512xf32> to vector<2x392xf32>
    %190 = vector.extract_strided_slice %100 {offsets = [0, 22], sizes = [2, 392], strides = [1, 1]} : vector<2x512xf32> to vector<2x392xf32>
    %c5_33 = arith.constant 5 : index
    %191 = memref.load %arg2[%c5_33] : memref<100xf32, #tpu.memory_space<smem>>
    %192 = vector.broadcast %191 : f32 to vector<2x392xf32>
    %193 = arith.mulf %192, %189 : vector<2x392xf32>
    %c30 = arith.constant 30 : index
    %194 = memref.load %arg2[%c30] : memref<100xf32, #tpu.memory_space<smem>>
    %195 = vector.broadcast %194 : f32 to vector<2x392xf32>
    %196 = arith.mulf %195, %190 : vector<2x392xf32>
    %197 = arith.addf %193, %196 : vector<2x392xf32>
    %c55 = arith.constant 55 : index
    %198 = memref.load %arg2[%c55] : memref<100xf32, #tpu.memory_space<smem>>
    %199 = vector.broadcast %198 : f32 to vector<2x392xf32>
    %200 = arith.mulf %199, %189 : vector<2x392xf32>
    %c80 = arith.constant 80 : index
    %201 = memref.load %arg2[%c80] : memref<100xf32, #tpu.memory_space<smem>>
    %202 = vector.broadcast %201 : f32 to vector<2x392xf32>
    %203 = arith.mulf %202, %190 : vector<2x392xf32>
    %204 = arith.addf %200, %203 : vector<2x392xf32>
    %205 = vector.extract_strided_slice %88 {offsets = [0, 23], sizes = [2, 392], strides = [1, 1]} : vector<2x512xf32> to vector<2x392xf32>
    %206 = vector.extract_strided_slice %100 {offsets = [0, 23], sizes = [2, 392], strides = [1, 1]} : vector<2x512xf32> to vector<2x392xf32>
    %c6_34 = arith.constant 6 : index
    %207 = memref.load %arg2[%c6_34] : memref<100xf32, #tpu.memory_space<smem>>
    %208 = vector.broadcast %207 : f32 to vector<2x392xf32>
    %209 = arith.mulf %208, %205 : vector<2x392xf32>
    %c31 = arith.constant 31 : index
    %210 = memref.load %arg2[%c31] : memref<100xf32, #tpu.memory_space<smem>>
    %211 = vector.broadcast %210 : f32 to vector<2x392xf32>
    %212 = arith.mulf %211, %206 : vector<2x392xf32>
    %213 = arith.addf %209, %212 : vector<2x392xf32>
    %214 = arith.addf %197, %213 : vector<2x392xf32>
    %c56 = arith.constant 56 : index
    %215 = memref.load %arg2[%c56] : memref<100xf32, #tpu.memory_space<smem>>
    %216 = vector.broadcast %215 : f32 to vector<2x392xf32>
    %217 = arith.mulf %216, %205 : vector<2x392xf32>
    %c81 = arith.constant 81 : index
    %218 = memref.load %arg2[%c81] : memref<100xf32, #tpu.memory_space<smem>>
    %219 = vector.broadcast %218 : f32 to vector<2x392xf32>
    %220 = arith.mulf %219, %206 : vector<2x392xf32>
    %221 = arith.addf %217, %220 : vector<2x392xf32>
    %222 = arith.addf %204, %221 : vector<2x392xf32>
    %223 = vector.extract_strided_slice %88 {offsets = [0, 24], sizes = [2, 392], strides = [1, 1]} : vector<2x512xf32> to vector<2x392xf32>
    %224 = vector.extract_strided_slice %100 {offsets = [0, 24], sizes = [2, 392], strides = [1, 1]} : vector<2x512xf32> to vector<2x392xf32>
    %c7_35 = arith.constant 7 : index
    %225 = memref.load %arg2[%c7_35] : memref<100xf32, #tpu.memory_space<smem>>
    %226 = vector.broadcast %225 : f32 to vector<2x392xf32>
    %227 = arith.mulf %226, %223 : vector<2x392xf32>
    %c32 = arith.constant 32 : index
    %228 = memref.load %arg2[%c32] : memref<100xf32, #tpu.memory_space<smem>>
    %229 = vector.broadcast %228 : f32 to vector<2x392xf32>
    %230 = arith.mulf %229, %224 : vector<2x392xf32>
    %231 = arith.addf %227, %230 : vector<2x392xf32>
    %232 = arith.addf %214, %231 : vector<2x392xf32>
    %c57 = arith.constant 57 : index
    %233 = memref.load %arg2[%c57] : memref<100xf32, #tpu.memory_space<smem>>
    %234 = vector.broadcast %233 : f32 to vector<2x392xf32>
    %235 = arith.mulf %234, %223 : vector<2x392xf32>
    %c82 = arith.constant 82 : index
    %236 = memref.load %arg2[%c82] : memref<100xf32, #tpu.memory_space<smem>>
    %237 = vector.broadcast %236 : f32 to vector<2x392xf32>
    %238 = arith.mulf %237, %224 : vector<2x392xf32>
    %239 = arith.addf %235, %238 : vector<2x392xf32>
    %240 = arith.addf %222, %239 : vector<2x392xf32>
    %241 = vector.extract_strided_slice %88 {offsets = [0, 25], sizes = [2, 392], strides = [1, 1]} : vector<2x512xf32> to vector<2x392xf32>
    %242 = vector.extract_strided_slice %100 {offsets = [0, 25], sizes = [2, 392], strides = [1, 1]} : vector<2x512xf32> to vector<2x392xf32>
    %c8 = arith.constant 8 : index
    %243 = memref.load %arg2[%c8] : memref<100xf32, #tpu.memory_space<smem>>
    %244 = vector.broadcast %243 : f32 to vector<2x392xf32>
    %245 = arith.mulf %244, %241 : vector<2x392xf32>
    %c33 = arith.constant 33 : index
    %246 = memref.load %arg2[%c33] : memref<100xf32, #tpu.memory_space<smem>>
    %247 = vector.broadcast %246 : f32 to vector<2x392xf32>
    %248 = arith.mulf %247, %242 : vector<2x392xf32>
    %249 = arith.addf %245, %248 : vector<2x392xf32>
    %250 = arith.addf %232, %249 : vector<2x392xf32>
    %c58 = arith.constant 58 : index
    %251 = memref.load %arg2[%c58] : memref<100xf32, #tpu.memory_space<smem>>
    %252 = vector.broadcast %251 : f32 to vector<2x392xf32>
    %253 = arith.mulf %252, %241 : vector<2x392xf32>
    %c83 = arith.constant 83 : index
    %254 = memref.load %arg2[%c83] : memref<100xf32, #tpu.memory_space<smem>>
    %255 = vector.broadcast %254 : f32 to vector<2x392xf32>
    %256 = arith.mulf %255, %242 : vector<2x392xf32>
    %257 = arith.addf %253, %256 : vector<2x392xf32>
    %258 = arith.addf %240, %257 : vector<2x392xf32>
    %259 = vector.extract_strided_slice %88 {offsets = [0, 26], sizes = [2, 392], strides = [1, 1]} : vector<2x512xf32> to vector<2x392xf32>
    %260 = vector.extract_strided_slice %100 {offsets = [0, 26], sizes = [2, 392], strides = [1, 1]} : vector<2x512xf32> to vector<2x392xf32>
    %c9 = arith.constant 9 : index
    %261 = memref.load %arg2[%c9] : memref<100xf32, #tpu.memory_space<smem>>
    %262 = vector.broadcast %261 : f32 to vector<2x392xf32>
    %263 = arith.mulf %262, %259 : vector<2x392xf32>
    %c34 = arith.constant 34 : index
    %264 = memref.load %arg2[%c34] : memref<100xf32, #tpu.memory_space<smem>>
    %265 = vector.broadcast %264 : f32 to vector<2x392xf32>
    %266 = arith.mulf %265, %260 : vector<2x392xf32>
    %267 = arith.addf %263, %266 : vector<2x392xf32>
    %268 = arith.addf %250, %267 : vector<2x392xf32>
    %c59 = arith.constant 59 : index
    %269 = memref.load %arg2[%c59] : memref<100xf32, #tpu.memory_space<smem>>
    %270 = vector.broadcast %269 : f32 to vector<2x392xf32>
    %271 = arith.mulf %270, %259 : vector<2x392xf32>
    %c84 = arith.constant 84 : index
    %272 = memref.load %arg2[%c84] : memref<100xf32, #tpu.memory_space<smem>>
    %273 = vector.broadcast %272 : f32 to vector<2x392xf32>
    %274 = arith.mulf %273, %260 : vector<2x392xf32>
    %275 = arith.addf %271, %274 : vector<2x392xf32>
    %276 = arith.addf %258, %275 : vector<2x392xf32>
    %277 = vector.extract_strided_slice %88 {offsets = [0, 44], sizes = [2, 392], strides = [1, 1]} : vector<2x512xf32> to vector<2x392xf32>
    %278 = vector.extract_strided_slice %100 {offsets = [0, 44], sizes = [2, 392], strides = [1, 1]} : vector<2x512xf32> to vector<2x392xf32>
    %c10 = arith.constant 10 : index
    %279 = memref.load %arg2[%c10] : memref<100xf32, #tpu.memory_space<smem>>
    %280 = vector.broadcast %279 : f32 to vector<2x392xf32>
    %281 = arith.mulf %280, %277 : vector<2x392xf32>
    %c35 = arith.constant 35 : index
    %282 = memref.load %arg2[%c35] : memref<100xf32, #tpu.memory_space<smem>>
    %283 = vector.broadcast %282 : f32 to vector<2x392xf32>
    %284 = arith.mulf %283, %278 : vector<2x392xf32>
    %285 = arith.addf %281, %284 : vector<2x392xf32>
    %c60 = arith.constant 60 : index
    %286 = memref.load %arg2[%c60] : memref<100xf32, #tpu.memory_space<smem>>
    %287 = vector.broadcast %286 : f32 to vector<2x392xf32>
    %288 = arith.mulf %287, %277 : vector<2x392xf32>
    %c85 = arith.constant 85 : index
    %289 = memref.load %arg2[%c85] : memref<100xf32, #tpu.memory_space<smem>>
    %290 = vector.broadcast %289 : f32 to vector<2x392xf32>
    %291 = arith.mulf %290, %278 : vector<2x392xf32>
    %292 = arith.addf %288, %291 : vector<2x392xf32>
    %293 = vector.extract_strided_slice %88 {offsets = [0, 45], sizes = [2, 392], strides = [1, 1]} : vector<2x512xf32> to vector<2x392xf32>
    %294 = vector.extract_strided_slice %100 {offsets = [0, 45], sizes = [2, 392], strides = [1, 1]} : vector<2x512xf32> to vector<2x392xf32>
    %c11 = arith.constant 11 : index
    %295 = memref.load %arg2[%c11] : memref<100xf32, #tpu.memory_space<smem>>
    %296 = vector.broadcast %295 : f32 to vector<2x392xf32>
    %297 = arith.mulf %296, %293 : vector<2x392xf32>
    %c36 = arith.constant 36 : index
    %298 = memref.load %arg2[%c36] : memref<100xf32, #tpu.memory_space<smem>>
    %299 = vector.broadcast %298 : f32 to vector<2x392xf32>
    %300 = arith.mulf %299, %294 : vector<2x392xf32>
    %301 = arith.addf %297, %300 : vector<2x392xf32>
    %302 = arith.addf %285, %301 : vector<2x392xf32>
    %c61 = arith.constant 61 : index
    %303 = memref.load %arg2[%c61] : memref<100xf32, #tpu.memory_space<smem>>
    %304 = vector.broadcast %303 : f32 to vector<2x392xf32>
    %305 = arith.mulf %304, %293 : vector<2x392xf32>
    %c86 = arith.constant 86 : index
    %306 = memref.load %arg2[%c86] : memref<100xf32, #tpu.memory_space<smem>>
    %307 = vector.broadcast %306 : f32 to vector<2x392xf32>
    %308 = arith.mulf %307, %294 : vector<2x392xf32>
    %309 = arith.addf %305, %308 : vector<2x392xf32>
    %310 = arith.addf %292, %309 : vector<2x392xf32>
    %311 = vector.extract_strided_slice %88 {offsets = [0, 46], sizes = [2, 392], strides = [1, 1]} : vector<2x512xf32> to vector<2x392xf32>
    %312 = vector.extract_strided_slice %100 {offsets = [0, 46], sizes = [2, 392], strides = [1, 1]} : vector<2x512xf32> to vector<2x392xf32>
    %c12 = arith.constant 12 : index
    %313 = memref.load %arg2[%c12] : memref<100xf32, #tpu.memory_space<smem>>
    %314 = vector.broadcast %313 : f32 to vector<2x392xf32>
    %315 = arith.mulf %314, %311 : vector<2x392xf32>
    %c37 = arith.constant 37 : index
    %316 = memref.load %arg2[%c37] : memref<100xf32, #tpu.memory_space<smem>>
    %317 = vector.broadcast %316 : f32 to vector<2x392xf32>
    %318 = arith.mulf %317, %312 : vector<2x392xf32>
    %319 = arith.addf %315, %318 : vector<2x392xf32>
    %320 = arith.addf %302, %319 : vector<2x392xf32>
    %c62 = arith.constant 62 : index
    %321 = memref.load %arg2[%c62] : memref<100xf32, #tpu.memory_space<smem>>
    %322 = vector.broadcast %321 : f32 to vector<2x392xf32>
    %323 = arith.mulf %322, %311 : vector<2x392xf32>
    %c87 = arith.constant 87 : index
    %324 = memref.load %arg2[%c87] : memref<100xf32, #tpu.memory_space<smem>>
    %325 = vector.broadcast %324 : f32 to vector<2x392xf32>
    %326 = arith.mulf %325, %312 : vector<2x392xf32>
    %327 = arith.addf %323, %326 : vector<2x392xf32>
    %328 = arith.addf %310, %327 : vector<2x392xf32>
    %329 = vector.extract_strided_slice %88 {offsets = [0, 47], sizes = [2, 392], strides = [1, 1]} : vector<2x512xf32> to vector<2x392xf32>
    %330 = vector.extract_strided_slice %100 {offsets = [0, 47], sizes = [2, 392], strides = [1, 1]} : vector<2x512xf32> to vector<2x392xf32>
    %c13 = arith.constant 13 : index
    %331 = memref.load %arg2[%c13] : memref<100xf32, #tpu.memory_space<smem>>
    %332 = vector.broadcast %331 : f32 to vector<2x392xf32>
    %333 = arith.mulf %332, %329 : vector<2x392xf32>
    %c38 = arith.constant 38 : index
    %334 = memref.load %arg2[%c38] : memref<100xf32, #tpu.memory_space<smem>>
    %335 = vector.broadcast %334 : f32 to vector<2x392xf32>
    %336 = arith.mulf %335, %330 : vector<2x392xf32>
    %337 = arith.addf %333, %336 : vector<2x392xf32>
    %338 = arith.addf %320, %337 : vector<2x392xf32>
    %c63 = arith.constant 63 : index
    %339 = memref.load %arg2[%c63] : memref<100xf32, #tpu.memory_space<smem>>
    %340 = vector.broadcast %339 : f32 to vector<2x392xf32>
    %341 = arith.mulf %340, %329 : vector<2x392xf32>
    %c88 = arith.constant 88 : index
    %342 = memref.load %arg2[%c88] : memref<100xf32, #tpu.memory_space<smem>>
    %343 = vector.broadcast %342 : f32 to vector<2x392xf32>
    %344 = arith.mulf %343, %330 : vector<2x392xf32>
    %345 = arith.addf %341, %344 : vector<2x392xf32>
    %346 = arith.addf %328, %345 : vector<2x392xf32>
    %347 = vector.extract_strided_slice %88 {offsets = [0, 48], sizes = [2, 392], strides = [1, 1]} : vector<2x512xf32> to vector<2x392xf32>
    %348 = vector.extract_strided_slice %100 {offsets = [0, 48], sizes = [2, 392], strides = [1, 1]} : vector<2x512xf32> to vector<2x392xf32>
    %c14 = arith.constant 14 : index
    %349 = memref.load %arg2[%c14] : memref<100xf32, #tpu.memory_space<smem>>
    %350 = vector.broadcast %349 : f32 to vector<2x392xf32>
    %351 = arith.mulf %350, %347 : vector<2x392xf32>
    %c39 = arith.constant 39 : index
    %352 = memref.load %arg2[%c39] : memref<100xf32, #tpu.memory_space<smem>>
    %353 = vector.broadcast %352 : f32 to vector<2x392xf32>
    %354 = arith.mulf %353, %348 : vector<2x392xf32>
    %355 = arith.addf %351, %354 : vector<2x392xf32>
    %356 = arith.addf %338, %355 : vector<2x392xf32>
    %c64 = arith.constant 64 : index
    %357 = memref.load %arg2[%c64] : memref<100xf32, #tpu.memory_space<smem>>
    %358 = vector.broadcast %357 : f32 to vector<2x392xf32>
    %359 = arith.mulf %358, %347 : vector<2x392xf32>
    %c89 = arith.constant 89 : index
    %360 = memref.load %arg2[%c89] : memref<100xf32, #tpu.memory_space<smem>>
    %361 = vector.broadcast %360 : f32 to vector<2x392xf32>
    %362 = arith.mulf %361, %348 : vector<2x392xf32>
    %363 = arith.addf %359, %362 : vector<2x392xf32>
    %364 = arith.addf %346, %363 : vector<2x392xf32>
    %365 = vector.extract_strided_slice %88 {offsets = [0, 66], sizes = [2, 392], strides = [1, 1]} : vector<2x512xf32> to vector<2x392xf32>
    %366 = vector.extract_strided_slice %100 {offsets = [0, 66], sizes = [2, 392], strides = [1, 1]} : vector<2x512xf32> to vector<2x392xf32>
    %c15 = arith.constant 15 : index
    %367 = memref.load %arg2[%c15] : memref<100xf32, #tpu.memory_space<smem>>
    %368 = vector.broadcast %367 : f32 to vector<2x392xf32>
    %369 = arith.mulf %368, %365 : vector<2x392xf32>
    %c40 = arith.constant 40 : index
    %370 = memref.load %arg2[%c40] : memref<100xf32, #tpu.memory_space<smem>>
    %371 = vector.broadcast %370 : f32 to vector<2x392xf32>
    %372 = arith.mulf %371, %366 : vector<2x392xf32>
    %373 = arith.addf %369, %372 : vector<2x392xf32>
    %374 = arith.addf %180, %373 : vector<2x392xf32>
    %c65 = arith.constant 65 : index
    %375 = memref.load %arg2[%c65] : memref<100xf32, #tpu.memory_space<smem>>
    %376 = vector.broadcast %375 : f32 to vector<2x392xf32>
    %377 = arith.mulf %376, %365 : vector<2x392xf32>
    %c90 = arith.constant 90 : index
    %378 = memref.load %arg2[%c90] : memref<100xf32, #tpu.memory_space<smem>>
    %379 = vector.broadcast %378 : f32 to vector<2x392xf32>
    %380 = arith.mulf %379, %366 : vector<2x392xf32>
    %381 = arith.addf %377, %380 : vector<2x392xf32>
    %382 = arith.addf %188, %381 : vector<2x392xf32>
    %383 = vector.extract_strided_slice %88 {offsets = [0, 67], sizes = [2, 392], strides = [1, 1]} : vector<2x512xf32> to vector<2x392xf32>
    %384 = vector.extract_strided_slice %100 {offsets = [0, 67], sizes = [2, 392], strides = [1, 1]} : vector<2x512xf32> to vector<2x392xf32>
    %c16 = arith.constant 16 : index
    %385 = memref.load %arg2[%c16] : memref<100xf32, #tpu.memory_space<smem>>
    %386 = vector.broadcast %385 : f32 to vector<2x392xf32>
    %387 = arith.mulf %386, %383 : vector<2x392xf32>
    %c41 = arith.constant 41 : index
    %388 = memref.load %arg2[%c41] : memref<100xf32, #tpu.memory_space<smem>>
    %389 = vector.broadcast %388 : f32 to vector<2x392xf32>
    %390 = arith.mulf %389, %384 : vector<2x392xf32>
    %391 = arith.addf %387, %390 : vector<2x392xf32>
    %392 = arith.addf %374, %391 : vector<2x392xf32>
    %c66 = arith.constant 66 : index
    %393 = memref.load %arg2[%c66] : memref<100xf32, #tpu.memory_space<smem>>
    %394 = vector.broadcast %393 : f32 to vector<2x392xf32>
    %395 = arith.mulf %394, %383 : vector<2x392xf32>
    %c91_36 = arith.constant 91 : index
    %396 = memref.load %arg2[%c91_36] : memref<100xf32, #tpu.memory_space<smem>>
    %397 = vector.broadcast %396 : f32 to vector<2x392xf32>
    %398 = arith.mulf %397, %384 : vector<2x392xf32>
    %399 = arith.addf %395, %398 : vector<2x392xf32>
    %400 = arith.addf %382, %399 : vector<2x392xf32>
    %401 = vector.extract_strided_slice %88 {offsets = [0, 68], sizes = [2, 392], strides = [1, 1]} : vector<2x512xf32> to vector<2x392xf32>
    %402 = vector.extract_strided_slice %100 {offsets = [0, 68], sizes = [2, 392], strides = [1, 1]} : vector<2x512xf32> to vector<2x392xf32>
    %c17 = arith.constant 17 : index
    %403 = memref.load %arg2[%c17] : memref<100xf32, #tpu.memory_space<smem>>
    %404 = vector.broadcast %403 : f32 to vector<2x392xf32>
    %405 = arith.mulf %404, %401 : vector<2x392xf32>
    %c42 = arith.constant 42 : index
    %406 = memref.load %arg2[%c42] : memref<100xf32, #tpu.memory_space<smem>>
    %407 = vector.broadcast %406 : f32 to vector<2x392xf32>
    %408 = arith.mulf %407, %402 : vector<2x392xf32>
    %409 = arith.addf %405, %408 : vector<2x392xf32>
    %410 = arith.addf %392, %409 : vector<2x392xf32>
    %c67 = arith.constant 67 : index
    %411 = memref.load %arg2[%c67] : memref<100xf32, #tpu.memory_space<smem>>
    %412 = vector.broadcast %411 : f32 to vector<2x392xf32>
    %413 = arith.mulf %412, %401 : vector<2x392xf32>
    %c92 = arith.constant 92 : index
    %414 = memref.load %arg2[%c92] : memref<100xf32, #tpu.memory_space<smem>>
    %415 = vector.broadcast %414 : f32 to vector<2x392xf32>
    %416 = arith.mulf %415, %402 : vector<2x392xf32>
    %417 = arith.addf %413, %416 : vector<2x392xf32>
    %418 = arith.addf %400, %417 : vector<2x392xf32>
    %419 = vector.extract_strided_slice %88 {offsets = [0, 69], sizes = [2, 392], strides = [1, 1]} : vector<2x512xf32> to vector<2x392xf32>
    %420 = vector.extract_strided_slice %100 {offsets = [0, 69], sizes = [2, 392], strides = [1, 1]} : vector<2x512xf32> to vector<2x392xf32>
    %c18 = arith.constant 18 : index
    %421 = memref.load %arg2[%c18] : memref<100xf32, #tpu.memory_space<smem>>
    %422 = vector.broadcast %421 : f32 to vector<2x392xf32>
    %423 = arith.mulf %422, %419 : vector<2x392xf32>
    %c43 = arith.constant 43 : index
    %424 = memref.load %arg2[%c43] : memref<100xf32, #tpu.memory_space<smem>>
    %425 = vector.broadcast %424 : f32 to vector<2x392xf32>
    %426 = arith.mulf %425, %420 : vector<2x392xf32>
    %427 = arith.addf %423, %426 : vector<2x392xf32>
    %428 = arith.addf %410, %427 : vector<2x392xf32>
    %c68 = arith.constant 68 : index
    %429 = memref.load %arg2[%c68] : memref<100xf32, #tpu.memory_space<smem>>
    %430 = vector.broadcast %429 : f32 to vector<2x392xf32>
    %431 = arith.mulf %430, %419 : vector<2x392xf32>
    %c93 = arith.constant 93 : index
    %432 = memref.load %arg2[%c93] : memref<100xf32, #tpu.memory_space<smem>>
    %433 = vector.broadcast %432 : f32 to vector<2x392xf32>
    %434 = arith.mulf %433, %420 : vector<2x392xf32>
    %435 = arith.addf %431, %434 : vector<2x392xf32>
    %436 = arith.addf %418, %435 : vector<2x392xf32>
    %437 = vector.extract_strided_slice %88 {offsets = [0, 70], sizes = [2, 392], strides = [1, 1]} : vector<2x512xf32> to vector<2x392xf32>
    %438 = vector.extract_strided_slice %100 {offsets = [0, 70], sizes = [2, 392], strides = [1, 1]} : vector<2x512xf32> to vector<2x392xf32>
    %c19 = arith.constant 19 : index
    %439 = memref.load %arg2[%c19] : memref<100xf32, #tpu.memory_space<smem>>
    %440 = vector.broadcast %439 : f32 to vector<2x392xf32>
    %441 = arith.mulf %440, %437 : vector<2x392xf32>
    %c44 = arith.constant 44 : index
    %442 = memref.load %arg2[%c44] : memref<100xf32, #tpu.memory_space<smem>>
    %443 = vector.broadcast %442 : f32 to vector<2x392xf32>
    %444 = arith.mulf %443, %438 : vector<2x392xf32>
    %445 = arith.addf %441, %444 : vector<2x392xf32>
    %446 = arith.addf %428, %445 : vector<2x392xf32>
    %c69_37 = arith.constant 69 : index
    %447 = memref.load %arg2[%c69_37] : memref<100xf32, #tpu.memory_space<smem>>
    %448 = vector.broadcast %447 : f32 to vector<2x392xf32>
    %449 = arith.mulf %448, %437 : vector<2x392xf32>
    %c94 = arith.constant 94 : index
    %450 = memref.load %arg2[%c94] : memref<100xf32, #tpu.memory_space<smem>>
    %451 = vector.broadcast %450 : f32 to vector<2x392xf32>
    %452 = arith.mulf %451, %438 : vector<2x392xf32>
    %453 = arith.addf %449, %452 : vector<2x392xf32>
    %454 = arith.addf %436, %453 : vector<2x392xf32>
    %455 = vector.extract_strided_slice %88 {offsets = [0, 88], sizes = [2, 392], strides = [1, 1]} : vector<2x512xf32> to vector<2x392xf32>
    %456 = vector.extract_strided_slice %100 {offsets = [0, 88], sizes = [2, 392], strides = [1, 1]} : vector<2x512xf32> to vector<2x392xf32>
    %c20 = arith.constant 20 : index
    %457 = memref.load %arg2[%c20] : memref<100xf32, #tpu.memory_space<smem>>
    %458 = vector.broadcast %457 : f32 to vector<2x392xf32>
    %459 = arith.mulf %458, %455 : vector<2x392xf32>
    %c45 = arith.constant 45 : index
    %460 = memref.load %arg2[%c45] : memref<100xf32, #tpu.memory_space<smem>>
    %461 = vector.broadcast %460 : f32 to vector<2x392xf32>
    %462 = arith.mulf %461, %456 : vector<2x392xf32>
    %463 = arith.addf %459, %462 : vector<2x392xf32>
    %464 = arith.addf %268, %463 : vector<2x392xf32>
    %c70 = arith.constant 70 : index
    %465 = memref.load %arg2[%c70] : memref<100xf32, #tpu.memory_space<smem>>
    %466 = vector.broadcast %465 : f32 to vector<2x392xf32>
    %467 = arith.mulf %466, %455 : vector<2x392xf32>
    %c95 = arith.constant 95 : index
    %468 = memref.load %arg2[%c95] : memref<100xf32, #tpu.memory_space<smem>>
    %469 = vector.broadcast %468 : f32 to vector<2x392xf32>
    %470 = arith.mulf %469, %456 : vector<2x392xf32>
    %471 = arith.addf %467, %470 : vector<2x392xf32>
    %472 = arith.addf %276, %471 : vector<2x392xf32>
    %473 = vector.extract_strided_slice %88 {offsets = [0, 89], sizes = [2, 392], strides = [1, 1]} : vector<2x512xf32> to vector<2x392xf32>
    %474 = vector.extract_strided_slice %100 {offsets = [0, 89], sizes = [2, 392], strides = [1, 1]} : vector<2x512xf32> to vector<2x392xf32>
    %c21 = arith.constant 21 : index
    %475 = memref.load %arg2[%c21] : memref<100xf32, #tpu.memory_space<smem>>
    %476 = vector.broadcast %475 : f32 to vector<2x392xf32>
    %477 = arith.mulf %476, %473 : vector<2x392xf32>
    %c46 = arith.constant 46 : index
    %478 = memref.load %arg2[%c46] : memref<100xf32, #tpu.memory_space<smem>>
    %479 = vector.broadcast %478 : f32 to vector<2x392xf32>
    %480 = arith.mulf %479, %474 : vector<2x392xf32>
    %481 = arith.addf %477, %480 : vector<2x392xf32>
    %482 = arith.addf %464, %481 : vector<2x392xf32>
    %c71 = arith.constant 71 : index
    %483 = memref.load %arg2[%c71] : memref<100xf32, #tpu.memory_space<smem>>
    %484 = vector.broadcast %483 : f32 to vector<2x392xf32>
    %485 = arith.mulf %484, %473 : vector<2x392xf32>
    %c96 = arith.constant 96 : index
    %486 = memref.load %arg2[%c96] : memref<100xf32, #tpu.memory_space<smem>>
    %487 = vector.broadcast %486 : f32 to vector<2x392xf32>
    %488 = arith.mulf %487, %474 : vector<2x392xf32>
    %489 = arith.addf %485, %488 : vector<2x392xf32>
    %490 = arith.addf %472, %489 : vector<2x392xf32>
    %491 = vector.extract_strided_slice %88 {offsets = [0, 90], sizes = [2, 392], strides = [1, 1]} : vector<2x512xf32> to vector<2x392xf32>
    %492 = vector.extract_strided_slice %100 {offsets = [0, 90], sizes = [2, 392], strides = [1, 1]} : vector<2x512xf32> to vector<2x392xf32>
    %c22 = arith.constant 22 : index
    %493 = memref.load %arg2[%c22] : memref<100xf32, #tpu.memory_space<smem>>
    %494 = vector.broadcast %493 : f32 to vector<2x392xf32>
    %495 = arith.mulf %494, %491 : vector<2x392xf32>
    %c47 = arith.constant 47 : index
    %496 = memref.load %arg2[%c47] : memref<100xf32, #tpu.memory_space<smem>>
    %497 = vector.broadcast %496 : f32 to vector<2x392xf32>
    %498 = arith.mulf %497, %492 : vector<2x392xf32>
    %499 = arith.addf %495, %498 : vector<2x392xf32>
    %500 = arith.addf %482, %499 : vector<2x392xf32>
    %c72 = arith.constant 72 : index
    %501 = memref.load %arg2[%c72] : memref<100xf32, #tpu.memory_space<smem>>
    %502 = vector.broadcast %501 : f32 to vector<2x392xf32>
    %503 = arith.mulf %502, %491 : vector<2x392xf32>
    %c97 = arith.constant 97 : index
    %504 = memref.load %arg2[%c97] : memref<100xf32, #tpu.memory_space<smem>>
    %505 = vector.broadcast %504 : f32 to vector<2x392xf32>
    %506 = arith.mulf %505, %492 : vector<2x392xf32>
    %507 = arith.addf %503, %506 : vector<2x392xf32>
    %508 = arith.addf %490, %507 : vector<2x392xf32>
    %509 = vector.extract_strided_slice %88 {offsets = [0, 91], sizes = [2, 392], strides = [1, 1]} : vector<2x512xf32> to vector<2x392xf32>
    %510 = vector.extract_strided_slice %100 {offsets = [0, 91], sizes = [2, 392], strides = [1, 1]} : vector<2x512xf32> to vector<2x392xf32>
    %c23 = arith.constant 23 : index
    %511 = memref.load %arg2[%c23] : memref<100xf32, #tpu.memory_space<smem>>
    %512 = vector.broadcast %511 : f32 to vector<2x392xf32>
    %513 = arith.mulf %512, %509 : vector<2x392xf32>
    %c48 = arith.constant 48 : index
    %514 = memref.load %arg2[%c48] : memref<100xf32, #tpu.memory_space<smem>>
    %515 = vector.broadcast %514 : f32 to vector<2x392xf32>
    %516 = arith.mulf %515, %510 : vector<2x392xf32>
    %517 = arith.addf %513, %516 : vector<2x392xf32>
    %518 = arith.addf %500, %517 : vector<2x392xf32>
    %c73 = arith.constant 73 : index
    %519 = memref.load %arg2[%c73] : memref<100xf32, #tpu.memory_space<smem>>
    %520 = vector.broadcast %519 : f32 to vector<2x392xf32>
    %521 = arith.mulf %520, %509 : vector<2x392xf32>
    %c98 = arith.constant 98 : index
    %522 = memref.load %arg2[%c98] : memref<100xf32, #tpu.memory_space<smem>>
    %523 = vector.broadcast %522 : f32 to vector<2x392xf32>
    %524 = arith.mulf %523, %510 : vector<2x392xf32>
    %525 = arith.addf %521, %524 : vector<2x392xf32>
    %526 = arith.addf %508, %525 : vector<2x392xf32>
    %527 = vector.extract_strided_slice %88 {offsets = [0, 92], sizes = [2, 392], strides = [1, 1]} : vector<2x512xf32> to vector<2x392xf32>
    %528 = vector.extract_strided_slice %100 {offsets = [0, 92], sizes = [2, 392], strides = [1, 1]} : vector<2x512xf32> to vector<2x392xf32>
    %c24 = arith.constant 24 : index
    %529 = memref.load %arg2[%c24] : memref<100xf32, #tpu.memory_space<smem>>
    %530 = vector.broadcast %529 : f32 to vector<2x392xf32>
    %531 = arith.mulf %530, %527 : vector<2x392xf32>
    %c49 = arith.constant 49 : index
    %532 = memref.load %arg2[%c49] : memref<100xf32, #tpu.memory_space<smem>>
    %533 = vector.broadcast %532 : f32 to vector<2x392xf32>
    %534 = arith.mulf %533, %528 : vector<2x392xf32>
    %535 = arith.addf %531, %534 : vector<2x392xf32>
    %536 = arith.addf %518, %535 : vector<2x392xf32>
    %c74 = arith.constant 74 : index
    %537 = memref.load %arg2[%c74] : memref<100xf32, #tpu.memory_space<smem>>
    %538 = vector.broadcast %537 : f32 to vector<2x392xf32>
    %539 = arith.mulf %538, %527 : vector<2x392xf32>
    %c99 = arith.constant 99 : index
    %540 = memref.load %arg2[%c99] : memref<100xf32, #tpu.memory_space<smem>>
    %541 = vector.broadcast %540 : f32 to vector<2x392xf32>
    %542 = arith.mulf %541, %528 : vector<2x392xf32>
    %543 = arith.addf %539, %542 : vector<2x392xf32>
    %544 = arith.addf %526, %543 : vector<2x392xf32>
    %545 = arith.addf %446, %536 : vector<2x392xf32>
    %546 = arith.addf %545, %356 : vector<2x392xf32>
    %c0_38 = arith.constant 0 : index
    %547 = memref.load %arg3[%c0_38] : memref<2xf32, #tpu.memory_space<smem>>
    %548 = vector.broadcast %547 : f32 to vector<2x392xf32>
    %549 = arith.addf %546, %548 : vector<2x392xf32>
    %550 = arith.negf %549 : vector<2x392xf32>
    %551 = math.exp %550 : vector<2x392xf32>
    %cst_39 = arith.constant 1.000000e+00 : f32
    %552 = vector.broadcast %cst_39 : f32 to vector<2x392xf32>
    %553 = arith.addf %552, %551 : vector<2x392xf32>
    %554 = arith.divf %552, %553 : vector<2x392xf32>
    %555 = arith.mulf %549, %554 : vector<2x392xf32>
    %556 = arith.addf %454, %544 : vector<2x392xf32>
    %557 = arith.addf %556, %364 : vector<2x392xf32>
    %c1_40 = arith.constant 1 : index
    %558 = memref.load %arg3[%c1_40] : memref<2xf32, #tpu.memory_space<smem>>
    %559 = vector.broadcast %558 : f32 to vector<2x392xf32>
    %560 = arith.addf %557, %559 : vector<2x392xf32>
    %561 = arith.negf %560 : vector<2x392xf32>
    %562 = math.exp %561 : vector<2x392xf32>
    %cst_41 = arith.constant 1.000000e+00 : f32
    %563 = vector.broadcast %cst_41 : f32 to vector<2x392xf32>
    %564 = arith.addf %563, %562 : vector<2x392xf32>
    %565 = arith.divf %563, %564 : vector<2x392xf32>
    %566 = arith.mulf %560, %565 : vector<2x392xf32>
    %567 = vector.extract_strided_slice %88 {offsets = [0, 46], sizes = [2, 392], strides = [1, 1]} : vector<2x512xf32> to vector<2x392xf32>
    %568 = vector.extract_strided_slice %100 {offsets = [0, 46], sizes = [2, 392], strides = [1, 1]} : vector<2x512xf32> to vector<2x392xf32>
    %569 = tpu.concatenate %567, %568, %555, %566 in 0 : vector<2x392xf32>, vector<2x392xf32>, vector<2x392xf32>, vector<2x392xf32> -> vector<8x392xf32>
    %570 = vector.extract_strided_slice %569 {offsets = [0, 0], sizes = [8, 18], strides = [1, 1]} : vector<8x392xf32> to vector<8x18xf32>
    %571 = vector.extract_strided_slice %569 {offsets = [0, 22], sizes = [8, 18], strides = [1, 1]} : vector<8x392xf32> to vector<8x18xf32>
    %572 = vector.extract_strided_slice %569 {offsets = [0, 44], sizes = [8, 18], strides = [1, 1]} : vector<8x392xf32> to vector<8x18xf32>
    %573 = vector.extract_strided_slice %569 {offsets = [0, 66], sizes = [8, 18], strides = [1, 1]} : vector<8x392xf32> to vector<8x18xf32>
    %574 = vector.extract_strided_slice %569 {offsets = [0, 88], sizes = [8, 18], strides = [1, 1]} : vector<8x392xf32> to vector<8x18xf32>
    %575 = vector.extract_strided_slice %569 {offsets = [0, 110], sizes = [8, 18], strides = [1, 1]} : vector<8x392xf32> to vector<8x18xf32>
    %576 = vector.extract_strided_slice %569 {offsets = [0, 132], sizes = [8, 18], strides = [1, 1]} : vector<8x392xf32> to vector<8x18xf32>
    %577 = vector.extract_strided_slice %569 {offsets = [0, 154], sizes = [8, 18], strides = [1, 1]} : vector<8x392xf32> to vector<8x18xf32>
    %578 = vector.extract_strided_slice %569 {offsets = [0, 176], sizes = [8, 18], strides = [1, 1]} : vector<8x392xf32> to vector<8x18xf32>
    %579 = vector.extract_strided_slice %569 {offsets = [0, 198], sizes = [8, 18], strides = [1, 1]} : vector<8x392xf32> to vector<8x18xf32>
    %580 = vector.extract_strided_slice %569 {offsets = [0, 220], sizes = [8, 18], strides = [1, 1]} : vector<8x392xf32> to vector<8x18xf32>
    %581 = vector.extract_strided_slice %569 {offsets = [0, 242], sizes = [8, 18], strides = [1, 1]} : vector<8x392xf32> to vector<8x18xf32>
    %582 = vector.extract_strided_slice %569 {offsets = [0, 264], sizes = [8, 18], strides = [1, 1]} : vector<8x392xf32> to vector<8x18xf32>
    %583 = vector.extract_strided_slice %569 {offsets = [0, 286], sizes = [8, 18], strides = [1, 1]} : vector<8x392xf32> to vector<8x18xf32>
    %584 = vector.extract_strided_slice %569 {offsets = [0, 308], sizes = [8, 18], strides = [1, 1]} : vector<8x392xf32> to vector<8x18xf32>
    %585 = vector.extract_strided_slice %569 {offsets = [0, 330], sizes = [8, 18], strides = [1, 1]} : vector<8x392xf32> to vector<8x18xf32>
    %586 = vector.extract_strided_slice %569 {offsets = [0, 352], sizes = [8, 18], strides = [1, 1]} : vector<8x392xf32> to vector<8x18xf32>
    %587 = vector.extract_strided_slice %569 {offsets = [0, 374], sizes = [8, 18], strides = [1, 1]} : vector<8x392xf32> to vector<8x18xf32>
    %588 = tpu.concatenate %570, %571, %572, %573, %574, %575, %576, %577, %578, %579, %580, %581, %582, %583, %584, %585 in 1 : vector<8x18xf32>, vector<8x18xf32>, vector<8x18xf32>, vector<8x18xf32>, vector<8x18xf32>, vector<8x18xf32>, vector<8x18xf32>, vector<8x18xf32>, vector<8x18xf32>, vector<8x18xf32>, vector<8x18xf32>, vector<8x18xf32>, vector<8x18xf32>, vector<8x18xf32>, vector<8x18xf32>, vector<8x18xf32> -> vector<8x288xf32>
    %589 = tpu.concatenate %586, %587 in 1 : vector<8x18xf32>, vector<8x18xf32> -> vector<8x36xf32>
    %590 = tpu.concatenate %588, %589 in 1 : vector<8x288xf32>, vector<8x36xf32> -> vector<8x324xf32>
    %591 = vector.extract_strided_slice %590 {offsets = [0, 0], sizes = [1, 324], strides = [1, 1]} : vector<8x324xf32> to vector<1x324xf32>
    %592 = vector.extract_strided_slice %590 {offsets = [2, 0], sizes = [1, 324], strides = [1, 1]} : vector<8x324xf32> to vector<1x324xf32>
    %593 = vector.extract_strided_slice %590 {offsets = [4, 0], sizes = [1, 324], strides = [1, 1]} : vector<8x324xf32> to vector<1x324xf32>
    %594 = vector.extract_strided_slice %590 {offsets = [6, 0], sizes = [1, 324], strides = [1, 1]} : vector<8x324xf32> to vector<1x324xf32>
    %595 = vector.extract_strided_slice %590 {offsets = [1, 0], sizes = [1, 324], strides = [1, 1]} : vector<8x324xf32> to vector<1x324xf32>
    %596 = vector.extract_strided_slice %590 {offsets = [3, 0], sizes = [1, 324], strides = [1, 1]} : vector<8x324xf32> to vector<1x324xf32>
    %597 = vector.extract_strided_slice %590 {offsets = [5, 0], sizes = [1, 324], strides = [1, 1]} : vector<8x324xf32> to vector<1x324xf32>
    %598 = vector.extract_strided_slice %590 {offsets = [7, 0], sizes = [1, 324], strides = [1, 1]} : vector<8x324xf32> to vector<1x324xf32>
    %599 = tpu.concatenate %591, %592, %593, %594, %595, %596, %597, %598 in 0 : vector<1x324xf32>, vector<1x324xf32>, vector<1x324xf32>, vector<1x324xf32>, vector<1x324xf32>, vector<1x324xf32>, vector<1x324xf32>, vector<1x324xf32> -> vector<8x324xf32>
    %c0_42 = arith.constant 0 : index
    %c0_43 = arith.constant 0 : index
    %600 = vector.load %arg6[%c0_42, %c0_43] : memref<8x324xf32, #tpu.memory_space<vmem>>, vector<8x324xf32>
    tpu.vector_store %arg6[%c0_42, %c0_43], %599 {strides = array<i32>} : memref<8x324xf32, #tpu.memory_space<vmem>>, vector<8x324xf32>,
    return
  }
}

</mosaic_0001>

<bundles_post_ra>
// kernel: tpu_custom_call.1
= control target key start
LH: loop header
LB: loop body
LE: loop exit
PB: predicated region body
PF: predicated region fallthrough
CT: control target
= control target key end

     0   :  { %s4769_s0 = inlined_call_operand.hbm [shape: f32[8], index: 0, kind: input, shape index: {}]   ;;  %s4770_s1 = inlined_call_operand.vmem [shape: f32[2], index: 1, kind: input, shape index: {}]   ;;  %s4771_s2 = inlined_call_operand.vmem [shape: f32[100], index: 2, kind: input, shape index: {}]   ;;  %s4772_s3 = inlined_call_operand.vmem [shape: f32[2], index: 3, kind: input, shape index: {}]   ;;  %s4773_s4 = inlined_call_operand.hbm [shape: f32[8,256], index: 4, kind: input, shape index: {}]   ;;  %s4774_s5 = inlined_call_operand.vmem [shape: f32[1,512], index: 5, kind: input, shape index: {}]   ;;  %s4775_s6 = inlined_call_operand.hbm [shape: f32[8,324], index: 6, kind: output, shape index: {}]  }
   0x1   :  { %4954 = sst [smem:[#allocation85_spill]] %s4775_s6 }
   0x2   :  { %11 = vsyncpa [#allocation6], 0 }
   0x3   :  { %12 = vsyncpa [#allocation7], 0 }
   0x4   :  { %13 = vsyncpa [#allocation10], 0 }
   0x5   :  { %14 = vsyncpa [#allocation4], 0  ;;  %s40_s23 = sshll.u32 %s4771_s2, 4  ;;  %s41_s23 = int_to_ptr.vmem [resolvable:$true] %s40_s23 }
   0x6   :  { %15 = vsyncpa [#allocation5], 0  ;;  %s2636_s24 = scalar_lea.vmem %s41_s23, 16  ;;  %p2641_p1 = scmp.lt.s32.totalorder %s41_s23, %s41_s23 }
   0x7   :  { %p2637_p0 = scmp.ne.s32.totalorder %s41_s23, %s2636_s24  ;;  %p2642_p2 = scmp.lt.s32.totalorder %s2636_s24, %s2636_s24 }
   0x9   :  { %p2643_p3 = por %p2642_p2, %p2641_p1 }
   0xb   :  { %p2644_p4 = pnand %p2643_p3, %p2637_p0 }
   0xd   :  { %2647 = shalt.err (!%p2644_p4)
}
   0xe   :  { %s2736_s25 = smov [#allocation9]   ;;  %s2648_s28 = scalar_lea.hbm %s4769_s0, 16 }
   0xf   :  { %43 = dma.vmem_to_smem %s41_s23, 16, %s2736_s25, [#allocation10]  }
  0x10   :  { %p2649_p5 = scmp.ne.s32.totalorder %s4769_s0, %s2648_s28  ;;  %p2652_p6 = scmp.lt.u32.totalorder %s2648_s28, %s4769_s0 }
  0x12   :  { %p2654_p7 = pnand %p2652_p6, %p2649_p5 }
  0x14   :  { %2657 = shalt.err (!%p2654_p7)
}
  0x15   :  { %s2737_s8 = smov [#allocation3]   ;;  %s30_s13 = sshll.u32 %s4770_s1, 4  ;;  %s31_s13 = int_to_ptr.vmem [resolvable:$true] %s30_s13 }
  0x16   :  { %23 = dma.hbm_to_smem %s4769_s0, 16, %s2737_s8, [#allocation6]  }
  0x17   :  { %s50_s16 = sshll.u32 %s4772_s3, 4  ;;  %s2658_s17 = scalar_lea.vmem %s31_s13, 16  ;;  %s51_s16 = int_to_ptr.vmem [resolvable:$true] %s50_s16 }
  0x18   :  { %p2659_p8 = scmp.ne.s32.totalorder %s31_s13, %s2658_s17  ;;  %p2663_p9 = scmp.lt.s32.totalorder %s31_s13, %s31_s13 }
  0x19   :  { %p2664_p10 = scmp.lt.s32.totalorder %s2658_s17, %s2658_s17 }
  0x1b   :  { %p2665_p11 = por %p2664_p10, %p2663_p9 }
  0x1d   :  { %p2666_p12 = pnand %p2665_p11, %p2659_p8 }
  0x1f   :  { %2669 = shalt.err (!%p2666_p12)
}
  0x20   :  { %s2738_s18 = smov [#allocation8]   ;;  %s2670_s0 = scalar_lea.vmem %s51_s16, 16 }
  0x21   :  { %33 = dma.vmem_to_smem %s31_s13, 16, %s2738_s18, [#allocation7]  }
  0x22   :  { %p2671_p13 = scmp.ne.s32.totalorder %s51_s16, %s2670_s0  ;;  %p2675_p0 = scmp.lt.s32.totalorder %s51_s16, %s51_s16 }
  0x23   :  { %p2676_p1 = scmp.lt.s32.totalorder %s2670_s0, %s2670_s0 }
  0x25   :  { %p2677_p2 = por %p2676_p1, %p2675_p0 }
  0x27   :  { %p2678_p3 = pnand %p2677_p2, %p2671_p13 }
  0x29   :  { %2681 = shalt.err (!%p2678_p3)
}
  0x2a   :  { %s2739_s1 = smov [#allocation11]   ;;  %s2740_s3 = smov [#allocation12]  }
  0x2b   :  { %53 = dma.vmem_to_smem %s51_s16, 16, %s2739_s1, [#allocation10]  }
  0x2c   :  { %s60_s19 = sshll.u32 %s2740_s3, 4  ;;  %s2682_s22 = scalar_lea.hbm %s4773_s4, 256  ;;  %s61_s19 = int_to_ptr.vmem [resolvable:$true] %s60_s19 }
  0x2d   :  { %p2683_p4 = scmp.ne.s32.totalorder %s4773_s4, %s2682_s22  ;;  %p2686_p5 = scmp.lt.u32.totalorder %s2682_s22, %s4773_s4 }
  0x2f   :  { %p2688_p6 = pnand %p2686_p5, %p2683_p4 }
  0x31   :  { %2691 = shalt.err (!%p2688_p6)
}
  0x32   :  { %s2692_s27 = scalar_lea.vmem %s61_s19, 256  ;;  %p2697_p8 = scmp.lt.s32.totalorder %s61_s19, %s61_s19 }
  0x33   :  { %p2693_p7 = scmp.ne.s32.totalorder %s61_s19, %s2692_s27  ;;  %p2698_p9 = scmp.lt.s32.totalorder %s2692_s27, %s2692_s27 }
  0x35   :  { %p2699_p10 = por %p2698_p9, %p2697_p8 }
  0x37   :  { %p2700_p11 = pnand %p2699_p10, %p2693_p7 }
  0x39   :  { %2703 = shalt.err (!%p2700_p11)
}
  0x3a   :  { %63 = dma.hbm_to_vmem [thread:$0]  %s4773_s4, 256, %s61_s19, [#allocation4]  }
  0x3b   :  { %2726 = dma.done.wait [#allocation6], 16  }
  0x3c   :  { %2727 = vsyncadd [#allocation6], 4294967280 }
  0x3d   :  { %2728 = dma.done.wait [#allocation7], 16  }
  0x3e   :  { %2729 = vsyncadd [#allocation7], 4294967280 }
  0x3f   :  { %2730 = dma.done.wait [#allocation10], 32  }
  0x40   :  { %2731 = vsyncadd [#allocation10], 4294967264 }
  0x41   :  { %2732 = dma.done.wait [#allocation4], 256  }
  0x42   :  { %2733 = vsyncadd [#allocation4], 4294967040 }
  0x43   :  { %81 = sfence }
  0x44   :  { %s90_s30 = sld [smem:[#allocation3]]  ;;  %v184_v0 = vlaneseq  ;;  %s2322_s2 = sld [smem:[#allocation3 + $0x1]]  ;;  %v2601_v2 = vld [vmem:[#allocation12] ss:$8 sps:$4 sm:$0xff]   ;;  %v2603_v3 = vld [vmem:[#allocation12 + $0x4] ss:$8 sps:$4 sm:$0xff]  }
  0x45   :  { %s2325_s7 = sld [smem:[#allocation3 + $0x2]]  ;;  %s2328_s8 = sld [smem:[#allocation3 + $0x3]]  ;;  %v2869_v5 = vld [vmem:[%s4774_s5] sm:$0xf]  ;;  %vm200_vm0 = vcmask 1041409   ;;  %v2741_v60 = vmov 0.0  }
  0x46   :  { %s2855_s9 = sld [smem:[#allocation3 + $0x4]]  ;;  %v2857_v1 = vshrl.u32 %v184_v0, 7  ;;  %s2859_s4 = sld [smem:[#allocation3 + $0x5]]  ;;  %231 = vst [vmem:[#allocation2] sm:$0xff] %v2741_v60  ;;  %232 = vst [vmem:[#allocation2 + $0x8] sm:$0xff] %v2741_v60  ;;  %vm223_vm1 = vcmask 1043459  }
  0x47   :  { %s2861_s10 = sld [smem:[#allocation3 + $0x6]]  ;;  %s2874_s13 = sld [smem:[#allocation3 + $0x7]]  ;;  %vm228_vm2 = vcmask 1041408   ;;  %vm250_vm3 = vcmask 1044360   ;;  %vm251_vm4 = vcmask 7172   ;;  %vm237_vm5 = vcmask 691752  }
  0x48   :  { %v2864_v4 = vsub.s32 0, %v2857_v1  ;;  %v358_v8 = vsub.s32 1, %v2857_v1  ;;  %s2742_s5 = smov 81   ;;  %s2743_s14 = smov 75   ;;  %vm247_vm6 = vcmask 662528   ;;  %vm242_vm7 = vcmask 872152   ;;  %vm252_vm8 = vmor %vm251_vm4, %vm250_vm3 }
  0x49   :  { %s2744_s15 = smov 69   ;;  %s2745_s16 = smov 87   ;;  %vm257_vm9 = vcmask 183352   ;;  %vm262_vm10 = vcmask 363752   ;;  %vm267_vm11 = vcmask 544152   ;;  %vm272_vm12 = vcmask 724552  }
  0x4a   :  { %v91_v6 = vstv %s90_s30  ;;  %v355_v7 = vrot.slane %v2869_v5, %v2864_v4  ;;  %v95_v11 = vstv %s2322_s2  ;;  %v359_v44 = vrot.slane %v2869_v5, %v358_v8  ;;  %s2746_s17 = smov 93   ;;  %s2747_s18 = smov 99  }
  0x4b   :  { %v92_v9 = vmul.f32 %v2601_v2, %v91_v6  ;;  %v93_v10 = vmul.f32 %v2603_v3, %v91_v6  ;;  %v109_v12 = vstv %s2325_s7  ;;  %v96_v13 = vmul.f32 %v2601_v2, %v95_v11  ;;  %s2748_s0 = smov 117   ;;  %s2749_s1 = smov 105  }
  0x4c   :  { %v97_v14 = vmul.f32 %v2603_v3, %v95_v11  ;;  %v110_v15 = vmul.f32 %v2601_v2, %v109_v12  ;;  %v111_v16 = vmul.f32 %v2603_v3, %v109_v12  ;;  %v123_v17 = vstv %s2328_s8  ;;  %s2750_s3 = smov 111   ;;  %s2751_s19 = smov 123  }
  0x4d   :  { %v137_v18 = vstv %s2855_s9  ;;  %v141_v19 = vstv %s2859_s4  ;;  %v155_v20 = vstv %s2861_s10  ;;  %v2323_v21 = vrot.slane %v96_v13, 9  ;;  %s2752_s20 = smov 1   ;;  %s2753_s21 = smov 7  }
  0x4e   :  { %v2324_v22 = vrot.slane %v97_v14, 9  ;;  %v2326_v23 = vrot.slane %v110_v15, 10  ;;  %v2327_v24 = vrot.slane %v111_v16, 10  ;;  %v124_v25 = vmul.f32 %v2601_v2, %v123_v17  ;;  %s2754_s22 = smov 25   ;;  %s2755_s23 = smov 13  }
  0x4f   :  { %v125_v26 = vmul.f32 %v2603_v3, %v123_v17  ;;  %v138_v27 = vmul.f32 %v2601_v2, %v137_v18  ;;  %v139_v28 = vmul.f32 %v2603_v3, %v137_v18  ;;  %v106_v29 = vadd.f32 %v2323_v21, %v92_v9  ;;  %s2756_s24 = smov 19   ;;  %s2757_s25 = smov 31  }
  0x50   :  { %v107_v30 = vadd.f32 %v2324_v22, %v93_v10  ;;  %v142_v31 = vmul.f32 %v2601_v2, %v141_v19  ;;  %v143_v32 = vmul.f32 %v2603_v3, %v141_v19  ;;  %v2329_v33 = vrot.slane %v124_v25, 11  ;;  %s2894_s26 = sld [smem:[#allocation8]]  ;;  %s2896_s27 = sld [smem:[#allocation8 + $0x1]] }
  0x51   :  { %v2330_v34 = vrot.slane %v125_v26, 11  ;;  %v156_v35 = vmul.f32 %v2601_v2, %v155_v20  ;;  %v157_v36 = vmul.f32 %v2603_v3, %v155_v20  ;;  %v120_v37 = vadd.f32 %v2326_v23, %v106_v29  ;;  %s2906_s28 = sld [smem:[#allocation9 + $0x51]]  ;;  %s2908_s29 = sld [smem:[#allocation9 + $0x1f]] }
  0x52   :  { %v121_v38 = vadd.f32 %v2327_v24, %v107_v30  ;;  %v2333_v39 = vrot.slane %v142_v31, 9  ;;  %v2334_v40 = vrot.slane %v143_v32, 9  ;;  %v169_v43 = vstv %s2874_s13  ;;  %s2910_s30 = sld [smem:[#allocation9 + $0x52]]  ;;  %s2912_s2 = sld [smem:[#allocation9 + $0x20]] }
  0x53   :  { %v2336_v41 = vrot.slane %v156_v35, 10  ;;  %v2337_v42 = vrot.slane %v157_v36, 10  ;;  %v134_v45 = vadd.f32 %v2329_v33, %v120_v37  ;;  %v170_v49 = vmul.f32 %v2601_v2, %v169_v43  ;;  %s2914_s7 = sld [smem:[#allocation9 + $0x38]]  ;;  %s2916_s8 = sld [smem:[#allocation9 + $0x6]] }
  0x54   :  { %v135_v46 = vadd.f32 %v2330_v34, %v121_v38  ;;  %v152_v47 = vadd.f32 %v2333_v39, %v138_v27  ;;  %v153_v48 = vadd.f32 %v2334_v40, %v139_v28  ;;  %v171_v50 = vmul.f32 %v2603_v3, %v169_v43  ;;  %s2918_s9 = sld [smem:[#allocation9 + $0x53]]  ;;  %s2920_s4 = sld [smem:[#allocation9 + $0x21]] }
  0x55   :  { %v187_v53 = vrot.slane %v134_v45, %v2864_v4  ;;  %v2339_v54 = vrot.slane %v170_v49, 11  ;;  %v2883_v57 = vcombine.low %v355_v7, %v359_v44  ;;  %v190_v2 = vsub.s32 4, %v2857_v1  ;;  %s2922_s10 = sld [smem:[#allocation9 + $0x39]]  ;;  %s2925_s11 = sld [smem:[#allocation9 + $0x7]] }
  0x56   :  { %v166_v51 = vadd.f32 %v2336_v41, %v152_v47  ;;  %v167_v52 = vadd.f32 %v2337_v42, %v153_v48  ;;  %v2340_v55 = vrot.slane %v171_v50, 11  ;;  %v195_v56 = vrot.slane %v135_v46, %v2864_v4  ;;  %s2927_s12 = sld [smem:[#allocation9 + $0x54]]  ;;  %s2933_s13 = sld [smem:[#allocation9 + $0x22]] }
  0x57   :  { %v191_v6 = vrot.slane %v134_v45, %v190_v2  ;;  %v199_v7 = vrot.slane %v135_v46, %v190_v2  ;;  %vm286_vm13 = vcmask 1044392   ;;  %vm287_vm14 = vcmask 39940   ;;  %s3078_s6 = sld [smem:[#allocation9 + $0x3d]] }
  0x58   :  { %v180_v58 = vadd.f32 %v2339_v54, %v166_v51  ;;  %v181_v59 = vadd.f32 %v2340_v55, %v167_v52  ;;  %v201_v61 = vsel %vm200_vm0, %v195_v56, %v187_v53  ;;  %vm283_vm15 = vcmask 957440  }
  0x59   :  { %vm293_vm3 = vcmask 216152   ;;  %vm298_vm4 = vcmask 396552   ;;  %v334_v28 = vstv %s2894_s26  ;;  %v375_v29 = vstv %s2896_s27  ;;  %s3038_s26 = sld [smem:[#allocation9 + $0x56]]  ;;  %s4778_s27 = smov 125  }
  0x5a   :  { %v210_v62 = vrot.slane %v180_v58, %v2864_v4  ;;  %v218_v63 = vrot.slane %v181_v59, %v2864_v4  ;;  %v214_v8 = vrot.slane %v180_v58, %v190_v2  ;;  %v222_v9 = vrot.slane %v181_v59, %v190_v2 }
  0x5b   :  { %v202_v4 = vsel %vm200_vm0, %v199_v7, %v191_v6  ;;  %vm277_vm0 = vcmask 904952   ;;  %v392_v52 = vrot.slane %v2883_v57, 6  ;;  %v777_v56 = vstv %s2906_s28  ;;  %s3124_s28 = sld [smem:[#allocation9 + $0x2f]] }
  0x5c   :  { %v224_v0 = vsel %vm223_vm1, %v218_v63, %v210_v62  ;;  %v225_v10 = vsel %vm223_vm1, %v222_v9, %v214_v8  ;;  %vm288_vm1 = vmor %vm287_vm14, %vm286_vm13  ;;  %v744_v59 = vstv %s2908_s29  ;;  %v843_v60 = vstv %s2910_s30  ;;  %s3145_s30 = sld [smem:[#allocation9 + $0x58]] }
  0x5d   :  { %v229_v3 = vsel %vm228_vm2, %v201_v61, %v224_v0  ;;  %v230_v11 = vsel %vm228_vm2, %v202_v4, %v225_v10  ;;  %v810_v61 = vstv %s2912_s2  ;;  %v773_v0 = vstv %s2914_s7  ;;  %4968 = sst [smem:[#allocation32_spill]] %s3078_s6  ;;  %s3154_s29 = sld [smem:[#allocation9 + $0x30]] }
  0x5e   :  { %244 = vrot.lane.b32.xlu0 %v229_v3, %s2742_s5  ;;  %239 = vrot.lane.b32.xlu1 %v229_v3, %s2743_s14  ;;  %s2940_s5 = sld [smem:[#allocation9 + $0x3a]]  ;;  %v740_v2 = vstv %s2916_s8  ;;  %s2945_s14 = sld [smem:[#allocation9 + $0x8]]  ;;  %v876_v6 = vstv %s2920_s4  ;;  %v362_v4 = vsub.s32 2, %v2857_v1  ;;  %v366_v10 = vsub.s32 3, %v2857_v1 }
  0x5f   :  { %4965 = sst [smem:[#allocation29_spill]] %s3038_s26  ;;  %s3168_s7 = sld [smem:[#allocation9 + $0x63]]  ;;  %vm462_vm13 = vcmask 1039360   ;;  %vm529_vm14 = vcmask 1031168  }
  0x60   :  { %s3187_s2 = sld [smem:[#allocation9 + $0x18]]  ;;  %s3198_s8 = sld [smem:[#allocation9 + $0x27]] }
  0x61   :  { %s3223_s4 = sld [smem:[#allocation9 + $0x4c]] }
  0x62   :  { %234 = vrot.lane.b32.xlu0 %v229_v3, %s2744_s15  ;;  %254 = vrot.lane.b32.xlu1 %v229_v3, %s2745_s16  ;;  %s2948_s15 = sld [smem:[#allocation9 + $0x5f]]  ;;  %s2965_s16 = sld [smem:[#allocation9 + $0x2d]] }
  0x63   :  { %4979 = sst [smem:[#allocation41_spill]] %s3154_s29 }
  0x65   :  { %4983 = sst [smem:[#allocation45_spill]] %s3168_s7 }
  0x66   :  { %259 = vrot.lane.b32.xlu0 %v229_v3, %s2746_s17  ;;  %264 = vrot.lane.b32.xlu1 %v229_v3, %s2747_s18  ;;  %s2973_s17 = sld [smem:[#allocation9 + $0x3b]]  ;;  %s2975_s18 = sld [smem:[#allocation9 + $0x9]] }
  0x67   :  { %4986 = sst [smem:[#allocation48_spill]] %s3187_s2 }
  0x68   :  { %4955 = sst [smem:[#allocation19_spill]] %s2965_s16 }
  0x69   :  { %4988 = sst [smem:[#allocation50_spill]] %s3198_s8 }
  0x6a   :  { %280 = vrot.lane.b32.xlu0 %v230_v11, %s2748_s0  ;;  %269 = vrot.lane.b32.xlu1 %v229_v3, %s2749_s1  ;;  %s2985_s0 = sld [smem:[#allocation9 + $0x61]]  ;;  %s2989_s1 = sld [smem:[#allocation9 + $0x60]] }
  0x6b   :  { %4993 = sst [smem:[#allocation54_spill]] %s3223_s4 }
  0x6c   :  { %4956 = sst [smem:[#allocation20_spill]] %s2975_s18 }
  0x6e   :  { %274 = vrot.lane.b32.xlu0 %v229_v3, %s2750_s3  ;;  %290 = vrot.lane.b32.xlu1 %v230_v11, %s2751_s19  ;;  %v909_v3 = vstv %s2918_s9  ;;  %s4780_s3 = smov 127   ;;  %s3001_s19 = sld [smem:[#allocation9 + $0x46]] }
  0x6f   :  { %s3189_s9 = sld [smem:[#allocation9 + $0x31]] }
  0x70   :  { %4957 = sst [smem:[#allocation21_spill]] %s2985_s0 }
  0x71   :  { %4958 = sst [smem:[#allocation22_spill]] %s2989_s1 }
  0x72   :  { %295 = vrot.lane.b32.xlu0 %v230_v11, %s2752_s20  ;;  %300 = vrot.lane.b32.xlu1 %v230_v11, %s2753_s21  ;;  %s3008_s20 = sld [smem:[#allocation9 + $0x14]] }
  0x73   :  { %s3014_s21 = sld [smem:[#allocation9 + $0x24]] }
  0x74   :  { %4959 = sst [smem:[#allocation23_spill]] %s3001_s19 }
  0x76   :  { %315 = vrot.lane.b32.xlu0 %v230_v11, %s2754_s22  ;;  %305 = vrot.lane.b32.xlu1 %v230_v11, %s2755_s23  ;;  %s3016_s22 = sld [smem:[#allocation9 + $0x2e]]  ;;  %s4776_s23 = smov 126  }
  0x78   :  { %4960 = sst [smem:[#allocation24_spill]] %s3008_s20 }
  0x79   :  { %4961 = sst [smem:[#allocation25_spill]] %s3014_s21 }
  0x7a   :  { %310 = vrot.lane.b32.xlu0 %v230_v11, %s2756_s24  ;;  %325 = vrot.lane.b32.xlu1 %v230_v11, %s2757_s25  ;;  %v839_v11 = vstv %s2922_s10  ;;  %s3029_s24 = sld [smem:[#allocation9 + $0x48]]  ;;  %s3031_s25 = sld [smem:[#allocation9 + $0x47]] }
  0x7b   :  { %s3196_s10 = sld [smem:[#allocation9 + $0xe]] }
  0x7c   :  { %4962 = sst [smem:[#allocation26_spill]] %s3016_s22 }
  0x80   :  { %4963 = sst [smem:[#allocation27_spill]] %s3029_s24 }
  0x81   :  { %4964 = sst [smem:[#allocation28_spill]] %s3031_s25 }
  0x82   :  { %4987 = sst [smem:[#allocation49_spill]] %s3196_s10 }
  0xd0   :  { %v245_v12 = vpop.permute.xlu0 %244  ;;  %v240_v13 = vpop.permute.xlu1 %239 }
  0xd1   :  { %v246_v14 = vrot.slane %v245_v12, 4 }
  0xd3   :  { %v248_v17 = vsel %vm247_vm6, %v246_v14, %v245_v12  ;;  %vm308_vm6 = vcmask 757352  }
  0xd4   :  { %v235_v15 = vpop.permute.xlu0 %234  ;;  %v255_v16 = vpop.permute.xlu1 %254 }
  0xd5   :  { %238 = vst.msk [vmem:[#allocation2] sm:$0xf] %vm237_vm5, %v235_v15  ;;  %vm303_vm5 = vcmask 576952  }
  0xd6   :  { %243 = vst.msk [vmem:[#allocation2] sm:$0xf] %vm242_vm7, %v240_v13  ;;  %vm318_vm7 = vcmask 203776  }
  0xd7   :  { %253 = vst.msk [vmem:[#allocation2] sm:$0xff] %vm252_vm8, %v248_v17  ;;  %vm321_vm8 = vcmask 1044424   ;;  %v806_v17 = vstv %s2925_s11  ;;  %s3234_s11 = sld [smem:[#allocation9 + $0x1]] }
  0xd8   :  { %258 = vst.msk [vmem:[#allocation2 + $0x4] sm:$0xf] %vm257_vm9, %v255_v16  ;;  %v260_v18 = vpop.permute.xlu0 %259  ;;  %v265_v19 = vpop.permute.xlu1 %264  ;;  %vm322_vm9 = vcmask 72708  }
  0xd9   :  { %263 = vst.msk [vmem:[#allocation2 + $0x4] sm:$0xf] %vm262_vm10, %v260_v18  ;;  %vm313_vm10 = vcmask 937752  }
  0xda   :  { %268 = vst.msk [vmem:[#allocation2 + $0x4] sm:$0xf] %vm267_vm11, %v265_v19  ;;  %vm323_vm11 = vmor %vm322_vm9, %vm321_vm8  ;;  %v975_v19 = vstv %s2927_s12  ;;  %s3209_s12 = sld [smem:[#allocation9 + $0x1b]]  ;;  %vm1977_vm8 = vcmask 867328   ;;  %vm1993_vm9 = vcmask 687104  }
  0xdc   :  { %v281_v20 = vpop.permute.xlu0 %280  ;;  %v270_v21 = vpop.permute.xlu1 %269 }
  0xdd   :  { %v282_v22 = vrot.slane %v281_v20, 4  ;;  %273 = vst.msk [vmem:[#allocation2 + $0x4] sm:$0xf] %vm272_vm12, %v270_v21  ;;  %vm328_vm12 = vcmask 248952   ;;  %4996 = sst [smem:[#allocation57_spill]] %s3234_s11  ;;  %s3319_s11 = sld [smem:[#allocation9 + $0x11]] }
  0xdf   :  { %v284_v25 = vsel %vm283_vm15, %v282_v22, %v281_v20  ;;  %vm596_vm15 = vcmask 1022976  }
  0xe0   :  { %v275_v23 = vpop.permute.xlu0 %274  ;;  %v291_v24 = vpop.permute.xlu1 %290  ;;  %4990 = sst [smem:[#allocation52_spill]] %s3209_s12  ;;  %s5072_s12 = sld [smem:[#allocation57_spill]] }
  0xe1   :  { %278 = vst.msk [vmem:[#allocation2 + $0x4] sm:$0xf] %vm277_vm0, %v275_v23  ;;  %vm663_vm0 = vcmask 1014784  }
  0xe2   :  { %289 = vst.msk [vmem:[#allocation2 + $0x4] sm:$0xff] %vm288_vm1, %v284_v25  ;;  %vm1330_vm1 = vcmask 506880  }
  0xe3   :  { %294 = vst.msk [vmem:[#allocation2 + $0x8] sm:$0xf] %vm293_vm3, %v291_v24  ;;  %v363_v24 = vrot.slane %v2869_v5, %v362_v4  ;;  %v1639_v4 = vstv %s3008_s20  ;;  %s4794_s20 = smov 61   ;;  %5020 = sst [smem:[#allocation25_spill]] %s3319_s11  ;;  %vm1397_vm3 = vcmask 498688  }
  0xe4   :  { %v296_v26 = vpop.permute.xlu0 %295  ;;  %v301_v27 = vpop.permute.xlu1 %300 }
  0xe5   :  { %299 = vst.msk [vmem:[#allocation2 + $0x8] sm:$0xf] %vm298_vm4, %v296_v26  ;;  %v942_v26 = vstv %s2933_s13  ;;  %s5073_s13 = sld [smem:[#allocation52_spill]]  ;;  %vm1464_vm4 = vcmask 490496  }
  0xe6   :  { %304 = vst.msk [vmem:[#allocation2 + $0x8] sm:$0xf] %vm303_vm5, %v301_v27  ;;  %v367_v27 = vrot.slane %v2869_v5, %v366_v10  ;;  %vm1531_vm5 = vcmask 482304  }
  0xe8   :  { %v316_v30 = vpop.permute.xlu0 %315  ;;  %v306_v31 = vpop.permute.xlu1 %305 }
  0xe9   :  { %v330_v32 = vld [vmem:[#allocation2] sm:$0xff]  ;;  %v317_v33 = vrot.slane %v316_v30, 4  ;;  %309 = vst.msk [vmem:[#allocation2 + $0x8] sm:$0xf] %vm308_vm6, %v306_v31  ;;  %vm1598_vm6 = vcmask 474112  }
  0xea   :  { %v335_v34 = vadd.f32 %v334_v28, %v330_v32  ;;  %v376_v35 = vadd.f32 %v375_v29, %v330_v32  ;;  %v872_v32 = vstv %s2945_s14  ;;  %s3268_s14 = sld [smem:[#allocation9 + $0x35]] }
  0xeb   :  { %v319_v36 = vsel %vm318_vm7, %v317_v33, %v316_v30  ;;  %v905_v30 = vstv %s2940_s5  ;;  %v1676_v33 = vstv %s2948_s15  ;;  %s3232_s5 = sld [smem:[#allocation9 + $0x1c]]  ;;  %s3249_s15 = sld [smem:[#allocation9 + $0x1d]]  ;;  %vm4953_vm7 = vcmask 1043456  }
  0xec   :  { %v311_v37 = vpop.permute.xlu0 %310  ;;  %v326_v38 = vpop.permute.xlu1 %325  ;;  %v2341_v39 = vmul.f32 -1.442695, %v335_v34  ;;  %v2344_v40 = vmul.f32 -1.442695, %v376_v35 }
  0xed   :  { %314 = vst.msk [vmem:[#allocation2 + $0x8] sm:$0xf] %vm313_vm10, %v311_v37  ;;  %vm2090_vm10 = vcmask 375808  }
  0xee   :  { %324 = vst.msk [vmem:[#allocation2 + $0x8] sm:$0xff] %vm323_vm11, %v319_v36  ;;  %2604 = vpow2.f32 %v2341_v39  ;;  %v3018_v39 = vcombine.low %v363_v24, %v367_v27  ;;  %v1077_v27 = vstv %s3038_s26  ;;  %s4977_s26 = smov 127   ;;  %vm4952_vm11 = vcmask 1045504  }
  0xef   :  { %329 = vst.msk [vmem:[#allocation2 + $0xc] sm:$0xf] %vm328_vm12, %v326_v38  ;;  %2606 = vpow2.f32 %v2344_v40  ;;  %v1643_v38 = vstv %s2965_s16  ;;  %s3160_s16 = sld [smem:[#allocation9 + $0x4a]]  ;;  %vm2197_vm12 = vcmask 146432  }
  0xf0   :  { %5007 = sst [smem:[#allocation19_spill]] %s3268_s14  ;;  %s3357_s14 = sld [smem:[#allocation9 + $0x5d]] }
  0xf1   :  { %4995 = sst [smem:[#allocation56_spill]] %s3232_s5 }
  0xf2   :  { %4999 = sst [smem:[#allocation60_spill]] %s3249_s15  ;;  %s3317_s5 = sld [smem:[#allocation9 + $0x5b]] }
  0xf3   :  { %s3333_s15 = sld [smem:[#allocation9 + $0x43]] }
  0xf5   :  { %4982 = sst [smem:[#allocation44_spill]] %s3160_s16 }
  0xf6   :  { %v331_v41 = vld [vmem:[#allocation2 + $0x8] sm:$0xff]  ;;  %5031 = sst [smem:[#allocation65_spill]] %s3357_s14 }
  0xf7   :  { %v2900_v42 = vadd.f32 %v375_v29, %v331_v41  ;;  %v2903_v48 = vadd.f32 %v334_v28, %v331_v41 }
  0xf8   :  { %v2605_v43 = vpop.eup %2604 }
  0xf9   :  { %v2607_v44 = vpop.eup %2606  ;;  %v343_v45 = vadd.f32 1.0, %v2605_v43  ;;  %v2345_v46 = vmul.f32 -1.442695, %v2900_v42  ;;  %v2342_v49 = vmul.f32 -1.442695, %v2903_v48  ;;  %v971_v43 = vstv %s2973_s17  ;;  %s3295_s17 = sld [smem:[#allocation9 + $0x36]] }
  0xfa   :  { %v384_v47 = vadd.f32 1.0, %v2607_v44  ;;  %5025 = sst [smem:[#allocation32_spill]] %s3333_s15 }
  0xfb   :  { %2608 = vrcp.f32 %v343_v45 }
  0xfc   :  { %2610 = vpow2.f32 %v2345_v46  ;;  %v938_v46 = vstv %s2975_s18  ;;  %s4978_s18 = smov 61  }
  0xfd   :  { %2612 = vrcp.f32 %v384_v47 }
  0xfe   :  { %2614 = vpow2.f32 %v2342_v49  ;;  %v1808_v49 = vstv %s2985_s0  ;;  %s3110_s0 = sld [smem:[#allocation9 + $0x16]] }
  0xff   :  { %5013 = sst [smem:[#allocation29_spill]] %s3295_s17  ;;  %s5079_s17 = sld [smem:[#allocation56_spill]] }
 0x104   :  { %4971 = sst [smem:[#allocation35_spill]] %s3110_s0 }
 0x105   :  { %v2609_v50 = vpop.eup %2608 }
 0x106   :  { %v2611_v51 = vpop.eup %2610  ;;  %v349_v53 = vmul.f32 %v2609_v50, %v335_v34 }
 0x107   :  { %v2613_v54 = vpop.eup %2612  ;;  %v385_v58 = vadd.f32 1.0, %v2611_v51 }
 0x108   :  { %v390_v55 = vmul.f32 %v2613_v54, %v376_v35  ;;  %v2936_v62 = vmul.f32 %v2883_v57, %v349_v53  ;;  %v2615_v12 = vpop.eup %2614  ;;  %v1742_v54 = vstv %s2989_s1  ;;  %s3178_s1 = sld [smem:[#allocation9 + $0x59]] }
 0x109   :  { %2616 = vrcp.f32 %v385_v58  ;;  %v344_v25 = vadd.f32 1.0, %v2615_v12 }
 0x10a   :  { %v2938_v63 = vmul.f32 %v392_v52, %v390_v55  ;;  %v774_v13 = vmul.f32 %v773_v0, %v2936_v62  ;;  %v741_v15 = vmul.f32 %v740_v2, %v2936_v62  ;;  %v840_v28 = vmul.f32 %v839_v11, %v2936_v62 }
 0x10b   :  { %v807_v29 = vmul.f32 %v806_v17, %v2936_v62  ;;  %2618 = vrcp.f32 %v344_v25  ;;  %v906_v40 = vmul.f32 %v905_v30, %v2936_v62  ;;  %v873_v41 = vmul.f32 %v872_v32, %v2936_v62 }
 0x10c   :  { %v778_v7 = vmul.f32 %v777_v56, %v2938_v63  ;;  %v745_v57 = vmul.f32 %v744_v59, %v2938_v63  ;;  %v844_v8 = vmul.f32 %v843_v60, %v2938_v63  ;;  %v811_v9 = vmul.f32 %v810_v61, %v2938_v63 }
 0x10d   :  { %v910_v1 = vmul.f32 %v909_v3, %v2938_v63  ;;  %v877_v18 = vmul.f32 %v876_v6, %v2938_v63  ;;  %v976_v5 = vmul.f32 %v975_v19, %v2938_v63  ;;  %v943_v37 = vmul.f32 %v942_v26, %v2938_v63 }
 0x10e   :  { %v2399_v14 = vrot.slane %v778_v7, 10  ;;  %v2395_v16 = vrot.slane %v745_v57, 10  ;;  %v2407_v22 = vrot.slane %v844_v8, 10  ;;  %v2403_v23 = vrot.slane %v811_v9, 10  ;;  %4985 = sst [smem:[#allocation47_spill]] %s3178_s1 }
 0x10f   :  { %v2415_v31 = vrot.slane %v910_v1, 10  ;;  %v2411_v36 = vrot.slane %v877_v18, 10  ;;  %v2423_v45 = vrot.slane %v976_v5, 10  ;;  %v1677_v47 = vmul.f32 %v1676_v33, %v2938_v63 }
 0x110   :  { %v788_v20 = vadd.f32 %v2399_v14, %v774_v13  ;;  %v755_v21 = vadd.f32 %v2395_v16, %v741_v15  ;;  %v854_v34 = vadd.f32 %v2407_v22, %v840_v28  ;;  %v821_v35 = vadd.f32 %v2403_v23, %v807_v29 }
 0x111   :  { %v920_v50 = vadd.f32 %v2415_v31, %v906_v40  ;;  %v887_v51 = vadd.f32 %v2411_v36, %v873_v41  ;;  %v2419_v52 = vrot.slane %v943_v37, 10  ;;  %v1644_v53 = vmul.f32 %v1643_v38, %v2938_v63 }
 0x112   :  { %792 = vrot.lane.b32.xlu0 %v788_v20, %s4780_s3  ;;  %759 = vrot.lane.b32.xlu1 %v755_v21, %s4780_s3  ;;  %v393_v55 = vrot.slane %v3018_v39, 6  ;;  %v972_v58 = vmul.f32 %v971_v43, %v2936_v62  ;;  %v939_v7 = vmul.f32 %v938_v46, %v2936_v62  ;;  %v1672_v57 = vstv %s3001_s19  ;;  %s4783_s3 = smov 124   ;;  %s3158_s19 = sld [smem:[#allocation9 + $0x26]] }
 0x113   :  { %v2617_v44 = vpop.eup %2616  ;;  %v2511_v9 = vrot.slane %v1677_v47, 10  ;;  %v1809_v10 = vmul.f32 %v1808_v49, %v2938_v63  ;;  %v2507_v14 = vrot.slane %v1644_v53, 10  ;;  %v1743_v15 = vmul.f32 %v1742_v54, %v2938_v63 }
 0x114   :  { %v391_v8 = vmul.f32 %v2617_v44, %v2900_v42  ;;  %v986_v12 = vadd.f32 %v2423_v45, %v972_v58  ;;  %v953_v13 = vadd.f32 %v2419_v52, %v939_v7  ;;  %v1673_v16 = vmul.f32 %v1672_v57, %v2936_v62 }
 0x115   :  { %v1044_v42 = vstv %s3014_s21  ;;  %v1709_v1 = vstv %s3016_s22  ;;  %v1640_v18 = vmul.f32 %v1639_v4, %v2936_v62  ;;  %v1804_v20 = vstv %s3029_s24  ;;  %v2619_v22 = vpop.eup %2618  ;;  %s3108_s24 = sld [smem:[#allocation9 + $0x57]]  ;;  %s4792_s21 = smov 60  }
 0x116   :  { %858 = vrot.lane.b32.xlu0 %v854_v34, %s4776_s23  ;;  %825 = vrot.lane.b32.xlu1 %v821_v35, %s4776_s23  ;;  %s3054_s23 = sld [smem:[#allocation9 + $0xb]]  ;;  %v1738_v21 = vstv %s3031_s25  ;;  %v3080_v23 = vmul.f32 %v393_v55, %v391_v8  ;;  %v1687_v24 = vadd.f32 %v2511_v9, %v1673_v16  ;;  %v2527_v25 = vrot.slane %v1809_v10, 10  ;;  %s3126_s25 = sld [smem:[#allocation9 + $0xc]] }
 0x117   :  { %v1654_v28 = vadd.f32 %v2507_v14, %v1640_v18  ;;  %v2519_v29 = vrot.slane %v1743_v15, 10  ;;  %v1045_v31 = vmul.f32 %v1044_v42, %v2938_v63  ;;  %v1710_v5 = vmul.f32 %v1709_v1, %v2938_v63  ;;  %s3147_s22 = sld [smem:[#allocation9 + $0x17]] }
 0x118   :  { %4969 = vst [vmem:[#allocation33_spill] sm:$0xff] %v3080_v23  ;;  %v1805_v34 = vmul.f32 %v1804_v20, %v2936_v62  ;;  %v350_v35 = vmul.f32 %v2619_v22, %v2903_v48  ;;  %v1739_v36 = vmul.f32 %v1738_v21, %v2936_v62  ;;  %v1078_v44 = vmul.f32 %v1077_v27, %v2938_v63  ;;  %4981 = sst [smem:[#allocation43_spill]] %s3158_s19 }
 0x119   :  { %v2435_v47 = vrot.slane %v1045_v31, 10  ;;  %v2515_v48 = vrot.slane %v1710_v5, 10  ;;  %v1073_v53 = vstv %s3078_s6  ;;  %v845_v55 = vmul.f32 %v843_v60, %v3080_v23  ;;  %s3156_s6 = sld [smem:[#allocation9 + $0xd]] }
 0x11a   :  { %924 = vrot.lane.b32.xlu0 %v920_v50, %s4778_s27  ;;  %891 = vrot.lane.b32.xlu1 %v887_v51, %s4778_s27  ;;  %s3061_s27 = sld [smem:[#allocation9 + $0x15]]  ;;  %v1819_v37 = vadd.f32 %v2527_v25, %v1805_v34  ;;  %v1753_v45 = vadd.f32 %v2519_v29, %v1739_v36  ;;  %v779_v50 = vmul.f32 %v777_v56, %v3080_v23 }
 0x11b   :  { %v3113_v51 = vmul.f32 %v3018_v39, %v350_v35  ;;  %v2439_v39 = vrot.slane %v1078_v44, 10  ;;  %v746_v9 = vmul.f32 %v744_v59, %v3080_v23  ;;  %v1074_v10 = vmul.f32 %v1073_v53, %v2936_v62 }
 0x11c   :  { %4966 = sst [smem:[#allocation30_spill]] %s3054_s23  ;;  %v1040_v40 = vstv %s3054_s23  ;;  %v2400_v8 = vrot.slane %v779_v50, 10  ;;  %s3138_s23 = sld [smem:[#allocation9 + $0x62]]  ;;  %v911_v15 = vmul.f32 %v909_v3, %v3080_v23  ;;  %v1143_v22 = vstv %s3108_s24 }
 0x11d   :  { %4972 = vst [vmem:[#allocation36_spill] sm:$0xff] %v3113_v51  ;;  %v1041_v56 = vmul.f32 %v1040_v40, %v2936_v62  ;;  %4973 = sst [smem:[#allocation37_spill]] %s3126_s25  ;;  %v775_v59 = vmul.f32 %v773_v0, %v3113_v51  ;;  %v1088_v60 = vadd.f32 %v2439_v39, %v1074_v10  ;;  %v2396_v14 = vrot.slane %v746_v9, 10  ;;  %s4902_s24 = smov 58  }
 0x11e   :  { %990 = vrot.lane.b32.xlu0 %v986_v12, %s4783_s3  ;;  %957 = vrot.lane.b32.xlu1 %v953_v13, %s4783_s3  ;;  %s4785_s3 = smov 62   ;;  %4976 = sst [smem:[#allocation40_spill]] %s3147_s22  ;;  %v2408_v12 = vrot.slane %v845_v55, 10  ;;  %v812_v0 = vmul.f32 %v810_v61, %v3080_v23  ;;  %v841_v16 = vmul.f32 %v839_v11, %v3113_v51  ;;  %v742_v61 = vmul.f32 %v740_v2, %v3113_v51 }
 0x11f   :  { %v1055_v58 = vadd.f32 %v2435_v47, %v1041_v56  ;;  %4980 = sst [smem:[#allocation42_spill]] %s3156_s6  ;;  %v789_v13 = vadd.f32 %v2400_v8, %v775_v59  ;;  %v1775_v3 = vstv %s3124_s28  ;;  %v1106_v11 = vstv %s3126_s25  ;;  %s3203_s25 = sld [smem:[#allocation9 + $0x2]] }
 0x120   :  { %4967 = sst [smem:[#allocation31_spill]] %s3061_s27  ;;  %v1705_v41 = vstv %s3061_s27  ;;  %s3140_s27 = sld [smem:[#allocation9 + $0x3f]]  ;;  %v855_v25 = vadd.f32 %v2408_v12, %v841_v16  ;;  %v756_v2 = vadd.f32 %v2396_v14, %v742_v61  ;;  %v2416_v5 = vrot.slane %v911_v15, 10 }
 0x121   :  { %v1706_v52 = vmul.f32 %v1705_v41, %v2936_v62  ;;  %v2404_v34 = vrot.slane %v812_v0, 10  ;;  %v878_v35 = vmul.f32 %v876_v6, %v3080_v23  ;;  %v1837_v44 = vstv %s3147_s22  ;;  %s3225_s22 = sld [smem:[#allocation9 + $0x3]] }
 0x122   :  { %1691 = vrot.lane.b32.xlu0 %v1687_v24, %s4785_s3  ;;  %1658 = vrot.lane.b32.xlu1 %v1654_v28, %s4785_s3  ;;  %s3106_s3 = sld [smem:[#allocation9 + $0x3e]]  ;;  %v1771_v24 = vstv %s3110_s0  ;;  %v977_v28 = vmul.f32 %v975_v19, %v3080_v23  ;;  %v1874_v19 = vstv %s3138_s23  ;;  %s4992_s0 = smov 126   ;;  %v907_v6 = vmul.f32 %v905_v30, %v3113_v51 }
 0x123   :  { %v1720_v7 = vadd.f32 %v2515_v48, %v1706_v52  ;;  %v1841_v47 = vstv %s3154_s29  ;;  %v1172_v48 = vstv %s3156_s6  ;;  %v1678_v56 = vmul.f32 %v1676_v33, %v3080_v23  ;;  %s3239_s6 = sld [smem:[#allocation9 + $0x1a]]  ;;  %s5011_s29 = smov 124  }
 0x124   :  { %v2424_v50 = vrot.slane %v977_v28, 10  ;;  %v1176_v52 = vstv %s3158_s19  ;;  %v1936_v39 = vstv %s3160_s16  ;;  %v2412_v55 = vrot.slane %v878_v35, 10  ;;  %s3251_s16 = sld [smem:[#allocation9 + $0x34]]  ;;  %s5001_s19 = smov 125  }
 0x125   :  { %4989 = sst [smem:[#allocation51_spill]] %s3203_s25  ;;  %v973_v33 = vmul.f32 %v971_v43, %v3113_v51  ;;  %v1275_v9 = vstv %s3178_s1  ;;  %v1903_v10 = vstv %s3187_s2  ;;  %v1907_v43 = vstv %s3189_s9  ;;  %s3262_s1 = sld [smem:[#allocation9 + $0x41]] }
 0x126   :  { %1823 = vrot.lane.b32.xlu0 %v1819_v37, %s4792_s21  ;;  %1757 = vrot.lane.b32.xlu1 %v1753_v45, %s4794_s20  ;;  %s3131_s21 = sld [smem:[#allocation9 + $0x25]]  ;;  %s3133_s20 = sld [smem:[#allocation9 + $0x49]]  ;;  %v1205_v36 = vstv %s3140_s27  ;;  %v1209_v37 = vstv %s3145_s30  ;;  %v808_v45 = vmul.f32 %v806_v17, %v3113_v51  ;;  %v921_v17 = vadd.f32 %v2416_v5, %v907_v6 }
 0x127   :  { %4975 = sst [smem:[#allocation39_spill]] %s3140_s27  ;;  %s3241_s27 = sld [smem:[#allocation9 + $0x4]]  ;;  %v987_v59 = vadd.f32 %v2424_v50, %v973_v33  ;;  %v1238_v12 = vstv %s3196_s10  ;;  %v1744_v15 = vmul.f32 %v1742_v54, %v3080_v23  ;;  %v1645_v0 = vmul.f32 %v1643_v38, %v3080_v23 }
 0x128   :  { %4970 = sst [smem:[#allocation34_spill]] %s3106_s3  ;;  %v1139_v18 = vstv %s3106_s3  ;;  %v822_v30 = vadd.f32 %v2404_v34, %v808_v45  ;;  %s3266_s3 = sld [smem:[#allocation9 + $0x5a]]  ;;  %v1674_v16 = vmul.f32 %v1672_v57, %v3113_v51  ;;  %v940_v38 = vmul.f32 %v938_v46, %v3113_v51 }
 0x129   :  { %4994 = sst [smem:[#allocation55_spill]] %s3225_s22  ;;  %s3284_s10 = sld [smem:[#allocation9 + $0xf]]  ;;  %v474_v54 = vstv %s3223_s4  ;;  %v1079_v5 = vmul.f32 %v1077_v27, %v3080_v23  ;;  %v2520_v6 = vrot.slane %v1744_v15, 10  ;;  %v2508_v45 = vrot.slane %v1645_v0, 10 }
 0x12a   :  { %1059 = vrot.lane.b32.xlu0 %v1055_v58, %s4977_s26  ;;  %1724 = vrot.lane.b32.xlu1 %v1720_v7, %s4978_s18  ;;  %s3176_s18 = sld [smem:[#allocation9 + $0x40]]  ;;  %v944_v58 = vmul.f32 %v942_v26, %v3080_v23  ;;  %4997 = sst [smem:[#allocation58_spill]] %s3239_s6  ;;  %v1940_v7 = vstv %s3168_s7  ;;  %v874_v26 = vmul.f32 %v872_v32, %v3113_v51  ;;  %v1711_v50 = vmul.f32 %v1709_v1, %v3080_v23 }
 0x12b   :  { %5000 = sst [smem:[#allocation61_spill]] %s3251_s16  ;;  %s3297_s25 = sld [smem:[#allocation9 + $0x4f]]  ;;  %v1740_v1 = vmul.f32 %v1738_v21, %v3113_v51  ;;  %v1338_v33 = vstv %s3262_s1  ;;  %v1810_v15 = vmul.f32 %v1808_v49, %v3080_v23  ;;  %v1707_v49 = vmul.f32 %v1705_v41, %v3113_v51 }
 0x12c   :  { %4974 = sst [smem:[#allocation38_spill]] %s3133_s20  ;;  %v1110_v29 = vstv %s3131_s21  ;;  %v1870_v31 = vstv %s3133_s20  ;;  %s3211_s20 = sld [smem:[#allocation9 + $0x33]]  ;;  %v888_v32 = vadd.f32 %v2412_v55, %v874_v26  ;;  %v2420_v14 = vrot.slane %v944_v58, 10 }
 0x12d   :  { %4998 = sst [smem:[#allocation59_spill]] %s3241_s27  ;;  %s3311_s22 = sld [smem:[#allocation9 + $0x42]]  ;;  %v1641_v55 = vmul.f32 %v1639_v4, %v3113_v51  ;;  %v2440_v26 = vrot.slane %v1079_v5, 10  ;;  %v1754_v4 = vadd.f32 %v2520_v6, %v1740_v1  ;;  %v1145_v1 = vmul.f32 %v1143_v22, %v3080_v23 }
 0x12e   :  { %1092 = vrot.lane.b32.xlu1 %v1088_v60, %s4977_s26  ;;  %794 = vrot.lane.b32.xlu0 %v789_v13, %s4977_s26  ;;  %v2512_v60 = vrot.slane %v1678_v56, 10  ;;  %v1242_v13 = vstv %s3198_s8  ;;  %s3286_s8 = sld [smem:[#allocation9 + $0x28]]  ;;  %v954_v46 = vadd.f32 %v2420_v14, %v940_v38  ;;  %s5021_s4 = smov 62   ;;  %v2516_v14 = vrot.slane %v1711_v50, 10 }
 0x12f   :  { %5010 = sst [smem:[#allocation20_spill]] %s3284_s10  ;;  %s3331_s27 = sld [smem:[#allocation9 + $0x2a]]  ;;  %v1655_v21 = vadd.f32 %v2508_v45, %v1641_v55  ;;  %v2528_v50 = vrot.slane %v1810_v15, 10  ;;  %v1777_v55 = vmul.f32 %v1775_v3, %v3080_v23  ;;  %v1211_v57 = vmul.f32 %v1209_v37, %v3080_v23 }
 0x130   :  { %4984 = sst [smem:[#allocation46_spill]] %s3176_s18  ;;  %v1271_v8 = vstv %s3176_s18  ;;  %s3260_s18 = sld [smem:[#allocation9 + $0x4d]]  ;;  %v1721_v41 = vadd.f32 %v2516_v14, %v1707_v49  ;;  %v1806_v14 = vmul.f32 %v1804_v20, %v3113_v51  ;;  %v1112_v49 = vmul.f32 %v1110_v29, %v3080_v23 }
 0x131   :  { %5014 = sst [smem:[#allocation26_spill]] %s3297_s25  ;;  %s3340_s16 = sld [smem:[#allocation9 + $0x5c]]  ;;  %v1876_v20 = vmul.f32 %v1874_v19, %v3080_v23  ;;  %v1938_v58 = vmul.f32 %v1936_v39, %v3113_v51  ;;  %v1111_v28 = vmul.f32 %v1110_v29, %v2938_v63 }
 0x132   :  { %4991 = sst [smem:[#allocation53_spill]] %s3211_s20  ;;  %860 = vrot.lane.b32.xlu0 %v855_v25, %s4992_s0  ;;  %761 = vrot.lane.b32.xlu1 %v756_v2, %s4977_s26  ;;  %v1688_v2 = vadd.f32 %v2512_v60, %v1674_v16  ;;  %v1342_v60 = vstv %s3266_s3  ;;  %s3342_s7 = sld [smem:[#allocation9 + $0x12]]  ;;  %v1304_v16 = vstv %s3284_s10  ;;  %v2456_v25 = vrot.slane %v1211_v57, 10 }
 0x133   :  { %s3304_s20 = sld [smem:[#allocation9 + $0x10]]  ;;  %5018 = sst [smem:[#allocation24_spill]] %s3311_s22  ;;  %v2536_v0 = vrot.slane %v1876_v20, 10 }
 0x134   :  { %v1308_v38 = vstv %s3286_s8  ;;  %s3355_s2 = sld [smem:[#allocation9 + $0x44]]  ;;  %s3366_s6 = sld [smem:[#allocation9 + $0x13]] }
 0x135   :  { %5024 = sst [smem:[#allocation21_spill]] %s3331_s27  ;;  %s3370_s10 = sld [smem:[#allocation9 + $0x2c]]  ;;  %v1442_v15 = vstv %s3331_s27 }
 0x136   :  { %926 = vrot.lane.b32.xlu0 %v921_v17, %s5001_s19  ;;  %827 = vrot.lane.b32.xlu1 %v822_v30, %s4992_s0  ;;  %5005 = sst [smem:[#allocation22_spill]] %s3260_s18  ;;  %s3276_s0 = sld [smem:[#allocation9 + $0x4e]]  ;;  %v2448_v17 = vrot.slane %v1145_v1, 10  ;;  %v1773_v1 = vmul.f32 %v1771_v24, %v3113_v51  ;;  %v1942_v30 = vmul.f32 %v1940_v7, %v3080_v23 }
 0x137   :  { %5027 = sst [smem:[#allocation31_spill]] %s3340_s16  ;;  %s3347_s18 = sld [smem:[#allocation9 + $0x2b]]  ;;  %v4916_v56 = vstv %s3340_s16 }
 0x138   :  { %5028 = sst [smem:[#allocation62_spill]] %s3342_s7  ;;  %v2544_v27 = vrot.slane %v1942_v30, 10  ;;  %s4900_s23 = smov 59  }
 0x139   :  { %5016 = sst [smem:[#allocation28_spill]] %s3304_s20  ;;  %v4915_v6 = vstv %s3304_s20  ;;  %s3473_s16 = sld [smem:[#allocation9 + $0x5e]] }
 0x13a   :  { %992 = vrot.lane.b32.xlu0 %v987_v59, %s5011_s29  ;;  %893 = vrot.lane.b32.xlu1 %v888_v32, %s5001_s19  ;;  %s3306_s19 = sld [smem:[#allocation9 + $0x29]]  ;;  %v1046_v59 = vmul.f32 %v1044_v42, %v3080_v23  ;;  %v1075_v42 = vmul.f32 %v1073_v53, %v3113_v51  ;;  %5030 = sst [smem:[#allocation64_spill]] %s3355_s2  ;;  %v4904_v53 = vstv %s3342_s7  ;;  %v1178_v32 = vmul.f32 %v1176_v52, %v3080_v23 }
 0x13b   :  { %5034 = sst [smem:[#allocation30_spill]] %s3366_s6  ;;  %s5045_s7 = smov 60  }
 0x13c   :  { %5009 = sst [smem:[#allocation23_spill]] %s3276_s0  ;;  %v1089_v5 = vadd.f32 %v2440_v26, %v1075_v42  ;;  %v1042_v26 = vmul.f32 %v1040_v40, %v3113_v51  ;;  %v4908_v42 = vstv %s3333_s15  ;;  %v2452_v35 = vrot.slane %v1178_v32, 10  ;;  %s5057_s21 = smov 125  }
 0x13d   :  { %5029 = sst [smem:[#allocation63_spill]] %s3347_s18  ;;  %s5069_s9 = sld [smem:[#allocation53_spill]] }
 0x13e   :  { %1693 = vrot.lane.b32.xlu0 %v1688_v2, %s5021_s4  ;;  %959 = vrot.lane.b32.xlu1 %v954_v46, %s5011_s29  ;;  %s5032_s29 = smov 61   ;;  %v2436_v46 = vrot.slane %v1046_v59, 10  ;;  %5036 = sst [smem:[#allocation27_spill]] %s3370_s10  ;;  %v4912_v59 = vstv %s3311_s22  ;;  %v4910_v2 = vstv %s3357_s14 }
 0x13f   :  { %5056 = sst [smem:[#allocation34_spill]] %s3473_s16  ;;  %s5070_s2 = sld [smem:[#allocation58_spill]] }
 0x140   :  { %v1375_v45 = vstv %s3306_s19  ;;  %v1056_v40 = vadd.f32 %v2436_v46, %v1042_v26  ;;  %v4911_v46 = vstv %s3347_s18  ;;  %v2444_v26 = vrot.slane %v1112_v49, 10  ;;  %s5064_s18 = smov 124   ;;  %s5071_s6 = sld [smem:[#allocation22_spill]] }
 0x141   :  { %v1872_v49 = vmul.f32 %v1870_v31, %v3113_v51  ;;  %s5074_s0 = sld [smem:[#allocation61_spill]]  ;;  %s5086_s15 = smov 60  }
 0x142   :  { %1759 = vrot.lane.b32.xlu0 %v1754_v4, %s5032_s29  ;;  %1660 = vrot.lane.b32.xlu1 %v1655_v21, %s5021_s4  ;;  %s3372_s4 = sld [smem:[#allocation9 + $0x45]]  ;;  %v1409_v4 = vstv %s3317_s5  ;;  %v4909_v21 = vstv %s3319_s11  ;;  %s5083_s11 = sld [smem:[#allocation26_spill]] }
 0x143   :  { %s5090_s30 = sld [smem:[#allocation29_spill]]  ;;  %s5096_s28 = sld [smem:[#allocation64_spill]] }
 0x144   :  { %s5097_s20 = sld [smem:[#allocation30_spill]]  ;;  %s5101_s27 = smov 58  }
 0x145   :  { %s5123_s22 = smov 127   ;;  %s5134_s1 = smov 62  }
 0x146   :  { %1094 = vrot.lane.b32.xlu0 %v1089_v5, %s4977_s26  ;;  %1726 = vrot.lane.b32.xlu1 %v1721_v41, %s5032_s29  ;;  %v1820_v5 = vadd.f32 %v2528_v50, %v1806_v14  ;;  %v2524_v41 = vrot.slane %v1777_v55, 10  ;;  %v1141_v50 = vmul.f32 %v1139_v18, %v3113_v51  ;;  %v1843_v55 = vmul.f32 %v1841_v47, %v3080_v23  ;;  %s5085_s29 = sld [smem:[#allocation55_spill]]  ;;  %s5135_s8 = sld [smem:[#allocation24_spill]] }
 0x147   :  { %v1108_v14 = vmul.f32 %v1106_v11, %v3113_v51  ;;  %s5138_s19 = sld [smem:[#allocation63_spill]]  ;;  %s5139_s5 = sld [smem:[#allocation65_spill]] }
 0x148   :  { %5037 = sst [smem:[#allocation66_spill]] %s3372_s4  ;;  %v1155_v34 = vadd.f32 %v2448_v17, %v1141_v50  ;;  %v1787_v61 = vadd.f32 %v2524_v41, %v1773_v1  ;;  %s5052_s4 = smov 126   ;;  %v1207_v17 = vmul.f32 %v1205_v36, %v3113_v51  ;;  %v1839_v41 = vmul.f32 %v1837_v44, %v3113_v51 }
 0x149   :  { %v2532_v20 = vrot.slane %v1843_v55, 10  ;;  %v1909_v50 = vmul.f32 %v1907_v43, %v3080_v23  ;;  %v1122_v57 = vadd.f32 %v2444_v26, %v1108_v14  ;;  %v1174_v1 = vmul.f32 %v1172_v48, %v3113_v51  ;;  %s5144_s25 = sld [smem:[#allocation27_spill]]  ;;  %s5155_s14 = smov 60  }
 0x14a   :  { %1061 = vrot.lane.b32.xlu0 %v1056_v40, %s4977_s26  ;;  %1825 = vrot.lane.b32.xlu1 %v1820_v5, %s5045_s7  ;;  %v4906_v40 = vstv %s3370_s10  ;;  %v1277_v5 = vmul.f32 %v1275_v9, %v3080_v23  ;;  %v1244_v55 = vmul.f32 %v1242_v13, %v3080_v23  ;;  %v1221_v26 = vadd.f32 %v2456_v25, %v1207_v17  ;;  %s5087_s10 = sld [smem:[#allocation60_spill]]  ;;  %s5100_s26 = sld [smem:[#allocation66_spill]] }
 0x14b   :  { %v1273_v14 = vmul.f32 %v1271_v8, %v3113_v51  ;;  %v1905_v25 = vmul.f32 %v1903_v10, %v3113_v51  ;;  %v2540_v30 = vrot.slane %v1909_v50, 10  ;;  %v1188_v29 = vadd.f32 %v2452_v35, %v1174_v1  ;;  %s4538_s3 = sld [smem:[#allocation11]] }
 0x14c   :  { %v2464_v32 = vrot.slane %v1277_v5, 10  ;;  %v1144_v17 = vmul.f32 %v1143_v22, %v2938_v63  ;;  %v2460_v50 = vrot.slane %v1244_v55, 10  ;;  %v1240_v35 = vmul.f32 %v1238_v12, %v3113_v51 }
 0x14d   :  { %v2443_v1 = vrot.slane %v1111_v28, 10  ;;  %v1919_v22 = vadd.f32 %v2540_v30, %v1905_v25  ;;  %v1937_v28 = vmul.f32 %v1936_v39, %v2936_v62  ;;  %v1140_v55 = vmul.f32 %v1139_v18, %v2936_v62 }
 0x14e   :  { %1160 = vrot.lane.b32.xlu0 %v1155_v34, %s5052_s4  ;;  %1792 = vrot.lane.b32.xlu1 %v1787_v61, %s5045_s7  ;;  %v1875_v61 = vmul.f32 %v1874_v19, %v2938_v63  ;;  %v1886_v34 = vadd.f32 %v2536_v0, %v1872_v49  ;;  %v1853_v19 = vadd.f32 %v2532_v20, %v1839_v41  ;;  %s5132_s7 = sld [smem:[#allocation31_spill]] }
 0x14f   :  { %v1776_v0 = vmul.f32 %v1775_v3, %v2938_v63  ;;  %v1941_v49 = vmul.f32 %v1940_v7, %v2938_v63  ;;  %v1952_v41 = vadd.f32 %v2544_v27, %v1938_v58  ;;  %v1871_v20 = vmul.f32 %v1870_v31, %v2936_v62 }
 0x150   :  { %v2535_v5 = vrot.slane %v1875_v61, 10  ;;  %v1177_v3 = vmul.f32 %v1176_v52, %v2938_v63  ;;  %v1842_v7 = vmul.f32 %v1841_v47, %v2938_v63  ;;  %v1107_v31 = vmul.f32 %v1106_v11, %v2936_v62 }
 0x151   :  { %v1772_v52 = vmul.f32 %v1771_v24, %v2936_v62  ;;  %v2523_v27 = vrot.slane %v1776_v0, 10  ;;  %v2543_v47 = vrot.slane %v1941_v49, 10  ;;  %v2447_v61 = vrot.slane %v1144_v17, 10 }
 0x152   :  { %1127 = vrot.lane.b32.xlu0 %v1122_v57, %s5052_s4  ;;  %1891 = vrot.lane.b32.xlu1 %v1886_v34, %s4900_s23  ;;  %v1287_v57 = vadd.f32 %v2464_v32, %v1273_v14  ;;  %v1885_v58 = vadd.f32 %v2535_v5, %v1871_v20  ;;  %v1254_v34 = vadd.f32 %v2460_v50, %v1240_v35  ;;  %v2531_v39 = vrot.slane %v1842_v7, 10 }
 0x153   :  { %v3510_v24 = vmul.f32 %v1275_v9, %v2938_v63  ;;  %v1121_v11 = vadd.f32 %v2443_v1, %v1107_v31  ;;  %v1173_v14 = vmul.f32 %v1172_v48, %v2936_v62  ;;  %v3518_v32 = vmul.f32 %v1209_v37, %v2938_v63 }
 0x154   :  { %v1786_v18 = vadd.f32 %v2523_v27, %v1772_v52  ;;  %v1838_v9 = vmul.f32 %v1837_v44, %v2936_v62  ;;  %v3528_v48 = vmul.f32 %v1342_v60, %v2938_v63  ;;  %v3531_v37 = vadd.f32 %v2543_v47, %v1937_v28 }
 0x155   :  { %v3533_v25 = vadd.f32 %v2447_v61, %v1140_v55  ;;  %v3538_v30 = vmul.f32 %v1271_v8, %v2936_v62  ;;  %v3543_v44 = vmul.f32 %v1308_v38, %v2938_v63  ;;  %v3551_v5 = vmul.f32 %v1205_v36, %v2936_v62 }
 0x156   :  { %1226 = vrot.lane.b32.xlu0 %v1221_v26, %s5057_s21  ;;  %1858 = vrot.lane.b32.xlu1 %v1853_v19, %s4900_s23  ;;  %v2451_v26 = vrot.slane %v1177_v3, 10  ;;  %v4905_v19 = vstv %s3473_s16  ;;  %v3556_v8 = vmul.f32 %v1242_v13, %v2938_v63  ;;  %v3558_v49 = vadd.f32 %v2531_v39, %v1838_v9  ;;  %s5081_s16 = sld [smem:[#allocation19_spill]] }
 0x157   :  { %v2455_v17 = vrot.slane %v3518_v32, 10  ;;  %v3569_v36 = vmul.f32 %v1409_v4, %v2938_v63  ;;  %v3576_v13 = vmul.f32 %v1907_v43, %v2938_v63  ;;  %v1339_v20 = vmul.f32 %v1338_v33, %v2936_v62 }
 0x158   :  { %v3545_v0 = vadd.f32 %v2451_v26, %v1173_v14  ;;  %v2471_v50 = vrot.slane %v3528_v48, 10  ;;  %v3585_v3 = vmul.f32 %v1442_v15, %v2938_v63  ;;  %v2467_v35 = vrot.slane %v3543_v44, 10 }
 0x159   :  { %v1372_v43 = vmul.f32 %v4915_v6, %v2936_v62  ;;  %v3597_v1 = vmul.f32 %v4916_v56, %v2938_v63  ;;  %v1406_v7 = vmul.f32 %v4912_v59, %v2936_v62  ;;  %v3610_v31 = vmul.f32 %v4910_v2, %v2938_v63 }
 0x15a   :  { %1193 = vrot.lane.b32.xlu0 %v1188_v29, %s5057_s21  ;;  %1957 = vrot.lane.b32.xlu1 %v1952_v41, %s4902_s24  ;;  %v2463_v29 = vrot.slane %v3510_v24, 10  ;;  %v3564_v41 = vmul.f32 %v1375_v45, %v2938_v63  ;;  %v3615_v52 = vmul.f32 %v4906_v40, %v2938_v63  ;;  %v2479_v28 = vrot.slane %v3569_v36, 10 }
 0x15b   :  { %v1439_v47 = vmul.f32 %v4909_v21, %v2936_v62  ;;  %v475_v61 = vmul.f32 %v474_v54, %v2938_v63  ;;  %v2483_v55 = vrot.slane %v3585_v3, 10  ;;  %v1473_v26 = vmul.f32 %v4908_v42, %v2936_v62 }
 0x15c   :  { %v2475_v27 = vrot.slane %v3564_v41, 10  ;;  %v1506_v14 = vmul.f32 %v4904_v53, %v2936_v62  ;;  %v1611_v39 = vmul.f32 %v4905_v19, %v2938_v63  ;;  %v2487_v9 = vrot.slane %v3597_v1, 10 }
 0x15d   :  { %v5075_v48 = vstv %s5069_s9  ;;  %v5077_v44 = vstv %s5070_s2  ;;  %v2495_v3 = vrot.slane %v3610_v31, 10  ;;  %v2499_v53 = vrot.slane %v3615_v52, 10 }
 0x15e   :  { %1292 = vrot.lane.b32.xlu0 %v1287_v57, %s5064_s18  ;;  %1924 = vrot.lane.b32.xlu1 %v1919_v22, %s4902_s24  ;;  %v1305_v57 = vmul.f32 %v1304_v16, %v2936_v62  ;;  %v3605_v22 = vmul.f32 %v4911_v46, %v2938_v63  ;;  %v440_v41 = vmul.f32 %v5077_v44, %v2938_v63  ;;  %s5078_s24 = sld [smem:[#allocation51_spill]]  ;;  %v5080_v19 = vstv %s5071_s6 }
 0x15f   :  { %v542_v40 = vmul.f32 %v5080_v19, %v2938_v63  ;;  %v5084_v44 = vstv %s5073_s13  ;;  %v5088_v19 = vstv %s5074_s0  ;;  %v5095_v59 = vstv %s5083_s11 }
 0x160   :  { %v2491_v36 = vrot.slane %v3605_v22, 10  ;;  %v2355_v42 = vrot.slane %v440_v41, 10  ;;  %v508_v21 = vmul.f32 %v5084_v44, %v2938_v63  ;;  %v2503_v22 = vrot.slane %v1611_v39, 10 }
 0x161   :  { %v538_v31 = vmul.f32 %v5088_v19, %v2936_v62  ;;  %v2367_v52 = vrot.slane %v542_v40, 10  ;;  %v5094_v39 = vstv %s5081_s16  ;;  %v3706_v6 = vadd.f32 %v2467_v35, %v1305_v57 }
 0x162   :  { %1889 = vrot.lane.b32.xlu0 %v1885_v58, %s4900_s23  ;;  %1259 = vrot.lane.b32.xlu1 %v1254_v34, %s5064_s18  ;;  %v471_v58 = vmul.f32 %v5075_v48, %v2936_v62  ;;  %s5076_s23 = sld [smem:[#allocation23_spill]]  ;;  %v2359_v34 = vrot.slane %v475_v61, 10  ;;  %v5082_v48 = vstv %s5072_s12  ;;  %v2363_v2 = vrot.slane %v508_v21, 10 }
 0x163   :  { %v436_v61 = vmul.f32 %v5082_v48, %v2936_v62  ;;  %v605_v19 = vmul.f32 %v5094_v39, %v2936_v62  ;;  %v3725_v57 = vadd.f32 %v2487_v9, %v1473_v26  ;;  %v3731_v35 = vadd.f32 %v2483_v55, %v1439_v47 }
 0x164   :  { %v3650_v1 = vadd.f32 %v2359_v34, %v471_v58  ;;  %v5091_v41 = vstv %s5078_s24  ;;  %v2459_v47 = vrot.slane %v3556_v8, 10  ;;  %v2539_v55 = vrot.slane %v3576_v13, 10 }
 0x165   :  { %v3666_v48 = vadd.f32 %v2355_v42, %v436_v61  ;;  %v504_v44 = vmul.f32 %v5091_v41, %v2936_v62  ;;  %v5098_v61 = vstv %s5085_s29  ;;  %5109 = vst [vmem:[#allocation69_spill] sm:$0xff] %v3725_v57  ;;  %5111 = vst [vmem:[#allocation70_spill] sm:$0xff] %v3731_v35  ;;  %v476_v24 = vmul.f32 %v474_v54, %v3080_v23 }
 0x166   :  { %1125 = vrot.lane.b32.xlu0 %v1121_v11, %s5052_s4  ;;  %1790 = vrot.lane.b32.xlu1 %v1786_v18, %s5086_s15  ;;  %v5092_v11 = vstv %s5079_s17  ;;  %s5093_s15 = sld [smem:[#allocation59_spill]]  ;;  %v3674_v18 = vadd.f32 %v2367_v52, %v538_v31  ;;  %v571_v21 = vmul.f32 %v5098_v61, %v2936_v62  ;;  %v1904_v32 = vmul.f32 %v1903_v10, %v2936_v62 }
 0x167   :  { %v575_v46 = vmul.f32 %v5092_v11, %v2938_v63  ;;  %v3682_v42 = vadd.f32 %v2363_v2, %v504_v44  ;;  %v5099_v11 = vstv %s5087_s10  ;;  %v3699_v44 = vadd.f32 %v2471_v50, %v1339_v20 }
 0x168   :  { %v5089_v58 = vstv %s5076_s23  ;;  %v642_v31 = vmul.f32 %v5099_v11, %v2938_v63  ;;  %v5107_v20 = vstv %s5100_s26  ;;  %v2360_v54 = vrot.slane %v476_v24, 10 }
 0x169   :  { %v609_v34 = vmul.f32 %v5089_v58, %v2938_v63  ;;  %v676_v58 = vmul.f32 %v5095_v59, %v2938_v63  ;;  %v2371_v41 = vrot.slane %v575_v46, 10  ;;  %v5102_v59 = vstv %s5090_s30 }
 0x16a   :  { %1955 = vrot.lane.b32.xlu0 %v3531_v37, %s5101_s27  ;;  %1158 = vrot.lane.b32.xlu1 %v3533_v25, %s5052_s4  ;;  %v672_v2 = vmul.f32 %v5102_v59, %v2936_v62  ;;  %v2379_v11 = vrot.slane %v642_v31, 10  ;;  %v5104_v37 = vstv %s5096_s28  ;;  %v1607_v50 = vmul.f32 %v5107_v20, %v2936_v62 }
 0x16b   :  { %v2375_v40 = vrot.slane %v609_v34, 10  ;;  %v2383_v34 = vrot.slane %v676_v58, 10  ;;  %v3701_v39 = vadd.f32 %v2371_v41, %v571_v21  ;;  %v1540_v25 = vmul.f32 %v5104_v37, %v2936_v62 }
 0x16c   :  { %v5103_v46 = vstv %s5093_s15  ;;  %v3716_v58 = vadd.f32 %v2479_v28, %v1406_v7  ;;  %v3723_v41 = vadd.f32 %v2475_v27, %v1372_v43  ;;  %v3735_v28 = vadd.f32 %v2491_v36, %v1506_v14 }
 0x16d   :  { %v3694_v52 = vadd.f32 %v2375_v40, %v605_v19  ;;  %v638_v61 = vmul.f32 %v5103_v46, %v2936_v62  ;;  %v5105_v19 = vstv %s5097_s20  ;;  %v3714_v56 = vadd.f32 %v2383_v34, %v672_v2  ;;  %s5110_s20 = smov 59  }
 0x16e   :  { %v1573_v40 = vmul.f32 %v5105_v19, %v2936_v62  ;;  %5106 = vst [vmem:[#allocation67_spill] sm:$0xff] %v3716_v58  ;;  %5108 = vst [vmem:[#allocation68_spill] sm:$0xff] %v3723_v41  ;;  %1191 = vrot.lane.b32.xlu0 %v3545_v0, %s5057_s21  ;;  %1856 = vrot.lane.b32.xlu1 %v3558_v49, %s5110_s20  ;;  %v3733_v7 = vadd.f32 %v2495_v3, %v1540_v25  ;;  %v5114_v27 = vstv %s5073_s13  ;;  %s2767_s13 = smov 106  }
 0x16f   :  { %v3721_v21 = vadd.f32 %v2379_v11, %v638_v61  ;;  %5113 = vst [vmem:[#allocation72_spill] sm:$0xff] %v3735_v28  ;;  %v1286_v43 = vadd.f32 %v2463_v29, %v3538_v30  ;;  %v509_v26 = vmul.f32 %v5114_v27, %v3080_v23  ;;  %v3743_v0 = vadd.f32 %v2503_v22, %v1607_v50 }
 0x170   :  { %5112 = vst [vmem:[#allocation71_spill] sm:$0xff] %v3733_v7  ;;  %v3745_v9 = vadd.f32 %v2499_v53, %v1573_v40  ;;  %v1220_v49 = vadd.f32 %v2455_v17, %v3551_v5  ;;  %v1239_v53 = vmul.f32 %v1238_v12, %v2936_v62  ;;  %v5117_v29 = vstv %s5079_s17  ;;  %s3939_s17 = sld [smem:[#allocation9 + $0x5]] }
 0x171   :  { %5115 = vst [vmem:[#allocation73_spill] sm:$0xff] %v3743_v0  ;;  %v2364_v30 = vrot.slane %v509_v26, 10  ;;  %v576_v5 = vmul.f32 %v5117_v29, %v3080_v23  ;;  %v1918_v17 = vadd.f32 %v2539_v55, %v1904_v32  ;;  %v5118_v13 = vstv %s5070_s2  ;;  %s3947_s2 = sld [smem:[#allocation9 + $0x55]] }
 0x172   :  { %5116 = vst [vmem:[#allocation74_spill] sm:$0xff] %v3745_v9  ;;  %1290 = vrot.lane.b32.xlu0 %v1286_v43, %s5064_s18  ;;  %1224 = vrot.lane.b32.xlu1 %v1220_v49, %s5057_s21  ;;  %v1253_v8 = vadd.f32 %v2459_v47, %v1239_v53  ;;  %v441_v14 = vmul.f32 %v5118_v13, %v3080_v23  ;;  %v5119_v12 = vstv %s5078_s24  ;;  %v5120_v10 = vstv %s5069_s9  ;;  %s5141_s24 = sld [smem:[#allocation32_spill]]  ;;  %s3941_s9 = sld [smem:[#allocation9 + $0x3c]] }
 0x173   :  { %v505_v36 = vmul.f32 %v5119_v12, %v3113_v51  ;;  %v472_v3 = vmul.f32 %v5120_v10, %v3113_v51  ;;  %v2372_v31 = vrot.slane %v576_v5, 10  ;;  %v5121_v34 = vstv %s5087_s10  ;;  %s5148_s10 = sld [smem:[#allocation62_spill]] }
 0x174   :  { %v2356_v2 = vrot.slane %v441_v14, 10  ;;  %v643_v46 = vmul.f32 %v5121_v34, %v3080_v23  ;;  %v5122_v61 = vstv %s5071_s6  ;;  %v5124_v37 = vstv %s5085_s29  ;;  %s3937_s29 = sld [smem:[#allocation9 + $0x37]]  ;;  %s3949_s6 = sld [smem:[#allocation9 + $0xa]] }
 0x175   :  { %v519_v22 = vadd.f32 %v2364_v30, %v505_v36  ;;  %v486_v59 = vadd.f32 %v2360_v54, %v472_v3  ;;  %v543_v11 = vmul.f32 %v5122_v61, %v3080_v23  ;;  %v572_v25 = vmul.f32 %v5124_v37, %v3113_v51 }
 0x176   :  { %1257 = vrot.lane.b32.xlu0 %v1253_v8, %s5064_s18  ;;  %1922 = vrot.lane.b32.xlu1 %v1918_v17, %s5101_s27  ;;  %v5125_v19 = vstv %s5072_s12  ;;  %v1344_v20 = vmul.f32 %v1342_v60, %v3080_v23  ;;  %v5126_v50 = vstv %s5076_s23  ;;  %v2380_v49 = vrot.slane %v643_v46, 10  ;;  %s5140_s23 = sld [smem:[#allocation25_spill]]  ;;  %s3952_s12 = sld [smem:[#allocation9 + $0x23]] }
 0x177   :  { %v437_v40 = vmul.f32 %v5125_v19, %v3113_v51  ;;  %v610_v43 = vmul.f32 %v5126_v50, %v3080_v23  ;;  %v586_v27 = vadd.f32 %v2372_v31, %v572_v25  ;;  %v2368_v47 = vrot.slane %v543_v11, 10 }
 0x178   :  { %v5127_v55 = vstv %s5093_s15  ;;  %v5128_v53 = vstv %s5074_s0  ;;  %v2472_v60 = vrot.slane %v1344_v20, 10  ;;  %v1310_v8 = vmul.f32 %v1308_v38, %v3080_v23  ;;  %s5152_s15 = sld [smem:[#allocation30_spill]]  ;;  %s2768_s0 = smov 84  }
 0x179   :  { %v451_v26 = vadd.f32 %v2356_v2, %v437_v40  ;;  %v639_v24 = vmul.f32 %v5127_v55, %v3113_v51  ;;  %v539_v32 = vmul.f32 %v5128_v53, %v3113_v51  ;;  %v2376_v30 = vrot.slane %v610_v43, 10 }
 0x17a   :  { %524 = vrot.lane.b32.xlu1 %v519_v22, %s5052_s4  ;;  %491 = vrot.lane.b32.xlu0 %v486_v59, %s5123_s22  ;;  %v5129_v17 = vstv %s5083_s11  ;;  %v1340_v13 = vmul.f32 %v1338_v33, %v3113_v51  ;;  %v5130_v14 = vstv %s5081_s16  ;;  %v2468_v22 = vrot.slane %v1310_v8, 10  ;;  %s5133_s16 = sld [smem:[#allocation28_spill]]  ;;  %s5151_s11 = smov 61  }
 0x17b   :  { %v653_v29 = vadd.f32 %v2380_v49, %v639_v24  ;;  %v553_v5 = vadd.f32 %v2368_v47, %v539_v32  ;;  %v677_v54 = vmul.f32 %v5129_v17, %v3080_v23  ;;  %v606_v12 = vmul.f32 %v5130_v14, %v3113_v51 }
 0x17c   :  { %v1354_v36 = vadd.f32 %v2472_v60, %v1340_v13  ;;  %v1377_v33 = vmul.f32 %v1375_v45, %v3080_v23  ;;  %v1411_v59 = vmul.f32 %v1409_v4, %v3080_v23  ;;  %v1306_v2 = vmul.f32 %v1304_v16, %v3113_v51 }
 0x17d   :  { %v620_v10 = vadd.f32 %v2376_v30, %v606_v12  ;;  %v2384_v31 = vrot.slane %v677_v54, 10  ;;  %v5136_v34 = vstv %s5090_s30  ;;  %v1444_v61 = vmul.f32 %v1442_v15, %v3080_v23  ;;  %s5145_s30 = sld [smem:[#allocation34_spill]] }
 0x17e   :  { %591 = vrot.lane.b32.xlu1 %v586_v27, %s5057_s21  ;;  %456 = vrot.lane.b32.xlu0 %v451_v26, %s5123_s22  ;;  %v673_v46 = vmul.f32 %v5136_v34, %v3113_v51  ;;  %v5137_v45 = vstv %s5132_s7  ;;  %v1320_v25 = vadd.f32 %v2468_v22, %v1306_v2  ;;  %v2476_v16 = vrot.slane %v1377_v33, 10  ;;  %s2769_s7 = smov 46  }
 0x17f   :  { %v1478_v11 = vmul.f32 %v5137_v45, %v3080_v23  ;;  %v2480_v40 = vrot.slane %v1411_v59, 10  ;;  %v5143_v50 = vstv %s5135_s8  ;;  %v2484_v27 = vrot.slane %v1444_v61, 10  ;;  %s2771_s8 = smov 114  }
 0x180   :  { %v687_v19 = vadd.f32 %v2384_v31, %v673_v46  ;;  %v5142_v15 = vstv %s5133_s16  ;;  %v1407_v43 = vmul.f32 %v5143_v50, %v3113_v51  ;;  %v5146_v53 = vstv %s5138_s19  ;;  %s2770_s16 = smov 110   ;;  %s2772_s19 = smov 78  }
 0x181   :  { %v1373_v20 = vmul.f32 %v5142_v15, %v3113_v51  ;;  %v2488_v26 = vrot.slane %v1478_v11, 10  ;;  %v1511_v32 = vmul.f32 %v5146_v53, %v3080_v23  ;;  %v5147_v60 = vstv %s5139_s5  ;;  %s2773_s5 = smov 82  }
 0x182   :  { %658 = vrot.lane.b32.xlu1 %v653_v29, %s5064_s18  ;;  %558 = vrot.lane.b32.xlu0 %v553_v5, %s5052_s4  ;;  %v1421_v24 = vadd.f32 %v2480_v40, %v1407_v43  ;;  %v1545_v30 = vmul.f32 %v5147_v60, %v3080_v23  ;;  %v5149_v29 = vstv %s5140_s23  ;;  %v5150_v8 = vstv %s5141_s24  ;;  %s2774_s23 = smov 70   ;;  %s2775_s24 = smov 74  }
 0x183   :  { %v1387_v55 = vadd.f32 %v2476_v16, %v1373_v20  ;;  %v1440_v5 = vmul.f32 %v5149_v29, %v3113_v51  ;;  %v1474_v17 = vmul.f32 %v5150_v8, %v3113_v51  ;;  %v5153_v22 = vstv %s5144_s25  ;;  %s2776_s25 = smov 22  }
 0x184   :  { %v3819_v38 = vpop.permute.xlu1 %759  ;;  %v3821_v3 = vpop.permute.xlu0 %792  ;;  %v1578_v31 = vmul.f32 %v5153_v22, %v3080_v23  ;;  %v5154_v33 = vstv %s5145_s30  ;;  %v5156_v2 = vstv %s5148_s10  ;;  %v5157_v46 = vstv %s5096_s28  ;;  %s3935_s28 = sld [smem:[#allocation9 + $0x1e]]  ;;  %s2777_s30 = smov 54  }
 0x185   :  { %v1454_v54 = vadd.f32 %v2484_v27, %v1440_v5  ;;  %v1488_v13 = vadd.f32 %v2488_v26, %v1474_v17  ;;  %v1612_v59 = vmul.f32 %v5154_v33, %v3080_v23  ;;  %v1507_v34 = vmul.f32 %v5156_v2, %v3113_v51  ;;  %s2778_s10 = smov 50  }
 0x186   :  { %1359 = vrot.lane.b32.xlu1 %v1354_v36, %s5134_s1  ;;  %625 = vrot.lane.b32.xlu0 %v620_v10, %s5057_s21  ;;  %v2492_v36 = vrot.slane %v1511_v32, 10  ;;  %v2496_v10 = vrot.slane %v1545_v30, 10  ;;  %v1541_v61 = vmul.f32 %v5157_v46, %v3113_v51  ;;  %v2500_v16 = vrot.slane %v1578_v31, 10 }
 0x187   :  { %v2504_v40 = vrot.slane %v1612_v59, 10  ;;  %v5158_v15 = vstv %s5152_s15  ;;  %v5159_v50 = vstv %s5100_s26  ;;  %s3929_s26 = sld [smem:[#allocation9 + $0x50]]  ;;  %v5172_v7 = vstv %s3947_s2  ;;  %s2780_s15 = smov 66  }
 0x188   :  { %v3843_v37 = vpop.permute.xlu1 %825  ;;  %v3845_v4 = vpop.permute.xlu0 %858  ;;  %v1574_v20 = vmul.f32 %v5158_v15, %v3113_v51  ;;  %v1608_v43 = vmul.f32 %v5159_v50, %v3113_v51  ;;  %v1028_v35 = vmul.f32 %v5172_v7, %v3080_v23 }
 0x18a   :  { %1325 = vrot.lane.b32.xlu1 %v1320_v25, %s5134_s1  ;;  %692 = vrot.lane.b32.xlu0 %v687_v19, %s5064_s18  ;;  %v1521_v25 = vadd.f32 %v2492_v36, %v1507_v34  ;;  %v1555_v19 = vadd.f32 %v2496_v10, %v1541_v61  ;;  %v4918_v61 = vstv %s3935_s28 }
 0x18c   :  { %v3855_v49 = vpop.permute.xlu1 %891  ;;  %v3857_v47 = vpop.permute.xlu0 %924 }
 0x18d   :  { %v4917_v33 = vstv %s3929_s26 }
 0x18e   :  { %1392 = vrot.lane.b32.xlu1 %v1387_v55, %s5151_s11  ;;  %1426 = vrot.lane.b32.xlu0 %v1421_v24, %s5151_s11  ;;  %v1588_v55 = vadd.f32 %v2500_v16, %v1574_v20  ;;  %v1622_v24 = vadd.f32 %v2504_v40, %v1608_v43  ;;  %v728_v59 = vmul.f32 %v4917_v33, %v3080_v23  ;;  %v4919_v16 = vstv %s3937_s29 }
 0x18f   :  { %v724_v50 = vmul.f32 %v4919_v16, %v3113_v51  ;;  %v5168_v43 = vstv %s3939_s17 }
 0x190   :  { %v3873_v14 = vpop.permute.xlu1 %957  ;;  %v3875_v12 = vpop.permute.xlu0 %990  ;;  %v706_v9 = vmul.f32 %v5168_v43, %v3113_v51 }
 0x192   :  { %1459 = vrot.lane.b32.xlu1 %v1454_v54, %s5155_s14  ;;  %1493 = vrot.lane.b32.xlu0 %v1488_v13, %s5155_s14 }
 0x194   :  { %v3891_v45 = vpop.permute.xlu1 %1658  ;;  %v3893_v11 = vpop.permute.xlu0 %1691 }
 0x196   :  { %1526 = vrot.lane.b32.xlu1 %v1521_v25, %s5110_s20  ;;  %1560 = vrot.lane.b32.xlu0 %v1555_v19, %s5110_s20  ;;  %v2392_v25 = vrot.slane %v728_v59, 10  ;;  %v710_v19 = vmul.f32 %v4918_v61, %v3080_v23 }
 0x198   :  { %v3903_v27 = vpop.permute.xlu1 %1757  ;;  %v3905_v26 = vpop.permute.xlu0 %1823  ;;  %v738_v40 = vadd.f32 %v2392_v25, %v724_v50  ;;  %v2388_v16 = vrot.slane %v710_v19, 10  ;;  %v5170_v25 = vstv %s3941_s9 }
 0x199   :  { %5160 = vst [vmem:[#allocation75_spill] sm:$0xff] %v3905_v26  ;;  %v1024_v19 = vmul.f32 %v5170_v25, %v3113_v51 }
 0x19a   :  { %1593 = vrot.lane.b32.xlu1 %v1588_v55, %s5101_s27  ;;  %1627 = vrot.lane.b32.xlu0 %v1622_v24, %s5101_s27 }
 0x19c   :  { %v3909_v53 = vpop.permute.xlu1 %1724  ;;  %v3911_v32 = vpop.permute.xlu0 %1059 }
 0x19d   :  { %5161 = vst [vmem:[#allocation76_spill] sm:$0xff] %v3909_v53  ;;  %5162 = vst [vmem:[#allocation77_spill] sm:$0xff] %v3911_v32 }
 0x1a0   :  { %v3913_v60 = vpop.permute.xlu1 %1092  ;;  %v3915_v30 = vpop.permute.xlu0 %794 }
 0x1a1   :  { %5163 = vst [vmem:[#allocation78_spill] sm:$0xff] %v3913_v60  ;;  %v4920_v46 = vrot.slane %v3915_v30, 4 }
 0x1a3   :  { %v800_v59 = vsel %vm462_vm13, %v3915_v30, %v4920_v46  ;;  %v720_v46 = vadd.f32 %v2388_v16, %v706_v9  ;;  %v5176_v16 = vstv %s3952_s12 }
 0x1a4   :  { %v3917_v29 = vpop.permute.xlu1 %761  ;;  %v3919_v5 = vpop.permute.xlu0 %860  ;;  %v804_v61 = vadd.f32 %v800_v59, %v738_v40  ;;  %v1010_v41 = vmul.f32 %v5176_v16, %v3080_v23 }
 0x1a5   :  { %v5169_v24 = vrot.slane %v3919_v5, 4  ;;  %v5171_v15 = vrot.slane %v3917_v29, 4 }
 0x1a7   :  { %v866_v0 = vsel %vm529_vm14, %v3919_v5, %v5169_v24  ;;  %v767_v24 = vsel %vm462_vm13, %v3917_v29, %v5171_v15 }
 0x1a8   :  { %v3921_v8 = vpop.permute.xlu1 %827  ;;  %v3923_v17 = vpop.permute.xlu0 %926  ;;  %v870_v28 = vadd.f32 %v866_v0, %v804_v61  ;;  %v771_v9 = vadd.f32 %v767_v24, %v720_v46  ;;  %v5175_v61 = vstv %s3949_s6 }
 0x1a9   :  { %v4922_v20 = vrot.slane %v3923_v17, 4  ;;  %v5173_v32 = vrot.slane %v3921_v8, 4  ;;  %v1006_v7 = vmul.f32 %v5175_v61, %v3113_v51 }
 0x1ab   :  { %v932_v40 = vsel %vm596_vm15, %v3923_v17, %v4922_v20  ;;  %v833_v15 = vsel %vm529_vm14, %v3921_v8, %v5173_v32 }
 0x1ac   :  { %v3925_v54 = vpop.permute.xlu1 %893  ;;  %v3927_v13 = vpop.permute.xlu0 %992  ;;  %v936_v0 = vadd.f32 %v932_v40, %v870_v28  ;;  %v837_v40 = vadd.f32 %v833_v15, %v771_v9 }
 0x1ad   :  { %v5174_v57 = vrot.slane %v3927_v13, 4  ;;  %v5177_v53 = vrot.slane %v3925_v54, 4 }
 0x1af   :  { %v998_v20 = vsel %vm663_vm0, %v3927_v13, %v5174_v57  ;;  %v899_v57 = vsel %vm596_vm15, %v3925_v54, %v5177_v53 }
 0x1b0   :  { %v3931_v36 = vpop.permute.xlu1 %959  ;;  %v3933_v10 = vpop.permute.xlu0 %1693  ;;  %v1002_v61 = vadd.f32 %v998_v20, %v936_v0  ;;  %v903_v24 = vadd.f32 %v899_v57, %v837_v40  ;;  %v2432_v20 = vrot.slane %v1028_v35, 10 }
 0x1b1   :  { %v5178_v59 = vrot.slane %v3933_v10, 4  ;;  %v5179_v25 = vrot.slane %v3931_v36, 4 }
 0x1b3   :  { %v1699_v28 = vsel %vm1330_vm1, %v3933_v10, %v5178_v59  ;;  %v965_v51 = vsel %vm663_vm0, %v3931_v36, %v5179_v25 }
 0x1b4   :  { %v3943_v22 = vpop.permute.xlu1 %1660  ;;  %v3945_v31 = vpop.permute.xlu0 %1759  ;;  %v1703_v15 = vadd.f32 %v1699_v28, %v1002_v61  ;;  %v969_v35 = vadd.f32 %v965_v51, %v903_v24 }
 0x1b5   :  { %v5180_v53 = vrot.slane %v3945_v31, 4  ;;  %v5183_v16 = vrot.slane %v3943_v22, 4 }
 0x1b7   :  { %v1765_v23 = vsel %vm1397_vm3, %v3945_v31, %v5180_v53  ;;  %v1666_v25 = vsel %vm1330_vm1, %v3943_v22, %v5183_v16 }
 0x1b8   :  { %v3957_v2 = vpop.permute.xlu1 %1726  ;;  %v3959_v34 = vpop.permute.xlu0 %1094  ;;  %v1769_v28 = vadd.f32 %v1765_v23, %v1703_v15  ;;  %v1670_v24 = vadd.f32 %v1666_v25, %v969_v35  ;;  %v1038_v15 = vadd.f32 %v2432_v20, %v1024_v19 }
 0x1b9   :  { %5164 = vst [vmem:[#allocation79_spill] sm:$0xff] %v3957_v2  ;;  %5165 = vst [vmem:[#allocation80_spill] sm:$0xff] %v3959_v34  ;;  %v5185_v40 = vrot.slane %v3957_v2, 4  ;;  %v5186_v16 = vrot.slane %v3959_v34, 4 }
 0x1bb   :  { %v1732_v61 = vsel %vm1397_vm3, %v3957_v2, %v5185_v40  ;;  %v1100_v58 = vsel %vm462_vm13, %v3959_v34, %v5186_v16  ;;  %v2428_v40 = vrot.slane %v1010_v41, 10 }
 0x1bc   :  { %v3974_v55 = vpop.permute.xlu1 %1825  ;;  %v3977_v33 = vpop.permute.xlu0 %1061  ;;  %v1736_v20 = vadd.f32 %v1732_v61, %v1670_v24  ;;  %v1104_v41 = vadd.f32 %v1100_v58, %v1038_v15 }
 0x1bd   :  { %5166 = vst [vmem:[#allocation81_spill] sm:$0xff] %v3974_v55  ;;  %5167 = vst [vmem:[#allocation82_spill] sm:$0xff] %v3977_v33  ;;  %v5184_v26 = vrot.slane %v3974_v55, 4  ;;  %v5190_v25 = vrot.slane %v3977_v33, 4  ;;  %v1020_v24 = vadd.f32 %v2428_v40, %v1006_v7 }
 0x1bf   :  { %v1831_v53 = vsel %vm1464_vm4, %v3974_v55, %v5184_v26 }
 0x1c0   :  { %v3998_v50 = vpop.permute.xlu1 %1792  ;;  %v4000_v43 = vpop.permute.xlu0 %1160  ;;  %v1835_v57 = vadd.f32 %v1831_v53, %v1769_v28  ;;  %v1067_v53 = vsel %vm462_vm13, %v3977_v33, %v5190_v25 }
 0x1c1   :  { %v5188_v55 = vrot.slane %v3998_v50, 4  ;;  %v5189_v34 = vrot.slane %v4000_v43, 4 }
 0x1c3   :  { %v1798_v16 = vsel %vm1464_vm4, %v3998_v50, %v5188_v55 }
 0x1c4   :  { %v4031_v60 = vpop.permute.xlu1 %1891  ;;  %v4033_v32 = vpop.permute.xlu0 %1127  ;;  %v1802_v15 = vadd.f32 %v1798_v16, %v1736_v20 }
 0x1c5   :  { %v5187_v26 = vrot.slane %v4031_v60, 4 }
 0x1c7   :  { %v1897_v46 = vsel %vm1531_vm5, %v4031_v60, %v5187_v26  ;;  %v1166_v26 = vsel %vm529_vm14, %v4000_v43, %v5189_v34 }
 0x1c8   :  { %v4056_v9 = vpop.permute.xlu1 %1858  ;;  %v4058_v0 = vpop.permute.xlu0 %1226  ;;  %v1901_v35 = vadd.f32 %v1897_v46, %v1835_v57  ;;  %v1170_v46 = vadd.f32 %v1166_v26, %v1104_v41 }
 0x1c9   :  { %5181 = vst [vmem:[#allocation83_spill] sm:$0xff] %v4056_v9  ;;  %5182 = vst [vmem:[#allocation84_spill] sm:$0xff] %v4058_v0  ;;  %v4933_v51 = vrot.slane %v4056_v9, 4  ;;  %v5191_v28 = vrot.slane %v4058_v0, 4 }
 0x1cb   :  { %v1864_v55 = vsel %vm1531_vm5, %v4056_v9, %v4933_v51  ;;  %v1232_v34 = vsel %vm596_vm15, %v4058_v0, %v5191_v28  ;;  %v5192_v51 = vrot.slane %v4033_v32, 4 }
 0x1cc   :  { %v4085_v2 = vpop.permute.xlu1 %1957  ;;  %v4087_v59 = vpop.permute.xlu0 %1193  ;;  %v1868_v0 = vadd.f32 %v1864_v55, %v1802_v15  ;;  %v1236_v61 = vadd.f32 %v1232_v34, %v1170_v46  ;;  %v5195_v15 = vstv %s3935_s28  ;;  %s2783_s28 = smov 30  }
 0x1cd   :  { %v4936_v19 = vrot.slane %v4085_v2, 4  ;;  %v1133_v28 = vsel %vm529_vm14, %v4033_v32, %v5192_v51  ;;  %v5193_v7 = vrot.slane %v4087_v59, 4  ;;  %v709_v46 = vmul.f32 %v5195_v15, %v2938_v63 }
 0x1cf   :  { %v1963_v58 = vsel %vm1598_vm6, %v4085_v2, %v4936_v19  ;;  %v1071_v19 = vadd.f32 %v1067_v53, %v1020_v24  ;;  %v1199_v40 = vsel %vm596_vm15, %v4087_v59, %v5193_v7  ;;  %v862_v7 = vrot.slane %v3845_v4, 4 }
 0x1d0   :  { %v1967_v57 = vadd.f32 %v1963_v58, %v1901_v35  ;;  %v4116_v25 = vpop.permute.xlu1 %1924  ;;  %v4118_v23 = vpop.permute.xlu0 %1292 }
 0x1d1   :  { %v1927_v9 = vrot.slane %v4116_v25, 4  ;;  %v1295_v33 = vrot.slane %v4118_v23, 4  ;;  %v1137_v26 = vadd.f32 %v1133_v28, %v1071_v19 }
 0x1d2   :  { %2022 = vrot.lane.b32.xlu0 %v1967_v57, %s2767_s13 }
 0x1d3   :  { %v1930_v51 = vsel %vm1598_vm6, %v4116_v25, %v1927_v9  ;;  %v1298_v16 = vsel %vm663_vm0, %v4118_v23, %v1295_v33  ;;  %v1203_v55 = vadd.f32 %v1199_v40, %v1137_v26  ;;  %v928_v26 = vrot.slane %v3857_v47, 4 }
 0x1d4   :  { %v1934_v20 = vadd.f32 %v1930_v51, %v1868_v0  ;;  %v1302_v41 = vadd.f32 %v1298_v16, %v1236_v61  ;;  %v4139_v53 = vpop.permute.xlu1 %1259  ;;  %v4148_v19 = vpop.permute.xlu0 %1889  ;;  %v5194_v61 = vstv %s3929_s26  ;;  %v5196_v51 = vrot.slane %v3915_v30, 4  ;;  %s2782_s26 = smov 34  }
 0x1d5   :  { %v1262_v35 = vrot.slane %v4139_v53, 4  ;;  %v727_v24 = vmul.f32 %v5194_v61, %v2938_v63  ;;  %v2387_v16 = vrot.slane %v709_v46, 10  ;;  %v5200_v61 = vrot.slane %v3917_v29, 4 }
 0x1d6   :  { %1972 = vrot.lane.b32.xlu1 %v1934_v20, %s2767_s13  ;;  %2037 = vrot.lane.b32.xlu0 %v1302_v41, %s2768_s0  ;;  %v5197_v20 = vstv %s3937_s29  ;;  %v994_v46 = vrot.slane %v3875_v12, 4  ;;  %v895_v29 = vrot.slane %v3855_v49, 4  ;;  %s2784_s29 = smov 26  }
 0x1d7   :  { %v1265_v34 = vsel %vm663_vm0, %v4139_v53, %v1262_v35  ;;  %v2391_v40 = vrot.slane %v727_v24, 10  ;;  %v723_v41 = vmul.f32 %v5197_v20, %v2936_v62  ;;  %v1695_v20 = vrot.slane %v3893_v11, 4 }
 0x1d8   :  { %v1269_v58 = vadd.f32 %v1265_v34, %v1203_v55  ;;  %v4153_v0 = vpop.permute.xlu1 %1790  ;;  %v4165_v57 = vpop.permute.xlu0 %1125  ;;  %v5198_v55 = vrot.slane %v3919_v5, 4  ;;  %v829_v34 = vrot.slane %v3843_v37, 4  ;;  %v5201_v5 = vrot.slane %v3923_v17, 4 }
 0x1da   :  { %1988 = vrot.lane.b32.xlu1 %v1269_v58, %s2768_s0  ;;  %489 = vrot.lane.b32.xlu0 %v3650_v1, %s5123_s22  ;;  %v796_v1 = vrot.slane %v3821_v3, 4  ;;  %v864_v30 = vsel %vm4953_vm7, %v862_v7, %v5198_v55  ;;  %v5199_v58 = vstv %s3939_s17  ;;  %v930_v7 = vsel %vm4953_vm7, %v928_v26, %v5201_v5  ;;  %s2785_s17 = smov 32  }
 0x1db   :  { %v865_v17 = vsel %vm529_vm14, %v3845_v4, %v864_v30  ;;  %v5205_v4 = vrot.slane %v3925_v54, 4  ;;  %v5206_v30 = vstv %s3949_s6 }
 0x1dc   :  { %v4168_v28 = vpop.permute.xlu1 %1158  ;;  %v4195_v15 = vpop.permute.xlu0 %1955 }
 0x1de   :  { %454 = vrot.lane.b32.xlu1 %v3666_v48, %s5123_s22  ;;  %556 = vrot.lane.b32.xlu0 %v3674_v18, %s5052_s4  ;;  %v798_v48 = vsel %vm4953_vm7, %v796_v1, %v5196_v51  ;;  %v763_v18 = vrot.slane %v3819_v38, 4  ;;  %v737_v1 = vadd.f32 %v2391_v40, %v723_v41  ;;  %v5202_v51 = vstv %s3952_s12  ;;  %s4516_s22 = sld [smem:[#allocation11 + $0x1]] }
 0x1df   :  { %v5203_v40 = vrot.slane %v3921_v8, 4  ;;  %v897_v8 = vsel %vm4953_vm7, %v895_v29, %v5205_v4  ;;  %v5210_v29 = vrot.slane %v3931_v36, 4  ;;  %v5213_v36 = vld [vmem:[#allocation67_spill] sm:$0xff] }
 0x1e0   :  { %v765_v24 = vsel %vm4953_vm7, %v763_v18, %v5200_v61  ;;  %v4216_v26 = vpop.permute.xlu1 %1856  ;;  %v961_v61 = vrot.slane %v3873_v14, 4 }
 0x1e1   :  { %v831_v18 = vsel %vm4953_vm7, %v829_v34, %v5203_v40  ;;  %v4232_v34 = vmul.f32 %v5206_v30, %v2936_v62 }
 0x1e2   :  { %522 = vrot.lane.b32.xlu1 %v3682_v42, %s5052_s4  ;;  %623 = vrot.lane.b32.xlu0 %v3694_v52, %s5057_s21  ;;  %v799_v42 = vsel %vm462_vm13, %v3821_v3, %v798_v48  ;;  %v705_v52 = vmul.f32 %v5199_v58, %v2936_v62  ;;  %v4204_v3 = vmul.f32 %v5202_v51, %v2938_v63  ;;  %s4399_s4 = sld [smem:[#allocation9 + $0x19]] }
 0x1e3   :  { %v803_v41 = vadd.f32 %v799_v42, %v737_v1  ;;  %v5207_v42 = vstv %s3947_s2  ;;  %v4251_v1 = vpop.permute.xlu0 %1191 }
 0x1e4   :  { %v719_v48 = vadd.f32 %v2387_v16, %v705_v52  ;;  %v931_v16 = vsel %vm596_vm15, %v3857_v47, %v930_v7  ;;  %v1027_v58 = vmul.f32 %v5207_v42, %v2938_v63  ;;  %v5208_v52 = vrot.slane %v3933_v10, 4 }
 0x1e5   :  { %v2427_v54 = vrot.slane %v4204_v3, 10  ;;  %v1662_v10 = vrot.slane %v3891_v45, 4  ;;  %v898_v7 = vsel %vm596_vm15, %v3855_v49, %v897_v8 }
 0x1e6   :  { %589 = vrot.lane.b32.xlu1 %v3701_v39, %s5057_s21  ;;  %690 = vrot.lane.b32.xlu0 %v3714_v56, %s5064_s18  ;;  %v766_v39 = vsel %vm462_vm13, %v3819_v38, %v765_v24  ;;  %v5204_v56 = vrot.slane %v3927_v13, 4  ;;  %v869_v38 = vadd.f32 %v865_v17, %v803_v41  ;;  %v832_v13 = vsel %vm529_vm14, %v3843_v37, %v831_v18  ;;  %v1225_v18 = vpop.permute.xlu1 %1224  ;;  %s4405_s21 = sld [smem:[#allocation9 + $0x32]] }
 0x1e7   :  { %v1697_v47 = vsel %vm4953_vm7, %v1695_v20, %v5208_v52  ;;  %v1761_v24 = vrot.slane %v3903_v27, 4  ;;  %v963_v17 = vsel %vm4953_vm7, %v961_v61, %v5210_v29  ;;  %v5212_v20 = vrot.slane %v3943_v22, 4 }
 0x1e8   :  { %v996_v55 = vsel %vm4953_vm7, %v994_v46, %v5204_v56  ;;  %v770_v46 = vadd.f32 %v766_v39, %v719_v48  ;;  %v935_v5 = vadd.f32 %v931_v16, %v869_v38  ;;  %v5211_v48 = vrot.slane %v3945_v31, 4  ;;  %v5214_v31 = vld [vmem:[#allocation75_spill] sm:$0xff]  ;;  %v5215_v16 = vld [vmem:[#allocation76_spill] sm:$0xff] }
 0x1e9   :  { %v997_v37 = vsel %vm663_vm0, %v3875_v12, %v996_v55  ;;  %v1698_v40 = vsel %vm1330_vm1, %v3893_v11, %v1697_v47  ;;  %v1664_v49 = vsel %vm4953_vm7, %v1662_v10, %v5212_v20  ;;  %v1893_v39 = vrot.slane %v4148_v19, 4  ;;  %v5216_v11 = vld [vmem:[#allocation78_spill] sm:$0xff]  ;;  %v1291_v10 = vpop.permute.xlu0 %1290 }
 0x1ea   :  { %656 = vrot.lane.b32.xlu1 %v3721_v21, %s5064_s18  ;;  %1357 = vrot.lane.b32.xlu0 %v3699_v44, %s5134_s1  ;;  %v5209_v21 = vstv %s3941_s9  ;;  %v836_v44 = vadd.f32 %v832_v13, %v770_v46  ;;  %v1763_v12 = vsel %vm4953_vm7, %v1761_v24, %v5211_v48  ;;  %v1001_v41 = vadd.f32 %v997_v37, %v935_v5  ;;  %v5219_v24 = vld [vmem:[#allocation80_spill] sm:$0xff]  ;;  %v5222_v5 = vld [vmem:[#allocation79_spill] sm:$0xff]  ;;  %v5226_v48 = vld [vmem:[#allocation77_spill] sm:$0xff]  ;;  %s4408_s18 = sld [smem:[#allocation9]] }
 0x1eb   :  { %v1023_v51 = vmul.f32 %v5209_v21, %v2936_v62  ;;  %v2431_v56 = vrot.slane %v1027_v58, 10  ;;  %v1827_v55 = vrot.slane %v5214_v31, 4  ;;  %v1728_v4 = vrot.slane %v5215_v16, 4 }
 0x1ec   :  { %v1096_v8 = vrot.slane %v5216_v11, 4  ;;  %v902_v30 = vadd.f32 %v898_v7, %v836_v44  ;;  %v1702_v22 = vadd.f32 %v1698_v40, %v1001_v41  ;;  %v1764_v42 = vsel %vm1397_vm3, %v3903_v27, %v1763_v12 }
 0x1ed   :  { %v964_v58 = vsel %vm663_vm0, %v3873_v14, %v963_v17  ;;  %v1162_v38 = vrot.slane %v4168_v28, 4  ;;  %v1665_v47 = vsel %vm1330_vm1, %v3891_v45, %v1664_v49  ;;  %v1794_v61 = vrot.slane %v4153_v0, 4  ;;  %v5224_v45 = vld [vmem:[#allocation68_spill] sm:$0xff]  ;;  %v5225_v17 = vld [vmem:[#allocation69_spill] sm:$0xff]  ;;  %v1923_v49 = vpop.permute.xlu1 %1922 }
 0x1ee   :  { %1323 = vrot.lane.b32.xlu1 %v3706_v6, %s5134_s1  ;;  %1424 = vrot.lane.b32.xlu0 %v5213_v36, %s5151_s11  ;;  %v5217_v6 = vld [vmem:[#allocation81_spill] sm:$0xff]  ;;  %v5220_v46 = vrot.slane %v5219_v24, 4  ;;  %v5221_v27 = vrot.slane %v4031_v60, 4  ;;  %v5223_v7 = vrot.slane %v5222_v5, 4  ;;  %v1959_v44 = vrot.slane %v4195_v15, 4  ;;  %v1258_v24 = vpop.permute.xlu0 %1257 }
 0x1ef   :  { %v5218_v13 = vrot.slane %v5217_v6, 4  ;;  %v1228_v29 = vrot.slane %v1225_v18, 4  ;;  %v1063_v12 = vrot.slane %v5226_v48, 4  ;;  %v1768_v40 = vadd.f32 %v1764_v42, %v1702_v22  ;;  %v5230_v22 = vld [vmem:[#allocation84_spill] sm:$0xff] }
 0x1f0   :  { %v1098_v37 = vsel %vm4953_vm7, %v1096_v8, %v5220_v46  ;;  %v1895_v14 = vsel %vm4953_vm7, %v1893_v39, %v5221_v27  ;;  %v1730_v21 = vsel %vm4953_vm7, %v1728_v4, %v5223_v7  ;;  %v968_v20 = vadd.f32 %v964_v58, %v902_v30 }
 0x1f1   :  { %v1829_v52 = vsel %vm4953_vm7, %v1827_v55, %v5218_v13  ;;  %v1037_v60 = vadd.f32 %v2431_v56, %v1023_v51  ;;  %v1099_v39 = vsel %vm462_vm13, %v5216_v11, %v1098_v37  ;;  %v5227_v36 = vrot.slane %v4000_v43, 4  ;;  %v5236_v37 = vld [vmem:[#allocation83_spill] sm:$0xff] }
 0x1f2   :  { %1390 = vrot.lane.b32.xlu1 %v5224_v45, %s5151_s11  ;;  %1491 = vrot.lane.b32.xlu0 %v5225_v17, %s5155_s14  ;;  %v1830_v41 = vsel %vm1464_vm4, %v5214_v31, %v1829_v52  ;;  %v1860_v4 = vrot.slane %v4216_v26, 4  ;;  %v1896_v8 = vsel %vm1531_vm5, %v4148_v19, %v1895_v14  ;;  %v1669_v6 = vadd.f32 %v1665_v47, %v968_v20  ;;  %v5232_v19 = vld [vmem:[#allocation70_spill] sm:$0xff]  ;;  %v5239_v20 = vld [vmem:[#allocation72_spill] sm:$0xff]  ;;  %s2779_s11 = smov 42  }
 0x1f3   :  { %v1164_v55 = vsel %vm4953_vm7, %v1162_v38, %v5227_v36  ;;  %v1731_v51 = vsel %vm1397_vm3, %v5215_v16, %v1730_v21  ;;  %v5228_v56 = vrot.slane %v3998_v50, 4  ;;  %v1129_v30 = vrot.slane %v4165_v57, 4  ;;  %v5233_v16 = vld [vmem:[#allocation71_spill] sm:$0xff]  ;;  %v5234_v50 = vld [vmem:[#allocation82_spill] sm:$0xff] }
 0x1f4   :  { %v5229_v11 = vrot.slane %v4085_v2, 4  ;;  %v5231_v42 = vrot.slane %v5230_v22, 4  ;;  %v1926_v38 = vrot.slane %v1923_v49, 4  ;;  %v5235_v13 = vrot.slane %v5234_v50, 4 }
 0x1f5   :  { %v1796_v31 = vsel %vm4953_vm7, %v1794_v61, %v5228_v56  ;;  %v1834_v47 = vadd.f32 %v1830_v41, %v1768_v40  ;;  %v1103_v61 = vadd.f32 %v1099_v39, %v1037_v60  ;;  %v1165_v2 = vsel %vm529_vm14, %v4168_v28, %v1164_v55  ;;  %v5240_v60 = vld [vmem:[#allocation73_spill] sm:$0xff] }
 0x1f6   :  { %v1961_v43 = vsel %vm4953_vm7, %v1959_v44, %v5229_v11  ;;  %v1230_v58 = vsel %vm4953_vm7, %v1228_v29, %v5231_v42  ;;  %1457 = vrot.lane.b32.xlu1 %v5232_v19, %s5155_s14  ;;  %1558 = vrot.lane.b32.xlu0 %v5233_v16, %s5110_s20  ;;  %v1065_v52 = vsel %vm4953_vm7, %v1063_v12, %v5235_v13  ;;  %v5237_v27 = vrot.slane %v5236_v37, 4  ;;  %v5243_v42 = vld [vmem:[#allocation33_spill] sm:$0xff]  ;;  %s2781_s14 = smov 38  }
 0x1f7   :  { %v1797_v46 = vsel %vm1464_vm4, %v4153_v0, %v1796_v31  ;;  %v1195_v5 = vrot.slane %v4251_v1, 4  ;;  %v1294_v7 = vrot.slane %v1291_v10, 4  ;;  %v1900_v21 = vadd.f32 %v1896_v8, %v1834_v47 }
 0x1f8   :  { %v1862_v14 = vsel %vm4953_vm7, %v1860_v4, %v5237_v27  ;;  %v1735_v44 = vadd.f32 %v1731_v51, %v1669_v6  ;;  %v1962_v29 = vsel %vm1598_vm6, %v4195_v15, %v1961_v43  ;;  %v1231_v45 = vsel %vm596_vm15, %v1225_v18, %v1230_v58  ;;  %v4385_v51 = vpop.permute.xlu1 %524 }
 0x1f9   :  { %v5238_v28 = vrot.slane %v4033_v32, 4  ;;  %v1169_v12 = vadd.f32 %v1165_v2, %v1103_v61  ;;  %v1928_v0 = vsel %vm4953_vm7, %v1926_v38, %v1927_v9  ;;  %v1261_v40 = vrot.slane %v1258_v24, 4 }
 0x1fa   :  { %1524 = vrot.lane.b32.xlu1 %v5239_v20, %s5110_s20  ;;  %1625 = vrot.lane.b32.xlu0 %v5240_v60, %s5101_s27  ;;  %v1801_v41 = vadd.f32 %v1797_v46, %v1735_v44  ;;  %v1019_v15 = vadd.f32 %v2427_v54, %v4232_v34  ;;  %v1066_v32 = vsel %vm462_vm13, %v5226_v48, %v1065_v52  ;;  %v5241_v9 = vrot.slane %v4087_v59, 4  ;;  %v5242_v59 = vld [vmem:[#allocation74_spill] sm:$0xff]  ;;  %s4397_s20 = sld [smem:[#allocation9 + $0x4b]] }
 0x1fb   :  { %v1131_v17 = vsel %vm4953_vm7, %v1129_v30, %v5238_v28  ;;  %v1863_v25 = vsel %vm1531_vm5, %v4216_v26, %v1862_v14  ;;  %v1966_v18 = vadd.f32 %v1962_v29, %v1900_v21  ;;  %v1235_v36 = vadd.f32 %v1231_v45, %v1169_v12 }
 0x1fc   :  { %v1197_v39 = vsel %vm4953_vm7, %v1195_v5, %v5241_v9  ;;  %v1296_v55 = vsel %vm4953_vm7, %v1294_v7, %v1295_v33  ;;  %v1132_v3 = vsel %vm529_vm14, %v4165_v57, %v1131_v17  ;;  %v1929_v34 = vsel %vm1598_vm6, %v1923_v49, %v1928_v0 }
 0x1fd   :  { %v1070_v54 = vadd.f32 %v1066_v32, %v1019_v15  ;;  %v1867_v48 = vadd.f32 %v1863_v25, %v1801_v41  ;;  %v1263_v26 = vsel %vm4953_vm7, %v1261_v40, %v1262_v35  ;;  %v1198_v23 = vsel %vm596_vm15, %v4251_v1, %v1197_v39  ;;  %v4383_v35 = vpop.permute.xlu0 %491 }
 0x1fe   :  { %1591 = vrot.lane.b32.xlu1 %v5242_v59, %s5101_s27  ;;  %2020 = vrot.lane.b32.xlu0 %v1966_v18, %s2767_s13  ;;  %v1297_v33 = vsel %vm663_vm0, %v1291_v10, %v1296_v55  ;;  %v1264_v49 = vsel %vm663_vm0, %v1258_v24, %v1263_v26  ;;  %v4389_v10 = vpop.permute.xlu1 %591  ;;  %v403_v19 = vstv %s4399_s4  ;;  %v494_v13 = vrot.slane %v4383_v35, 4  ;;  %v5244_v24 = vld [vmem:[#allocation36_spill] sm:$0xff] }
 0x1ff   :  { %v1136_v4 = vadd.f32 %v1132_v3, %v1070_v54  ;;  %v1301_v57 = vadd.f32 %v1297_v33, %v1235_v36  ;;  %v1933_v8 = vadd.f32 %v1929_v34, %v1867_v48  ;;  %v405_v16 = vmul.f32 %v403_v19, %v5243_v42 }
 0x200   :  { %v421_v22 = vstv %s4397_s20  ;;  %v417_v47 = vstv %s4405_s21  ;;  %v497_v14 = vsel %vm462_vm13, %v4383_v35, %v494_v13  ;;  %v399_v5 = vstv %s4408_s18 }
 0x201   :  { %v1202_v6 = vadd.f32 %v1198_v23, %v1136_v4  ;;  %v4387_v1 = vpop.permute.xlu0 %456  ;;  %v423_v58 = vmul.f32 %v421_v22, %v5243_v42  ;;  %v419_v46 = vmul.f32 %v417_v47, %v5244_v24  ;;  %v2348_v37 = vrot.slane %v405_v16, 10 }
 0x202   :  { %1970 = vrot.lane.b32.xlu1 %v1933_v8, %s2767_s13  ;;  %2035 = vrot.lane.b32.xlu0 %v1301_v57, %s2768_s0  ;;  %v4393_v31 = vpop.permute.xlu1 %658  ;;  %v459_v61 = vrot.slane %v4387_v1, 4  ;;  %v401_v44 = vmul.f32 %v399_v5, %v5244_v24  ;;  %v527_v40 = vrot.slane %v4385_v51, 4  ;;  %v594_v39 = vrot.slane %v4389_v10, 4 }
 0x203   :  { %v1268_v53 = vadd.f32 %v1264_v49, %v1202_v6  ;;  %v2352_v52 = vrot.slane %v423_v58, 10  ;;  %v661_v54 = vrot.slane %v4393_v31, 4 }
 0x204   :  { %v464_v45 = vsel %vm462_vm13, %v4387_v1, %v459_v61  ;;  %v415_v0 = vadd.f32 %v2348_v37, %v401_v44  ;;  %v531_v9 = vsel %vm529_vm14, %v4385_v51, %v527_v40  ;;  %v598_v26 = vsel %vm596_vm15, %v4389_v10, %v594_v39 }
 0x205   :  { %v4391_v56 = vpop.permute.xlu0 %558  ;;  %v433_v21 = vadd.f32 %v2352_v52, %v419_v46  ;;  %v665_v58 = vsel %vm663_vm0, %v4393_v31, %v661_v54 }
 0x206   :  { %1986 = vrot.lane.b32.xlu1 %v1268_v53, %s2768_s0  ;;  %v4401_v11 = vpop.permute.xlu1 %1359  ;;  %v561_v2 = vrot.slane %v4391_v56, 4  ;;  %v468_v60 = vadd.f32 %v464_v45, %v415_v0 }
 0x207   :  { %v501_v12 = vadd.f32 %v497_v14, %v433_v21  ;;  %v1362_v36 = vrot.slane %v4401_v11, 4 }
 0x208   :  { %v564_v28 = vsel %vm529_vm14, %v4391_v56, %v561_v2  ;;  %v535_v55 = vadd.f32 %v531_v9, %v468_v60 }
 0x209   :  { %v4395_v30 = vpop.permute.xlu0 %625  ;;  %v568_v41 = vadd.f32 %v564_v28, %v501_v12  ;;  %v1365_v59 = vsel %vm1330_vm1, %v4401_v11, %v1362_v36 }
 0x20a   :  { %v4413_v38 = vpop.permute.xlu1 %1325  ;;  %v628_v7 = vrot.slane %v4395_v30, 4  ;;  %v602_v4 = vadd.f32 %v598_v26, %v535_v55 }
 0x20b   :  { %v1328_v23 = vrot.slane %v4413_v38, 4 }
 0x20c   :  { %v631_v20 = vsel %vm596_vm15, %v4395_v30, %v628_v7  ;;  %v669_v14 = vadd.f32 %v665_v58, %v602_v4 }
 0x20d   :  { %v4403_v43 = vpop.permute.xlu0 %692  ;;  %v635_v25 = vadd.f32 %v631_v20, %v568_v41  ;;  %v1332_v16 = vsel %vm1330_vm1, %v4413_v38, %v1328_v23 }
 0x20e   :  { %v4428_v27 = vpop.permute.xlu1 %1392  ;;  %v695_v17 = vrot.slane %v4403_v43, 4  ;;  %v1336_v0 = vadd.f32 %v1332_v16, %v669_v14 }
 0x20f   :  { %v4949_v49 = vrot.slane %v4428_v27, 4 }
 0x210   :  { %v698_v32 = vsel %vm663_vm0, %v4403_v43, %v695_v17 }
 0x211   :  { %v4419_v50 = vpop.permute.xlu0 %1426  ;;  %v702_v3 = vadd.f32 %v698_v32, %v635_v25  ;;  %v1399_v45 = vsel %vm1397_vm3, %v4428_v27, %v4949_v49 }
 0x212   :  { %v4455_v15 = vpop.permute.xlu1 %1459  ;;  %v4951_v34 = vrot.slane %v4419_v50, 4  ;;  %v1403_v55 = vadd.f32 %v1399_v45, %v1336_v0  ;;  %v4940_v0 = vstv %s4516_s22 }
 0x213   :  { %v1369_v57 = vadd.f32 %v1365_v59, %v702_v3  ;;  %v4947_v52 = vrot.slane %v4455_v15, 4 }
 0x214   :  { %v1432_v6 = vsel %vm1397_vm3, %v4419_v50, %v4951_v34 }
 0x215   :  { %v4439_v29 = vpop.permute.xlu0 %1493  ;;  %v1436_v21 = vadd.f32 %v1432_v6, %v1369_v57  ;;  %v1466_v41 = vsel %vm1464_vm4, %v4455_v15, %v4947_v52 }
 0x216   :  { %v4471_v48 = vpop.permute.xlu1 %1526  ;;  %v4950_v33 = vrot.slane %v4439_v29, 4  ;;  %v1470_v4 = vadd.f32 %v1466_v41, %v1403_v55 }
 0x217   :  { %v4945_v28 = vrot.slane %v4471_v48, 4 }
 0x218   :  { %v1499_v46 = vsel %vm1464_vm4, %v4439_v29, %v4950_v33 }
 0x219   :  { %v4461_v18 = vpop.permute.xlu0 %1560  ;;  %v1503_v20 = vadd.f32 %v1499_v46, %v1436_v21  ;;  %v1533_v26 = vsel %vm1531_vm5, %v4471_v48, %v4945_v28 }
 0x21a   :  { %v4948_v53 = vrot.slane %v4461_v18, 4  ;;  %v4505_v44 = vpop.permute.xlu1 %1593  ;;  %v1537_v21 = vadd.f32 %v1533_v26, %v1470_v4 }
 0x21b   :  { %v4943_v32 = vrot.slane %v4505_v44, 4 }
 0x21c   :  { %v1566_v12 = vsel %vm1531_vm5, %v4461_v18, %v4948_v53 }
 0x21d   :  { %v4483_v8 = vpop.permute.xlu0 %1627  ;;  %v1570_v3 = vadd.f32 %v1566_v12, %v1503_v20  ;;  %v1600_v16 = vsel %vm1598_vm6, %v4505_v44, %v4943_v32 }
 0x21e   :  { %v4946_v37 = vrot.slane %v4483_v8, 4  ;;  %v1604_v41 = vadd.f32 %v1600_v16, %v1537_v21 }
 0x220   :  { %v1633_v25 = vsel %vm1598_vm6, %v4483_v8, %v4946_v37 }
 0x221   :  { %v1637_v57 = vadd.f32 %v1633_v25, %v1570_v3 }
 0x244   :  { %v4518_v60 = vpop.permute.xlu0 %2022 }
 0x245   :  { %v4941_v9 = vrot.slane %v4518_v60, 4 }
 0x247   :  { %v2028_v59 = vsel %vm1977_vm8, %v4518_v60, %v4941_v9 }
 0x248   :  { %v4540_v6 = vpop.permute.xlu1 %1972  ;;  %v4542_v58 = vpop.permute.xlu0 %2037  ;;  %v2032_v45 = vadd.f32 %v2028_v59, %v1637_v57  ;;  %v4944_v57 = vstv %s4538_s3 }
 0x249   :  { %v4938_v46 = vrot.slane %v4540_v6, 4  ;;  %v4939_v14 = vrot.slane %v4542_v58, 4 }
 0x24b   :  { %v1979_v12 = vsel %vm1977_vm8, %v4540_v6, %v4938_v46  ;;  %v2043_v20 = vsel %vm1993_vm9, %v4542_v58, %v4939_v14 }
 0x24c   :  { %v2047_v25 = vadd.f32 %v2043_v20, %v2032_v45  ;;  %v4559_v55 = vpop.permute.xlu1 %1988  ;;  %v490_v3 = vpop.permute.xlu0 %489  ;;  %v1983_v59 = vadd.f32 %v1979_v12, %v1604_v41 }
 0x24d   :  { %v4942_v26 = vrot.slane %v4559_v55, 4  ;;  %v493_v9 = vrot.slane %v490_v3, 4 }
 0x24e   :  { %v4564_v4 = vadd.f32 %v4940_v0, %v2047_v25  ;;  %v422_v0 = vmul.f32 %v421_v22, %v2938_v63  ;;  %v418_v22 = vmul.f32 %v417_v47, %v2936_v62 }
 0x24f   :  { %v1995_v46 = vsel %vm1993_vm9, %v4559_v55, %v4942_v26 }
 0x250   :  { %v2549_v16 = vmul.f32 -1.442695, %v4564_v4  ;;  %v1999_v21 = vadd.f32 %v1995_v46, %v1983_v59  ;;  %v455_v45 = vpop.permute.xlu1 %454  ;;  %v557_v20 = vpop.permute.xlu0 %556  ;;  %v404_v46 = vmul.f32 %v403_v19, %v2938_v63  ;;  %v2351_v59 = vrot.slane %v422_v0, 10 }
 0x251   :  { %v560_v28 = vrot.slane %v557_v20, 4  ;;  %v400_v0 = vmul.f32 %v399_v5, %v2936_v62 }
 0x252   :  { %2620 = vpow2.f32 %v2549_v16  ;;  %v4574_v14 = vadd.f32 %v4944_v57, %v1999_v21  ;;  %v495_v21 = vsel %vm4953_vm7, %v493_v9, %v494_v13  ;;  %v458_v57 = vrot.slane %v455_v45, 4 }
 0x253   :  { %v2347_v49 = vrot.slane %v404_v46, 10  ;;  %v432_v33 = vadd.f32 %v2351_v59, %v418_v22  ;;  %v496_v19 = vsel %vm462_vm13, %v490_v3, %v495_v21  ;;  %v562_v9 = vsel %vm4953_vm7, %v560_v28, %v561_v2 }
 0x254   :  { %v2546_v12 = vmul.f32 -1.442695, %v4574_v14  ;;  %v523_v41 = vpop.permute.xlu1 %522  ;;  %v624_v25 = vpop.permute.xlu0 %623  ;;  %v461_v13 = vsel %vm4953_vm7, %v458_v57, %v459_v61  ;;  %v563_v56 = vsel %vm529_vm14, %v557_v20, %v562_v9 }
 0x255   :  { %v627_v53 = vrot.slane %v624_v25, 4  ;;  %v414_v21 = vadd.f32 %v2347_v49, %v400_v0  ;;  %v500_v1 = vadd.f32 %v496_v19, %v432_v33  ;;  %v463_v61 = vsel %vm462_vm13, %v455_v45, %v461_v13 }
 0x256   :  { %2622 = vpow2.f32 %v2546_v12  ;;  %vm2149_vm13 = vcmask 572416  }
 0x257   :  { %v629_v3 = vsel %vm4953_vm7, %v627_v53, %v628_v7  ;;  %v467_v20 = vadd.f32 %v463_v61, %v414_v21 }
 0x258   :  { %v590_v26 = vpop.permute.xlu1 %589  ;;  %v691_v32 = vpop.permute.xlu0 %690  ;;  %v630_v28 = vsel %vm596_vm15, %v624_v25, %v629_v3 }
 0x259   :  { %v694_v47 = vrot.slane %v691_v32, 4  ;;  %v593_v59 = vrot.slane %v590_v26, 4 }
 0x25b   :  { %v696_v30 = vsel %vm4953_vm7, %v694_v47, %v695_v17  ;;  %v595_v33 = vsel %vm4953_vm7, %v593_v59, %v594_v39 }
 0x25c   :  { %v2621_v16 = vpop.eup %2620  ;;  %v657_v37 = vpop.permute.xlu1 %656  ;;  %v697_v43 = vsel %vm663_vm0, %v691_v32, %v696_v30  ;;  %v597_v19 = vsel %vm596_vm15, %v590_v26, %v595_v33  ;;  %vm2199_vm15 = vcmask 293888  }
 0x25d   :  { %v1358_v12 = vpop.permute.xlu0 %1357  ;;  %v2059_v52 = vadd.f32 1.0, %v2621_v16  ;;  %v526_v16 = vrot.slane %v523_v41, 4  ;;  %v660_v7 = vrot.slane %v657_v37, 4 }
 0x25e   :  { %v1361_v5 = vrot.slane %v1358_v12, 4 }
 0x25f   :  { %2624 = vrcp.f32 %v2059_v52  ;;  %v528_v2 = vsel %vm4953_vm7, %v526_v16, %v527_v40  ;;  %v567_v40 = vadd.f32 %v563_v56, %v500_v1  ;;  %v662_v10 = vsel %vm4953_vm7, %v660_v7, %v661_v54 }
 0x260   :  { %v2623_v35 = vpop.eup %2622  ;;  %v1324_v34 = vpop.permute.xlu1 %1323  ;;  %v1363_v49 = vsel %vm4953_vm7, %v1361_v5, %v1362_v36  ;;  %v530_v25 = vsel %vm529_vm14, %v523_v41, %v528_v2  ;;  %v5245_v41 = vrot.slane %v4419_v50, 4  ;;  %v664_v54 = vsel %vm663_vm0, %v657_v37, %v662_v10 }
 0x261   :  { %v1425_v46 = vpop.permute.xlu0 %1424  ;;  %v2011_v52 = vadd.f32 1.0, %v2623_v35  ;;  %v1327_v51 = vrot.slane %v1324_v34, 4  ;;  %v634_v22 = vadd.f32 %v630_v28, %v567_v40  ;;  %v1364_v11 = vsel %vm1330_vm1, %v1358_v12, %v1363_v49 }
 0x262   :  { %v1428_v45 = vrot.slane %v1425_v46, 4  ;;  %v534_v31 = vadd.f32 %v530_v25, %v467_v20  ;;  %v5246_v12 = vrot.slane %v4439_v29, 4  ;;  %v5248_v37 = vrot.slane %v4461_v18, 4 }
 0x263   :  { %2626 = vrcp.f32 %v2011_v52  ;;  %v1329_v35 = vsel %vm4953_vm7, %v1327_v51, %v1328_v23  ;;  %v701_v16 = vadd.f32 %v697_v43, %v634_v22  ;;  %v5249_v7 = vrot.slane %v4455_v15, 4 }
 0x264   :  { %v1391_v53 = vpop.permute.xlu1 %1390  ;;  %v1430_v32 = vsel %vm4953_vm7, %v1428_v45, %v5245_v41  ;;  %v601_v38 = vadd.f32 %v597_v19, %v534_v31  ;;  %v1331_v23 = vsel %vm1330_vm1, %v1324_v34, %v1329_v35  ;;  %v5251_v15 = vrot.slane %v4471_v48, 4 }
 0x265   :  { %v1492_v57 = vpop.permute.xlu0 %1491  ;;  %v1394_v13 = vrot.slane %v1391_v53, 4  ;;  %v1368_v3 = vadd.f32 %v1364_v11, %v701_v16  ;;  %v1431_v50 = vsel %vm1397_vm3, %v1425_v46, %v1430_v32  ;;  %v5252_v11 = vrot.slane %v4505_v44, 4 }
 0x266   :  { %v1495_v17 = vrot.slane %v1492_v57, 4  ;;  %v668_v28 = vadd.f32 %v664_v54, %v601_v38  ;;  %v5255_v38 = vrot.slane %v4542_v58, 4  ;;  %vm2201_vm1 = vcmask 441344  }
 0x267   :  { %v1435_v46 = vadd.f32 %v1431_v50, %v1368_v3 }
 0x268   :  { %v1458_v39 = vpop.permute.xlu1 %1457  ;;  %v1497_v47 = vsel %vm4953_vm7, %v1495_v17, %v5246_v12  ;;  %v1335_v18 = vadd.f32 %v1331_v23, %v668_v28 }
 0x269   :  { %v1559_v36 = vpop.permute.xlu0 %1558  ;;  %v2625_v0 = vpop.eup %2624  ;;  %v1461_v52 = vrot.slane %v1458_v39, 4  ;;  %v1498_v34 = vsel %vm1464_vm4, %v1492_v57, %v1497_v47  ;;  %v5254_v47 = vrot.slane %v4540_v6, 4  ;;  %v5257_v6 = vrot.slane %v4559_v55, 4 }
 0x26a   :  { %v1562_v9 = vrot.slane %v1559_v36, 4  ;;  %v2065_v26 = vmul.f32 %v2625_v0, %v4564_v4  ;;  %v5247_v4 = vrot.slane %v4428_v27, 4  ;;  %v5250_v27 = vrot.slane %v4483_v8, 4 }
 0x26b   :  { %v1463_v33 = vsel %vm4953_vm7, %v1461_v52, %v5249_v7  ;;  %v1502_v20 = vadd.f32 %v1498_v34, %v1435_v46  ;;  %v5253_v0 = vrot.slane %v4518_v60, 4 }
 0x26c   :  { %v1525_v59 = vpop.permute.xlu1 %1524  ;;  %v1396_v1 = vsel %vm4953_vm7, %v1394_v13, %v5247_v4  ;;  %v1564_v29 = vsel %vm4953_vm7, %v1562_v9, %v5248_v37  ;;  %v2101_v30 = vcombine.high %v2065_v26, %v2065_v26  ;;  %v1465_v17 = vsel %vm1464_vm4, %v1458_v39, %v1463_v33 }
 0x26d   :  { %v1626_v5 = vpop.permute.xlu0 %1625  ;;  %v2627_v21 = vpop.eup %2626  ;;  %v1528_v61 = vrot.slane %v1525_v59, 4  ;;  %v1398_v51 = vsel %vm1397_vm3, %v1391_v53, %v1396_v1  ;;  %v1565_v45 = vsel %vm1531_vm5, %v1559_v36, %v1564_v29  ;;  %v2104_v13 = vrot.slane %v2065_v26, 2 }
 0x26e   :  { %v1629_v56 = vrot.slane %v1626_v5, 4  ;;  %v2017_v2 = vmul.f32 %v2627_v21, %v4574_v14  ;;  %v2105_v53 = vrot.slane %v2101_v30, 2  ;;  %v1402_v19 = vadd.f32 %v1398_v51, %v1335_v18 }
 0x26f   :  { %v1530_v25 = vsel %vm4953_vm7, %v1528_v61, %v5251_v15  ;;  %v1569_v10 = vadd.f32 %v1565_v45, %v1502_v20  ;;  %v5256_v1 = vstv %s4516_s22  ;;  %v2069_v20 = vcombine.high %v5244_v24, %v5244_v24 }
 0x270   :  { %v1631_v49 = vsel %vm4953_vm7, %v1629_v56, %v5250_v27  ;;  %v1592_v40 = vpop.permute.xlu1 %1591  ;;  %2088 = vrot.lane.b32.xlu1 %v2017_v2, %s2769_s7  ;;  %v2081_v57 = vcombine.low %v2017_v2, %v2017_v2  ;;  %v1532_v35 = vsel %vm1531_vm5, %v1525_v59, %v1530_v25  ;;  %v1469_v9 = vadd.f32 %v1465_v17, %v1402_v19 }
 0x271   :  { %v2021_v14 = vpop.permute.xlu0 %2020  ;;  %v1595_v43 = vrot.slane %v1592_v40, 4  ;;  %v1632_v22 = vsel %vm1598_vm6, %v1626_v5, %v1631_v49  ;;  %v5258_v2 = vstv %s4538_s3  ;;  %v2075_v15 = vcombine.high %v5243_v42, %v5243_v42 }
 0x272   :  { %v2024_v8 = vrot.slane %v2021_v14, 4  ;;  %2086 = vrot.lane.b32.xlu0 %v2081_v57, %s2769_s7  ;;  %v1636_v31 = vadd.f32 %v1632_v22, %v1569_v10  ;;  %v1536_v60 = vadd.f32 %v1532_v35, %v1469_v9  ;;  %vm2210_vm3 = vcmask 130048  }
 0x273   :  { %v1597_v36 = vsel %vm4953_vm7, %v1595_v43, %v5252_v11  ;;  %vm2203_vm4 = vcmask 588800   ;;  %vm2212_vm5 = vcmask 277504  }
 0x274   :  { %v2026_v48 = vsel %vm4953_vm7, %v2024_v8, %v5253_v0  ;;  %v1971_v39 = vpop.permute.xlu1 %1970  ;;  %2112 = vrot.lane.b32.xlu1 %v2105_v53, %s2769_s7  ;;  %v1599_v54 = vsel %vm1598_vm6, %v1592_v40, %v1597_v36  ;;  %v2124_v8 = vsel %vm228_vm2, %v2069_v20, %v2075_v15  ;;  %v2121_v0 = vsel %vm228_vm2, %v2936_v62, %v2938_v63 }
 0x275   :  { %v2027_v41 = vsel %vm1977_vm8, %v2021_v14, %v2026_v48  ;;  %v2036_v32 = vpop.permute.xlu0 %2035  ;;  %v1974_v16 = vrot.slane %v1971_v39, 4  ;;  %v1603_v59 = vadd.f32 %v1599_v54, %v1536_v60  ;;  %v2123_v60 = vsel %vm228_vm2, %v5244_v24, %v5243_v42 }
 0x276   :  { %v2039_v44 = vrot.slane %v2036_v32, 4  ;;  %2110 = vrot.lane.b32.xlu0 %v2104_v13, %s2769_s7  ;;  %v2031_v12 = vadd.f32 %v2027_v41, %v1636_v31  ;;  %vm2205_vm6 = vcmask 736256  }
 0x277   :  { %v1976_v52 = vsel %vm4953_vm7, %v1974_v16, %v5254_v47 }
 0x278   :  { %v2041_v26 = vsel %vm4953_vm7, %v2039_v44, %v5255_v38  ;;  %v1978_v3 = vsel %vm1977_vm8, %v1971_v39, %v1976_v52  ;;  %v1987_v50 = vpop.permute.xlu1 %1986  ;;  %v2068_v39 = vcombine.high %v2936_v62, %v2936_v62 }
 0x279   :  { %v2042_v23 = vsel %vm1993_vm9, %v2036_v32, %v2041_v26  ;;  %v1990_v21 = vrot.slane %v1987_v50, 4  ;;  %v1982_v4 = vadd.f32 %v1978_v3, %v1603_v59  ;;  %v2074_v32 = vcombine.high %v2938_v63, %v2938_v63 }
 0x27a   :  { %v2046_v5 = vadd.f32 %v2042_v23, %v2031_v12 }
 0x27b   :  { %v1992_v29 = vsel %vm4953_vm7, %v1990_v21, %v5257_v6  ;;  %v2122_v16 = vsel %vm228_vm2, %v2068_v39, %v2074_v32 }
 0x27c   :  { %v2050_v37 = vadd.f32 %v5256_v1, %v2046_v5  ;;  %v1994_v61 = vsel %vm1993_vm9, %v1987_v50, %v1992_v29  ;;  %vm2214_vm9 = vcmask 424960  }
 0x27d   :  { %v1998_v56 = vadd.f32 %v1994_v61, %v1982_v4 }
 0x27e   :  { %v2548_v58 = vmul.f32 -1.442695, %v2050_v37 }
 0x27f   :  { %v2002_v28 = vadd.f32 %v5258_v2, %v1998_v56 }
 0x280   :  { %2628 = vpow2.f32 %v2548_v58 }
 0x281   :  { %v2545_v34 = vmul.f32 -1.442695, %v2002_v28 }
 0x283   :  { %2630 = vpow2.f32 %v2545_v34 }
 0x28a   :  { %v2629_v30 = vpop.eup %2628 }
 0x28b   :  { %v2058_v46 = vadd.f32 1.0, %v2629_v30 }
 0x28d   :  { %2632 = vrcp.f32 %v2058_v46  ;;  %v2631_v7 = vpop.eup %2630 }
 0x28e   :  { %v2010_v33 = vadd.f32 1.0, %v2631_v7 }
 0x290   :  { %2634 = vrcp.f32 %v2010_v33 }
 0x297   :  { %v2633_v27 = vpop.eup %2632 }
 0x298   :  { %v2064_v49 = vmul.f32 %v2633_v27, %v2050_v37 }
 0x29a   :  { %v2635_v55 = vpop.eup %2634  ;;  %v2100_v51 = vcombine.high %v2064_v49, %v2064_v49  ;;  %v2102_v14 = vrot.slane %v2064_v49, 2 }
 0x29b   :  { %v2016_v18 = vmul.f32 %v2635_v55, %v2002_v28 }
 0x29c   :  { %v2103_v40 = vrot.slane %v2100_v51, 2 }
 0x29d   :  { %2084 = vrot.lane.b32.xlu1 %v2016_v18, %s2769_s7  ;;  %v2080_v45 = vcombine.low %v2016_v18, %v2016_v18 }
 0x29f   :  { %2082 = vrot.lane.b32.xlu0 %v2080_v45, %s2769_s7 }
 0x2a1   :  { %2108 = vrot.lane.b32.xlu1 %v2103_v40, %s2769_s7 }
 0x2a3   :  { %2106 = vrot.lane.b32.xlu0 %v2102_v14, %s2769_s7 }
 0x2e2   :  { %v2089_v57 = vpop.permute.xlu1 %2088 }
 0x2e4   :  { %v2087_v25 = vpop.permute.xlu0 %2086 }
 0x2e5   :  { %v2093_v43 = vsel %vm2090_vm10, %v2087_v25, %v2089_v57 }
 0x2e6   :  { %v2113_v17 = vpop.permute.xlu1 %2112  ;;  %v2128_v53 = vsel %vm4953_vm7, %v2124_v8, %v2093_v43 }
 0x2e8   :  { %v2111_v22 = vpop.permute.xlu0 %2110 }
 0x2e9   :  { %v2116_v19 = vsel %vm2090_vm10, %v2111_v22, %v2113_v17 }
 0x2ea   :  { %v2133_v10 = vsel %vm4952_vm11, %v2128_v53, %v2116_v19 }
 0x2eb   :  { %2226 = vrot.lane.b32.xlu1 %v2133_v10, %s2770_s16  ;;  %2223 = vrot.lane.b32.xlu0 %v2133_v10, %s2771_s8 }
 0x30f   :  { %v2085_v36 = vpop.permute.xlu1 %2084 }
 0x310   :  { %v2092_v62 = vsel %vm2090_vm10, %v2085_v36, %v2087_v25 }
 0x311   :  { %v2083_v11 = vpop.permute.xlu0 %2082  ;;  %v2127_v12 = vsel %vm4953_vm7, %v2123_v60, %v2092_v62 }
 0x312   :  { %v2125_v48 = vsel %vm4953_vm7, %v2121_v0, %v2083_v11  ;;  %v2091_v13 = vsel %vm2090_vm10, %v2083_v11, %v2085_v36 }
 0x313   :  { %v2109_v9 = vpop.permute.xlu1 %2108  ;;  %v2126_v44 = vsel %vm4953_vm7, %v2122_v16, %v2091_v13  ;;  %vm2217_vm7 = vcmask 719872  }
 0x314   :  { %v2115_v63 = vsel %vm2090_vm10, %v2109_v9, %v2111_v22 }
 0x315   :  { %v2107_v35 = vpop.permute.xlu0 %2106  ;;  %v2132_v47 = vsel %vm4952_vm11, %v2127_v12, %v2115_v63 }
 0x316   :  { %v2130_v41 = vsel %vm4952_vm11, %v2125_v48, %v2107_v35  ;;  %v2114_v31 = vsel %vm2090_vm10, %v2107_v35, %v2109_v9 }
 0x317   :  { %2138 = vrot.lane.b32.xlu1 %v2130_v41, %s2772_s19  ;;  %2135 = vrot.lane.b32.xlu0 %v2130_v41, %s2773_s5  ;;  %v2131_v54 = vsel %vm4952_vm11, %v2126_v44, %v2114_v31  ;;  %vm2207_vm11 = vcmask 883712  }
 0x31b   :  { %2145 = vrot.lane.b32.xlu1 %v2130_v41, %s2774_s23  ;;  %2141 = vrot.lane.b32.xlu0 %v2130_v41, %s2775_s24 }
 0x31f   :  { %2192 = vrot.lane.b32.xlu1 %v2133_v10, %s2776_s25  ;;  %2161 = vrot.lane.b32.xlu0 %v2131_v54, %s2777_s30 }
 0x323   :  { %2164 = vrot.lane.b32.xlu1 %v2131_v54, %s2778_s10  ;;  %2168 = vrot.lane.b32.xlu0 %v2131_v54, %s2769_s7 }
 0x327   :  { %2170 = vrot.lane.b32.xlu1 %v2132_v47, %s2769_s7  ;;  %2147 = vrot.lane.b32.xlu0 %v2131_v54, %s2774_s23 }
 0x32b   :  { %2174 = vrot.lane.b32.xlu1 %v2132_v47, %s2779_s11  ;;  %2152 = vrot.lane.b32.xlu0 %v2131_v54, %s2780_s15 }
 0x32f   :  { %2177 = vrot.lane.b32.xlu1 %v2132_v47, %s2781_s14  ;;  %2155 = vrot.lane.b32.xlu0 %v2131_v54, %s5134_s1 }
 0x333   :  { %2180 = vrot.lane.b32.xlu1 %v2132_v47, %s2782_s26  ;;  %2190 = vrot.lane.b32.xlu0 %v2132_v47, %s2776_s25 }
 0x337   :  { %2183 = vrot.lane.b32.xlu1 %v2132_v47, %s2783_s28  ;;  %2158 = vrot.lane.b32.xlu0 %v2131_v54, %s5101_s27  ;;  %s2786_s27 = smov [#allocation13]  }
 0x338   :  { %s2310_s1 = sshll.u32 %s2786_s27, 4  ;;  %s2311_s1 = int_to_ptr.vmem [resolvable:$true] %s2310_s1 }
 0x339   :  { %s2704_s9 = scalar_lea.vmem %s2311_s1, 384  ;;  %p2709_p13 = scmp.lt.s32.totalorder %s2311_s1, %s2311_s1 }
 0x33a   :  { %p2705_p12 = scmp.ne.s32.totalorder %s2311_s1, %s2704_s9  ;;  %p2710_p0 = scmp.lt.s32.totalorder %s2704_s9, %s2704_s9 }
 0x33b   :  { %2186 = vrot.lane.b32.xlu0 %v2132_v47, %s2784_s29 }
 0x33c   :  { %p2711_p1 = por %p2710_p0, %p2709_p13 }
 0x33e   :  { %p2712_p2 = pnand %p2711_p1, %p2705_p12 }
 0x35d   :  { %v2227_v42 = vpop.permute.xlu1 %2226  ;;  %v2224_v24 = vpop.permute.xlu0 %2223 }
 0x35e   :  { %v2229_v52 = vsel %vm2197_vm12, %v2224_v24, %v2227_v42 }
 0x35f   :  { %2231 = vrot.lane.b32.xlu1 %v2229_v52, %s2785_s17 }
 0x389   :  { %v2139_v38 = vpop.permute.xlu1 %2138  ;;  %v2136_v26 = vpop.permute.xlu0 %2135 }
 0x38a   :  { %v2198_v56 = vsel %vm2197_vm12, %v2136_v26, %v2139_v38  ;;  %vm2275_vm12 = vcmask 1040384  }
 0x38d   :  { %v2146_v3 = vpop.permute.xlu1 %2145  ;;  %v2142_v23 = vpop.permute.xlu0 %2141 }
 0x38e   :  { %v2200_v34 = vsel %vm2199_vm15, %v2198_v56, %v2142_v23  ;;  %vm2194_vm15 = vcmask 179200  }
 0x391   :  { %v4726_v50 = vpop.permute.xlu1 %2192  ;;  %v2162_v59 = vpop.permute.xlu0 %2161 }
 0x395   :  { %v2165_v5 = vpop.permute.xlu1 %2164  ;;  %v2169_v21 = vpop.permute.xlu0 %2168 }
 0x396   :  { %v2211_v7 = vsel %vm2210_vm3, %v2162_v59, %v2165_v5  ;;  %vm2234_vm3 = vcmask 261120  }
 0x399   :  { %v2171_v4 = vpop.permute.xlu1 %2170  ;;  %v2148_v1 = vpop.permute.xlu0 %2147 }
 0x39a   :  { %v2150_v58 = vsel %vm2149_vm13, %v2146_v3, %v2148_v1  ;;  %v2172_v30 = vsel %vm2090_vm10, %v2169_v21, %v2171_v4  ;;  %vm2282_vm10 = vcmask 1042432  }
 0x39b   :  { %v2202_v46 = vsel %vm2201_vm1, %v2200_v34, %v2150_v58  ;;  %v2213_v27 = vsel %vm2212_vm5, %v2211_v7, %v2172_v30  ;;  %vm2221_vm1 = vcmask 113664   ;;  %vm2302_vm5 = vcmask 556032  }
 0x39d   :  { %v2175_v37 = vpop.permute.xlu1 %2174  ;;  %v2153_v6 = vpop.permute.xlu0 %2152 }
 0x39e   :  { %v2204_v33 = vsel %vm2203_vm4, %v2202_v46, %v2153_v6  ;;  %v2215_v18 = vsel %vm2214_vm9, %v2213_v27, %v2175_v37 }
 0x3a1   :  { %v2178_v29 = vpop.permute.xlu1 %2177  ;;  %v2156_v61 = vpop.permute.xlu0 %2155 }
 0x3a2   :  { %v2206_v49 = vsel %vm2205_vm6, %v2204_v33, %v2156_v61  ;;  %v2216_v40 = vsel %vm2149_vm13, %v2215_v18, %v2178_v29 }
 0x3a5   :  { %v2181_v2 = vpop.permute.xlu1 %2180  ;;  %v2191_v28 = vpop.permute.xlu0 %2190 }
 0x3a6   :  { %v2218_v57 = vsel %vm2217_vm7, %v2216_v40, %v2181_v2  ;;  %v2195_v42 = vsel %vm2194_vm15, %v2191_v28, %v4726_v50 }
 0x3a9   :  { %v2159_v55 = vpop.permute.xlu0 %2158  ;;  %v2184_v51 = vpop.permute.xlu1 %2183 }
 0x3aa   :  { %v2208_v45 = vsel %vm2207_vm11, %v2206_v49, %v2159_v55  ;;  %v2219_v25 = vsel %vm1977_vm8, %v2218_v57, %v2184_v51  ;;  %vm2289_vm11 = vcmask 1044480   ;;  %vm5261_vm8 = vcmask 1045504  }
 0x3ab   :  { %v2209_v14 = vsel %vm529_vm14, %v2208_v45, %v2162_v59  ;;  %vm2296_vm14 = vcmask 1046528   ;;  %vm5262_vm13 = vmmov %vm5261_vm8 }
 0x3ac   :  { %v2239_v20 = vrot.slane %v2209_v14, 1  ;;  %v2245_v15 = vrot.slane %v2209_v14, 2  ;;  %v2251_v19 = vrot.slane %v2209_v14, 3  ;;  %v2257_v10 = vrot.slane %v2209_v14, 5  ;;  %vm5264_vm6 = vmmov %vm5261_vm8 }
 0x3ad   :  { %v2187_v43 = vpop.permute.xlu0 %2186  ;;  %v2263_v0 = vrot.slane %v2209_v14, 6  ;;  %v2269_v39 = vrot.slane %v2209_v14, 7 }
 0x3ae   :  { %v2220_v8 = vsel %vm663_vm0, %v2219_v25, %v2187_v43  ;;  %v2276_v17 = vsel %vm2275_vm12, %v2209_v14, %v2239_v20  ;;  %vm5259_vm0 = vcmask 1043456   ;;  %v2222_v24 = vsel %vm2221_vm1, %v2187_v43, %v2195_v42 }
 0x3af   :  { %v2240_v22 = vrot.slane %v2220_v8, 1  ;;  %v2246_v53 = vrot.slane %v2220_v8, 2  ;;  %v2279_v11 = vsel %vm228_vm2, %v2276_v17, %v2245_v15  ;;  %v2252_v36 = vrot.slane %v2220_v8, 3  ;;  %vm5260_vm7 = vmmov %vm5259_vm0 }
 0x3b0   :  { %v2283_v35 = vsel %vm2282_vm10, %v2279_v11, %v2251_v19  ;;  %v2258_v41 = vrot.slane %v2220_v8, 5  ;;  %v2264_v9 = vrot.slane %v2220_v8, 6  ;;  %v2270_v44 = vrot.slane %v2220_v8, 7  ;;  %vm5263_vm4 = vmmov %vm5259_vm0 }
 0x3b1   :  { %v2277_v48 = vsel %vm2275_vm12, %v2220_v8, %v2240_v22  ;;  %v2286_v13 = vsel %vm5259_vm0, %v2283_v35, %v2257_v10 }
 0x3b2   :  { %v2280_v32 = vsel %vm228_vm2, %v2277_v48, %v2246_v53  ;;  %v2290_v16 = vsel %vm2289_vm11, %v2286_v13, %v2263_v0 }
 0x3b3   :  { %v2284_v31 = vsel %vm2282_vm10, %v2280_v32, %v2252_v36  ;;  %v2293_v62 = vsel %vm5261_vm8, %v2290_v16, %v2269_v39 }
 0x3b4   :  { %v2287_v54 = vsel %vm5260_vm7, %v2284_v31, %v2258_v41  ;;  %v2297_v60 = vsel %vm2296_vm14, %v2293_v62, %v2209_v14 }
 0x3b5   :  { %v2291_v63 = vsel %vm2289_vm11, %v2287_v54, %v2264_v9  ;;  %2300 = vst [vmem:[#allocation13] sm:$0xff] %v2297_v60 }
 0x3b6   :  { %v2294_v12 = vsel %vm5262_vm13, %v2291_v63, %v2270_v44 }
 0x3b7   :  { %v2298_v47 = vsel %vm2296_vm14, %v2294_v12, %v2220_v8 }
 0x3b8   :  { %2301 = vst [vmem:[#allocation13 + $0x8] sm:$0xff] %v2298_v47 }
 0x3d1   :  { %v2232_v52 = vpop.permute.xlu1 %2231 }
 0x3d2   :  { %v2235_v38 = vsel %vm2234_vm3, %v2222_v24, %v2232_v52 }
 0x3d3   :  { %v2241_v26 = vrot.slane %v2235_v38, 1  ;;  %v2247_v3 = vrot.slane %v2235_v38, 2  ;;  %v2253_v23 = vrot.slane %v2235_v38, 3  ;;  %v2259_v5 = vrot.slane %v2235_v38, 5 }
 0x3d4   :  { %v2265_v4 = vrot.slane %v2235_v38, 6  ;;  %v2271_v37 = vrot.slane %v2235_v38, 7 }
 0x3d5   :  { %v2278_v59 = vsel %vm2275_vm12, %v2235_v38, %v2241_v26 }
 0x3d6   :  { %v2281_v21 = vsel %vm228_vm2, %v2278_v59, %v2247_v3 }
 0x3d7   :  { %v2285_v1 = vsel %vm2282_vm10, %v2281_v21, %v2253_v23 }
 0x3d8   :  { %v2288_v6 = vsel %vm5263_vm4, %v2285_v1, %v2259_v5 }
 0x3d9   :  { %v2292_v50 = vsel %vm2289_vm11, %v2288_v6, %v2265_v4 }
 0x3da   :  { %v2295_v29 = vsel %vm5264_vm6, %v2292_v50, %v2271_v37 }
 0x3db   :  { %v2299_v61 = vsel %vm2296_vm14, %v2295_v29, %v2235_v38 }
 0x3dc   :  { %2303 = vst.msk [vmem:[#allocation13 + $0x10] sm:$0xff] %vm2302_vm5, %v2299_v61 }
 0x3dd   :  { %2715 = shalt.err (!%p2712_p2)
}
 0x3de   :  { %s5265_s12 = sld [smem:[#allocation85_spill]] }
 0x3e4   :  { %s2716_s13 = scalar_lea.hbm %s5265_s12, 384 }
 0x3e5   :  { %p2717_p3 = scmp.ne.s32.totalorder %s5265_s12, %s2716_s13  ;;  %p2720_p4 = scmp.lt.u32.totalorder %s2716_s13, %s5265_s12 }
 0x3e7   :  { %p2722_p5 = pnand %p2720_p4, %p2717_p3 }
 0x3e9   :  { %2725 = shalt.err (!%p2722_p5)
}
 0x3ea   :  { %2313 = dma.vmem_to_hbm [thread:$0]  %s2311_s1, 384, %s5265_s12, [#allocation5]  }
 0x3eb   :  { %2734 = dma.done.wait [#allocation5], 384  }
 0x3ec   :  { %2735 = vsyncadd [#allocation5], 4294966912 }
 0x3ed   :  { %2317 = vsyncpa [#allocation4], 1 }
 0x3ee   :  { %2318 = vsyncpa [#allocation5], 1 }
 0x3ef   :  { %2319 = vsyncpa [#allocation6], 1 }
 0x3f0   :  { %2320 = vsyncpa [#allocation7], 1 }
 0x3f1   :  { %2321 = vsyncpa [#allocation10], 1 }

</bundles_post_ra>
